<compile_context>
chip_gen: v5e
topology: v5e:2x2
jax: 0.10.0
libtpu: 0.0.40
codegen_flags: <defaults>
</compile_context>

<pallas_src>
import math

import numpy as np

import jax
import jax.numpy as jnp
from jax.experimental import pallas as pl
from jax.experimental.pallas import tpu as pltpu

EMBED = 15
HEADS_MHA = 3
HEAD_DIM = 5          # 15 / 3
L_AC = 6              # sequence length seen by the AutoCorrelation layer
NODES = 3             # step_len / number of graph nodes (= number of chunks)
HEADS_GCN = 4
NEG_SLOPE = 0.2       # LeakyReLU slope for the graph-attention logits
# 48 MiB: leaves double-buffer + compiler headroom on v7x (64 MiB physical);
# well under the 128 MiB of v5e/v6e.
VMEM_LIMIT = 48 * 1024 * 1024


def _pick_tile(n, pref, mult):
    """Largest multiple of `mult` <= pref that divides n, else n (full dim)."""
    t = (min(pref, n) // mult) * mult
    while t >= mult:
        if n % t == 0:
            return t
        t -= mult
    # TODO(synk): pad N instead of falling back to a full-size tile for very
    # large token counts that have no aligned divisor.
    return n


def _build_constants():
    # pairing matrix: logits[:, (i*3+j)*4+h] = src_i[:,h] + dst_j[:,h]
    pair = np.zeros((NODES * 2 * HEADS_GCN, NODES * NODES * HEADS_GCN), np.float32)
    for i in range(NODES):
        for j in range(NODES):
            for h in range(HEADS_GCN):
                col = (i * NODES + j) * HEADS_GCN + h
                pair[i * 2 * HEADS_GCN + h, col] = 1.0                   # src_i, head h
                pair[j * 2 * HEADS_GCN + HEADS_GCN + h, col] = 1.0       # dst_j, head h
    expand = np.zeros((HEADS_GCN, HEADS_GCN * EMBED), np.float32)        # (4, 60)
    havg = np.zeros((HEADS_GCN * EMBED, EMBED), np.float32)              # (60, 15)
    for h in range(HEADS_GCN):
        expand[h, h * EMBED:(h + 1) * EMBED] = 1.0
        havg[h * EMBED:(h + 1) * EMBED, :] = np.eye(EMBED, dtype=np.float32) / HEADS_GCN
    return pair, expand, havg


_PAIR_NP, _EXPAND_NP, _HAVG_NP = _build_constants()


# --------------------------------------------------------------------------
# Stage 1: per-chunk MultiheadAttention(15, 3), flash-tiled over key blocks,
# followed by the AutoCorrelation Q/K/V in-projection (per-token).
# grid = (chunk, q_tile, k_tile); out block resident across the k axis.
# --------------------------------------------------------------------------
def _mha_acproj_kernel(xq_ref, xk_ref, wq_ref, bq_ref, wkv_ref, bkv_ref,
                       wo_ref, bo_ref, ac_win_ref, ac_bin_ref, out_ref,
                       m_sc, l_sc, acc_sc):
    ki = pl.program_id(2)

    @pl.when(ki == 0)
    def _():
        m_sc[...] = jnp.full_like(m_sc, -jnp.inf)
        l_sc[...] = jnp.zeros_like(l_sc)
        acc_sc[...] = jnp.zeros_like(acc_sc)

    # per-chunk in-projections; 1/sqrt(head_dim) is pre-folded into wq/bq and the
    # chunk selection is pre-embedded into the (45, .) weight matrices.
    q_all = jnp.dot(xq_ref[...], wq_ref[0],
                    preferred_element_type=jnp.float32) + bq_ref[...]        # (TQ, 15)
    kv = jnp.dot(xk_ref[...], wkv_ref[0],
                 preferred_element_type=jnp.float32) + bkv_ref[...]          # (TK, 30)

    # online softmax over key blocks, per head.
    # TODO(synk): a fori_loop over heads would bound live ranges further; with
    # 3 heads and TQ=TK<=256 the (TQ,TK) f32 temporaries are well under 1 MiB.
    for h in range(HEADS_MHA):
        q = q_all[:, h * HEAD_DIM:(h + 1) * HEAD_DIM]
        k = kv[:, h * HEAD_DIM:(h + 1) * HEAD_DIM]
        v = kv[:, EMBED + h * HEAD_DIM:EMBED + (h + 1) * HEAD_DIM]
        s = jax.lax.dot_general(q, k, (((1,), (1,)), ((), ())),
                                preferred_element_type=jnp.float32)          # (TQ, TK)
        m_prev = m_sc[h]
        m_new = jnp.maximum(m_prev, jnp.max(s, axis=-1, keepdims=True))
        alpha = jnp.exp(m_prev - m_new)
        p = jnp.exp(s - m_new)
        l_sc[h] = alpha * l_sc[h] + jnp.sum(p, axis=-1, keepdims=True)
        acc_sc[h] = alpha * acc_sc[h] + jnp.dot(p, v, preferred_element_type=jnp.float32)
        m_sc[h] = m_new

    @pl.when(ki == pl.num_programs(2) - 1)
    def _():
        # exact division for the final normalization (per correctness feedback)
        heads = jnp.concatenate([acc_sc[h] / l_sc[h] for h in range(HEADS_MHA)], axis=1)
        f = jnp.dot(heads, wo_ref[...],
                    preferred_element_type=jnp.float32) + bo_ref[...]        # (TQ, 15)
        # AutoCorrelation Q/K/V in-projection (per-token; commutes with the
        # (N,15) -> (-1,6,15) regrouping consumed by the fused stage-2/3 kernel)
        out_ref[0] = jnp.dot(f, ac_win_ref[...],
                             preferred_element_type=jnp.float32) + ac_bin_ref[...]


# --------------------------------------------------------------------------
# Stage 2+3 fused: AutoCorrelation core (eval path, factor=1 -> top-1 delay)
# + AC out-projection + GCN over the 3-node per-token graph.
# grid = (n_tile,), "parallel"; tile rows are whole length-6 windows.
# --------------------------------------------------------------------------
def _ac_gcn_kernel(qkv_ref, w_vz_ref, b_z_ref, w_sd_ref, pair_ref,
                   expand_ref, havg_ref, b_out_ref, out_ref):
    tile_n = out_ref.shape[0]

    # row position within each length-6 window (hoisted constant)
    t_mod = jax.lax.broadcasted_iota(jnp.int32, (tile_n, 1), 0) % L_AC

    def roll_win(x, n):
        # within-window circular roll: result[w*6 + t] = x[w*6 + (t+n) % 6]
        if n == 0:
            return x
        up = jnp.roll(x, tile_n - n, axis=0)     # == x[r + n]      (rows with t+n < 6)
        dn = jnp.roll(x, L_AC - n, axis=0)       # == x[r + n - 6]  (rows with t+n >= 6)
        return jnp.where(t_mod < (L_AC - n), up, dn)

    z_nodes = []
    sd_nodes = []
    for c in range(NODES):
        plane = qkv_ref[c]                       # (tile_n, 45) = [Q | K | V]
        q = plane[:, :EMBED]
        k = plane[:, EMBED:2 * EMBED]
        v = plane[:, 2 * EMBED:]

        # circular cross-correlation (== irfft(rfft(Q)*conj(rfft(K)))) per window:
        #   corr[w, n] = sum_{t,e} Q[w*6+(t+n)%6, e] * K[w*6+t, e]
        # the 1/L FFT scale is monotone and dropped (only the argmax is needed).
        c_rows = jnp.concatenate(
            [jnp.sum(roll_win(q, n) * k, axis=1, keepdims=True) for n in range(L_AC)],
            axis=1)                              # (tile_n, 6): per-row contributions
        c_win = c_rows
        for m in range(1, L_AC):                 # per-window sum, broadcast to its rows
            c_win = c_win + roll_win(c_rows, m)

        # first-maximum delay (ties -> smallest lag)
        lane = jax.lax.broadcasted_iota(jnp.int32, (tile_n, L_AC), 1)
        mval = jnp.max(c_win, axis=1, keepdims=True)
        delay = jnp.min(jnp.where(c_win >= mval, lane, L_AC), axis=1, keepdims=True)

        # top_k = int(1 * ln 6) = 1 -> softmax weight == 1 -> pure circular roll of V
        v_roll = jnp.zeros_like(v)
        for n in range(L_AC):
            v_roll = v_roll + jnp.where(delay == n, 1.0, 0.0) * roll_win(v, n)

        # fused AutoCorrelation out-projection + GCN per-head transform (15 -> 60)
        z_c = jnp.dot(v_roll, w_vz_ref[...],
                      preferred_element_type=jnp.float32) + b_z_ref[...]
        z_nodes.append(z_c)
        sd_nodes.append(jnp.dot(z_c, w_sd_ref[...],
                                preferred_element_type=jnp.float32))          # (tile_n, 8)

    # ---- GCN: GAT-style multi-head attention over the 3 nodes of each token ----
    # TODO(synk): the reference GCN class body is not provided; implemented as
    # adjacency-masked multi-head graph attention matching GCN(in=15, out=15,
    # n_heads=4, step_len=3). The module's all-ones 3x3 adjacency is baked in,
    # so no mask is applied.
    sd = jnp.concatenate(sd_nodes, axis=1)                                    # (tile_n, 24)
    logits = jnp.dot(sd, pair_ref[...], preferred_element_type=jnp.float32)   # (tile_n, 36)
    logits = jnp.where(logits > 0, logits, NEG_SLOPE * logits)                # LeakyReLU

    outs = []
    for i in range(NODES):
        li = logits[:, i * NODES * HEADS_GCN:(i + 1) * NODES * HEADS_GCN]     # (tile_n, 12)
        m = jnp.maximum(jnp.maximum(li[:, :HEADS_GCN], li[:, HEADS_GCN:2 * HEADS_GCN]),
                        li[:, 2 * HEADS_GCN:])
        e = [jnp.exp(li[:, j * HEADS_GCN:(j + 1) * HEADS_GCN] - m) for j in range(NODES)]
        inv = 1.0 / (e[0] + e[1] + e[2])                                      # exact divide
        acc = jnp.zeros((tile_n, HEADS_GCN * EMBED), jnp.float32)
        for j in range(NODES):
            alpha = jnp.dot(e[j] * inv, expand_ref[...],
                            preferred_element_type=jnp.float32)               # (tile_n, 60)
            acc = acc + alpha * z_nodes[j]
        outs.append(jnp.dot(acc, havg_ref[...],
                            preferred_element_type=jnp.float32))              # (tile_n, 15)

    # single lane-dense (tile_n, 45) store (nodes concatenated along lanes)
    y = jnp.concatenate(outs, axis=1) + b_out_ref[...]
    out_ref[...] = jnp.maximum(y, 0.0)


# --------------------------------------------------------------------------
# Parameters (natural layouts; fusions are applied in the forward wrapper)
# --------------------------------------------------------------------------
def init_params(key):
    def nrm(k, shape, scale=0.1):
        return (scale * jax.random.normal(k, shape)).astype(jnp.float32)

    ks = jax.random.split(key, 12)

    # GAT-style per-head attention vectors, packed block-structured into one
    # (60, 8) matrix so the kernel gets all src/dst scores from one matmul.
    a_src = nrm(ks[9], (HEADS_GCN, EMBED))
    a_dst = nrm(ks[10], (HEADS_GCN, EMBED))
    w_sd = jnp.zeros((HEADS_GCN * EMBED, 2 * HEADS_GCN), jnp.float32)
    for h in range(HEADS_GCN):
        w_sd = w_sd.at[h * EMBED:(h + 1) * EMBED, h].set(a_src[h])
        w_sd = w_sd.at[h * EMBED:(h + 1) * EMBED, HEADS_GCN + h].set(a_dst[h])

    return dict(
        # MultiheadAttention(15, 3): fused [Wq|Wk|Wv] in-projection + out-proj
        mha_w_in=nrm(ks[0], (EMBED, 3 * EMBED)),
        mha_b_in=nrm(ks[1], (1, 3 * EMBED)),
        mha_wo=nrm(ks[2], (EMBED, EMBED)),
        mha_bo=nrm(ks[3], (1, EMBED)),
        # AutoCorrelationLayer(d_model=15, n_heads=1): fused [Wq|Wk|Wv] + out-proj
        ac_w_in=nrm(ks[4], (EMBED, 3 * EMBED)),
        ac_b_in=nrm(ks[5], (1, 3 * EMBED)),
        ac_wo=nrm(ks[6], (EMBED, EMBED)),
        ac_bo=nrm(ks[7], (1, EMBED)),
        # GCN(in=15, out=15, n_heads=4, step_len=3): head weights stacked on lanes
        gcn_w=nrm(ks[8], (EMBED, HEADS_GCN * EMBED)),
        gcn_sd=w_sd,
        gcn_b=jnp.tile(nrm(ks[11], (1, EMBED)), (1, NODES)),   # (1, 45) pre-tiled
        # adjacency from the module: ones(3, 3) (statically baked into the kernel)
        adj=jnp.ones((NODES, NODES), jnp.float32),
    )


# --------------------------------------------------------------------------
# Forward wrapper
# --------------------------------------------------------------------------
def dam_forward(x, params):
    Bt, T, C = x.shape
    assert C == NODES * EMBED, "last dim must be 45"
    N = Bt * T
    assert N % L_AC == 0, "B*T must be divisible by 6"
    p = params

    # free reshape: tokens on sublanes, 45 channels on lanes (no split/stack pass)
    x2 = x.reshape(N, C).astype(jnp.float32)

    # fold the 1/sqrt(head_dim) softmax scale into the Q projection, and embed
    # the shared (15,.) projections into per-chunk (45,.) matrices.
    scale = 1.0 / math.sqrt(HEAD_DIM)
    wq = p["mha_w_in"][:, :EMBED] * scale
    bq = p["mha_b_in"][:, :EMBED] * scale
    wkv = p["mha_w_in"][:, EMBED:]
    bkv = p["mha_b_in"][:, EMBED:]
    wq_big = jnp.zeros((NODES, C, EMBED), jnp.float32)
    wkv_big = jnp.zeros((NODES, C, 2 * EMBED), jnp.float32)
    for c in range(NODES):
        wq_big = wq_big.at[c, c * EMBED:(c + 1) * EMBED, :].set(wq)
        wkv_big = wkv_big.at[c, c * EMBED:(c + 1) * EMBED, :].set(wkv)

    # fuse the AutoCorrelation out-projection into the GCN head transform
    w_vz = jnp.dot(p["ac_wo"], p["gcn_w"])       # (15, 60)
    b_z = jnp.dot(p["ac_bo"], p["gcn_w"])        # (1, 60)

    # --------------------------- stage 1 ---------------------------
    TS1 = _pick_tile(N, 256, 8)
    nqk = N // TS1
    full1 = lambda shape: pl.BlockSpec(shape, lambda c, qi, ki: (0,) * len(shape))
    f_qkv = pl.pallas_call(
        _mha_acproj_kernel,
        out_shape=jax.ShapeDtypeStruct((NODES, N, 3 * EMBED), jnp.float32),
        grid=(NODES, nqk, nqk),
        in_specs=[
            pl.BlockSpec((TS1, C), lambda c, qi, ki: (qi, 0)),       # query rows
            pl.BlockSpec((TS1, C), lambda c, qi, ki: (ki, 0)),       # key/value rows
            pl.BlockSpec((1, C, EMBED), lambda c, qi, ki: (c, 0, 0)),        # wq (per chunk)
            full1((1, EMBED)),                                               # bq
            pl.BlockSpec((1, C, 2 * EMBED), lambda c, qi, ki: (c, 0, 0)),    # wkv (per chunk)
            full1((1, 2 * EMBED)),                                           # bkv
            full1((EMBED, EMBED)), full1((1, EMBED)),                        # MHA out-proj
            full1((EMBED, 3 * EMBED)), full1((1, 3 * EMBED)),                # AC in-proj
        ],
        out_specs=pl.BlockSpec((1, TS1, 3 * EMBED), lambda c, qi, ki: (c, qi, 0)),
        scratch_shapes=[
            pltpu.VMEM((HEADS_MHA, TS1, 1), jnp.float32),         # running max
            pltpu.VMEM((HEADS_MHA, TS1, 1), jnp.float32),         # running denom
            pltpu.VMEM((HEADS_MHA, TS1, HEAD_DIM), jnp.float32),  # running numerator
        ],
        compiler_params=pltpu.CompilerParams(
            dimension_semantics=("parallel", "parallel", "arbitrary"),
            vmem_limit_bytes=VMEM_LIMIT),
    )(x2, x2, wq_big, bq, wkv_big, bkv, p["mha_wo"], p["mha_bo"],
      p["ac_w_in"], p["ac_b_in"])

    # ------------------------ stage 2 + 3 (fused) ------------------------
    TS2 = _pick_tile(N, 384, 24)          # whole length-6 windows, sublane aligned
    full2 = lambda shape: pl.BlockSpec(shape, lambda i: (0,) * len(shape))
    y = pl.pallas_call(
        _ac_gcn_kernel,
        out_shape=jax.ShapeDtypeStruct((N, C), jnp.float32),
        grid=(N // TS2,),
        in_specs=[
            pl.BlockSpec((NODES, TS2, 3 * EMBED), lambda i: (0, i, 0)),
            full2((EMBED, HEADS_GCN * EMBED)),                 # fused AC-out x GCN-W
            full2((1, HEADS_GCN * EMBED)),
            full2((HEADS_GCN * EMBED, 2 * HEADS_GCN)),         # src/dst score weights
            full2(_PAIR_NP.shape),                             # (24, 36) pairing
            full2(_EXPAND_NP.shape),                           # (4, 60)
            full2(_HAVG_NP.shape),                             # (60, 15)
            full2((1, C)),                                     # GCN bias (pre-tiled)
        ],
        out_specs=pl.BlockSpec((TS2, C), lambda i: (i, 0)),
        compiler_params=pltpu.CompilerParams(
            dimension_semantics=("parallel",),
            vmem_limit_bytes=VMEM_LIMIT),
    )(f_qkv, w_vz, b_z, p["gcn_sd"],
      jnp.asarray(_PAIR_NP), jnp.asarray(_EXPAND_NP), jnp.asarray(_HAVG_NP),
      p["gcn_b"])

    # (N, 45) is token-major with nodes concatenated along lanes, which is
    # exactly torch's cat(..., dim=2).reshape(-1, 3, 15) memory layout.
    return y.reshape(N // L_AC, L_AC, C)


if __name__ == "__main__":
    key = jax.random.PRNGKey(0)
    k_x, k_p = jax.random.split(key)

    # input: (batch=2, time=6, channels=45); B*T = 12 is divisible by 6
    x = jax.random.normal(k_x, (2, 6, NODES * EMBED), dtype=jnp.float32)
    params = init_params(k_p)

    out = jax.block_until_ready(jax.jit(dam_forward)(x, params))

    assert out.shape == (2, 6, 45), out.shape
    assert bool(jnp.all(jnp.isfinite(out)))
    print("KERNEL_OK")
</pallas_src>

<mosaic_0001>
module attributes {stable_mosaic.version = 11 : i64} {
  func.func @_mha_acproj_kernel(%arg0: i32, %arg1: i32, %arg2: i32, %arg3: memref<12x45xf32, #tpu.memory_space<vmem>>, %arg4: memref<12x45xf32, #tpu.memory_space<vmem>>, %arg5: memref<1x45x15xf32, #tpu.memory_space<vmem>>, %arg6: memref<1x15xf32, #tpu.memory_space<vmem>>, %arg7: memref<1x45x30xf32, #tpu.memory_space<vmem>>, %arg8: memref<1x30xf32, #tpu.memory_space<vmem>>, %arg9: memref<15x15xf32, #tpu.memory_space<vmem>>, %arg10: memref<1x15xf32, #tpu.memory_space<vmem>>, %arg11: memref<15x45xf32, #tpu.memory_space<vmem>>, %arg12: memref<1x45xf32, #tpu.memory_space<vmem>>, %arg13: memref<1x12x45xf32, #tpu.memory_space<vmem>>, %arg14: memref<3x12x1xf32, #tpu.memory_space<vmem>>, %arg15: memref<3x12x1xf32, #tpu.memory_space<vmem>>, %arg16: memref<3x12x5xf32, #tpu.memory_space<vmem>>) attributes {dimension_semantics = [#tpu.dimension_semantics<parallel>, #tpu.dimension_semantics<parallel>, #tpu.dimension_semantics<arbitrary>], iteration_bounds = array<i64: 3, 1, 1>, scalar_prefetch = 0 : i64, scratch_operands = 3 : i64, tpu.core_type = #tpu.core_type<tc>, window_params = [{transform_indices = @transform_0, window_bounds = array<i64: 12, 45>}, {transform_indices = @transform_1, window_bounds = array<i64: 12, 45>}, {transform_indices = @transform_2, window_bounds = array<i64: 1, 45, 15>}, {pipeline_mode = #tpu.pipeline_mode<synchronous>, transform_indices = @transform_3, window_bounds = array<i64: 1, 15>}, {transform_indices = @transform_4, window_bounds = array<i64: 1, 45, 30>}, {pipeline_mode = #tpu.pipeline_mode<synchronous>, transform_indices = @transform_5, window_bounds = array<i64: 1, 30>}, {pipeline_mode = #tpu.pipeline_mode<synchronous>, transform_indices = @transform_6, window_bounds = array<i64: 15, 15>}, {pipeline_mode = #tpu.pipeline_mode<synchronous>, transform_indices = @transform_7, window_bounds = array<i64: 1, 15>}, {pipeline_mode = #tpu.pipeline_mode<synchronous>, transform_indices = @transform_8, window_bounds = array<i64: 15, 45>}, {pipeline_mode = #tpu.pipeline_mode<synchronous>, transform_indices = @transform_9, window_bounds = array<i64: 1, 45>}, {transform_indices = @transform_10, window_bounds = array<i64: 1, 12, 45>}]} {
    %c0_i32 = arith.constant 0 : i32
    %0 = arith.cmpi eq, %arg2, %c0_i32 : i32
    %1 = arith.extui %0 : i1 to i32
    %c0_i32_0 = arith.constant 0 : i32
    %2 = arith.cmpi ne, %1, %c0_i32_0 : i32
    scf.if %2 {
      %cst_81 = arith.constant 0xFF800000 : f32
      %125 = vector.broadcast %cst_81 : f32 to vector<3x12x1xf32>
      %c0_82 = arith.constant 0 : index
      %c0_83 = arith.constant 0 : index
      %c0_84 = arith.constant 0 : index
      %126 = vector.load %arg14[%c0_82, %c0_83, %c0_84] : memref<3x12x1xf32, #tpu.memory_space<vmem>>, vector<3x12x1xf32>
      tpu.vector_store %arg14[%c0_82, %c0_83, %c0_84], %125 {strides = array<i32>} : memref<3x12x1xf32, #tpu.memory_space<vmem>>, vector<3x12x1xf32>,
      %cst_85 = arith.constant 0.000000e+00 : f32
      %127 = vector.broadcast %cst_85 : f32 to vector<3x12x1xf32>
      %c0_86 = arith.constant 0 : index
      %c0_87 = arith.constant 0 : index
      %c0_88 = arith.constant 0 : index
      %128 = vector.load %arg15[%c0_86, %c0_87, %c0_88] : memref<3x12x1xf32, #tpu.memory_space<vmem>>, vector<3x12x1xf32>
      tpu.vector_store %arg15[%c0_86, %c0_87, %c0_88], %127 {strides = array<i32>} : memref<3x12x1xf32, #tpu.memory_space<vmem>>, vector<3x12x1xf32>,
      %cst_89 = arith.constant 0.000000e+00 : f32
      %129 = vector.broadcast %cst_89 : f32 to vector<3x12x5xf32>
      %c0_90 = arith.constant 0 : index
      %c0_91 = arith.constant 0 : index
      %c0_92 = arith.constant 0 : index
      %130 = vector.load %arg16[%c0_90, %c0_91, %c0_92] : memref<3x12x5xf32, #tpu.memory_space<vmem>>, vector<3x12x5xf32>
      tpu.vector_store %arg16[%c0_90, %c0_91, %c0_92], %129 {strides = array<i32>} : memref<3x12x5xf32, #tpu.memory_space<vmem>>, vector<3x12x5xf32>,
    } else {
    }
    %c0 = arith.constant 0 : index
    %c0_1 = arith.constant 0 : index
    %3 = vector.load %arg3[%c0, %c0_1] : memref<12x45xf32, #tpu.memory_space<vmem>>, vector<12x45xf32>
    %c0_2 = arith.constant 0 : index
    %c0_3 = arith.constant 0 : index
    %c0_4 = arith.constant 0 : index
    %4 = vector.load %arg5[%c0_2, %c0_3, %c0_4] : memref<1x45x15xf32, #tpu.memory_space<vmem>>, vector<1x45x15xf32>
    %5 = vector.shape_cast %4 : vector<1x45x15xf32> to vector<45x15xf32>
    %cst = arith.constant dense<0.000000e+00> : vector<12x15xf32>
    %6 = tpu.matmul %3, %5, %cst {dimension_numbers = #tpu.dot_dimension_numbers<[1], [0], [0], [1], [0, 0, 1, 1], [], []>} : vector<12x45xf32>, vector<45x15xf32>, vector<12x15xf32> -> vector<12x15xf32>
    %c0_5 = arith.constant 0 : index
    %c0_6 = arith.constant 0 : index
    %7 = vector.load %arg6[%c0_5, %c0_6] : memref<1x15xf32, #tpu.memory_space<vmem>>, vector<1x15xf32>
    %8 = vector.broadcast %7 : vector<1x15xf32> to vector<12x15xf32>
    %9 = arith.addf %6, %8 : vector<12x15xf32>
    %c0_7 = arith.constant 0 : index
    %c0_8 = arith.constant 0 : index
    %10 = vector.load %arg4[%c0_7, %c0_8] : memref<12x45xf32, #tpu.memory_space<vmem>>, vector<12x45xf32>
    %c0_9 = arith.constant 0 : index
    %c0_10 = arith.constant 0 : index
    %c0_11 = arith.constant 0 : index
    %11 = vector.load %arg7[%c0_9, %c0_10, %c0_11] : memref<1x45x30xf32, #tpu.memory_space<vmem>>, vector<1x45x30xf32>
    %12 = vector.shape_cast %11 : vector<1x45x30xf32> to vector<45x30xf32>
    %cst_12 = arith.constant dense<0.000000e+00> : vector<12x30xf32>
    %13 = tpu.matmul %10, %12, %cst_12 {dimension_numbers = #tpu.dot_dimension_numbers<[1], [0], [0], [1], [0, 0, 1, 1], [], []>} : vector<12x45xf32>, vector<45x30xf32>, vector<12x30xf32> -> vector<12x30xf32>
    %c0_13 = arith.constant 0 : index
    %c0_14 = arith.constant 0 : index
    %14 = vector.load %arg8[%c0_13, %c0_14] : memref<1x30xf32, #tpu.memory_space<vmem>>, vector<1x30xf32>
    %15 = vector.broadcast %14 : vector<1x30xf32> to vector<12x30xf32>
    %16 = arith.addf %13, %15 : vector<12x30xf32>
    %17 = vector.extract_strided_slice %9 {offsets = [0, 0], sizes = [12, 5], strides = [1, 1]} : vector<12x15xf32> to vector<12x5xf32>
    %18 = vector.extract_strided_slice %16 {offsets = [0, 0], sizes = [12, 5], strides = [1, 1]} : vector<12x30xf32> to vector<12x5xf32>
    %19 = vector.extract_strided_slice %16 {offsets = [0, 15], sizes = [12, 5], strides = [1, 1]} : vector<12x30xf32> to vector<12x5xf32>
    %cst_15 = arith.constant dense<0.000000e+00> : vector<12x12xf32>
    %20 = tpu.matmul %17, %18, %cst_15 {dimension_numbers = #tpu.dot_dimension_numbers<[1], [1], [0], [0], [0, 0, 1, 0], [], []>} : vector<12x5xf32>, vector<12x5xf32>, vector<12x12xf32> -> vector<12x12xf32>
    %c0_16 = arith.constant 0 : index
    %c0_17 = arith.constant 0 : index
    %c0_18 = arith.constant 0 : index
    %21 = vector.load %arg14[%c0_16, %c0_17, %c0_18] : memref<3x12x1xf32, #tpu.memory_space<vmem>>, vector<1x12x1xf32>
    %22 = vector.shape_cast %21 : vector<1x12x1xf32> to vector<12x1xf32>
    %cst_19 = arith.constant dense<0xFF800000> : vector<12xf32>
    %23 = vector.multi_reduction <maximumf>, %20, %cst_19 [1] : vector<12x12xf32> to vector<12xf32>
    %24 = vector.shape_cast %23 : vector<12xf32> to vector<12x1xf32>
    %25 = arith.maximumf %22, %24 : vector<12x1xf32>
    %26 = arith.subf %22, %25 : vector<12x1xf32>
    %27 = math.exp %26 : vector<12x1xf32>
    %28 = vector.broadcast %25 : vector<12x1xf32> to vector<12x12xf32>
    %29 = arith.subf %20, %28 : vector<12x12xf32>
    %30 = math.exp %29 : vector<12x12xf32>
    %c0_20 = arith.constant 0 : index
    %c0_21 = arith.constant 0 : index
    %c0_22 = arith.constant 0 : index
    %31 = vector.load %arg15[%c0_20, %c0_21, %c0_22] : memref<3x12x1xf32, #tpu.memory_space<vmem>>, vector<1x12x1xf32>
    %32 = vector.shape_cast %31 : vector<1x12x1xf32> to vector<12x1xf32>
    %33 = arith.mulf %27, %32 : vector<12x1xf32>
    %cst_23 = arith.constant dense<0.000000e+00> : vector<12xf32>
    %34 = vector.multi_reduction <add>, %30, %cst_23 [1] : vector<12x12xf32> to vector<12xf32>
    %35 = vector.shape_cast %34 : vector<12xf32> to vector<12x1xf32>
    %36 = arith.addf %33, %35 : vector<12x1xf32>
    %c0_24 = arith.constant 0 : index
    %c0_25 = arith.constant 0 : index
    %c0_26 = arith.constant 0 : index
    %37 = vector.load %arg15[%c0_24, %c0_25, %c0_26] : memref<3x12x1xf32, #tpu.memory_space<vmem>>, vector<1x12x1xf32>
    %38 = vector.shape_cast %37 : vector<1x12x1xf32> to vector<12x1xf32>
    %39 = vector.shape_cast %36 : vector<12x1xf32> to vector<1x12x1xf32>
    tpu.vector_store %arg15[%c0_24, %c0_25, %c0_26], %39 {strides = array<i32>} : memref<3x12x1xf32, #tpu.memory_space<vmem>>, vector<1x12x1xf32>,
    %c0_27 = arith.constant 0 : index
    %c0_28 = arith.constant 0 : index
    %c0_29 = arith.constant 0 : index
    %40 = vector.load %arg16[%c0_27, %c0_28, %c0_29] : memref<3x12x5xf32, #tpu.memory_space<vmem>>, vector<1x12x5xf32>
    %41 = vector.shape_cast %40 : vector<1x12x5xf32> to vector<12x5xf32>
    %42 = vector.broadcast %27 : vector<12x1xf32> to vector<12x5xf32>
    %43 = arith.mulf %42, %41 : vector<12x5xf32>
    %cst_30 = arith.constant dense<0.000000e+00> : vector<12x5xf32>
    %44 = tpu.matmul %30, %19, %cst_30 {dimension_numbers = #tpu.dot_dimension_numbers<[1], [0], [0], [1], [0, 0, 1, 1], [], []>} : vector<12x12xf32>, vector<12x5xf32>, vector<12x5xf32> -> vector<12x5xf32>
    %45 = arith.addf %43, %44 : vector<12x5xf32>
    %c0_31 = arith.constant 0 : index
    %c0_32 = arith.constant 0 : index
    %c0_33 = arith.constant 0 : index
    %46 = vector.load %arg16[%c0_31, %c0_32, %c0_33] : memref<3x12x5xf32, #tpu.memory_space<vmem>>, vector<1x12x5xf32>
    %47 = vector.shape_cast %46 : vector<1x12x5xf32> to vector<12x5xf32>
    %48 = vector.shape_cast %45 : vector<12x5xf32> to vector<1x12x5xf32>
    tpu.vector_store %arg16[%c0_31, %c0_32, %c0_33], %48 {strides = array<i32>} : memref<3x12x5xf32, #tpu.memory_space<vmem>>, vector<1x12x5xf32>,
    %c0_34 = arith.constant 0 : index
    %c0_35 = arith.constant 0 : index
    %c0_36 = arith.constant 0 : index
    %49 = vector.load %arg14[%c0_34, %c0_35, %c0_36] : memref<3x12x1xf32, #tpu.memory_space<vmem>>, vector<1x12x1xf32>
    %50 = vector.shape_cast %49 : vector<1x12x1xf32> to vector<12x1xf32>
    %51 = vector.shape_cast %25 : vector<12x1xf32> to vector<1x12x1xf32>
    tpu.vector_store %arg14[%c0_34, %c0_35, %c0_36], %51 {strides = array<i32>} : memref<3x12x1xf32, #tpu.memory_space<vmem>>, vector<1x12x1xf32>,
    %52 = vector.extract_strided_slice %9 {offsets = [0, 5], sizes = [12, 5], strides = [1, 1]} : vector<12x15xf32> to vector<12x5xf32>
    %53 = vector.extract_strided_slice %16 {offsets = [0, 5], sizes = [12, 5], strides = [1, 1]} : vector<12x30xf32> to vector<12x5xf32>
    %54 = vector.extract_strided_slice %16 {offsets = [0, 20], sizes = [12, 5], strides = [1, 1]} : vector<12x30xf32> to vector<12x5xf32>
    %cst_37 = arith.constant dense<0.000000e+00> : vector<12x12xf32>
    %55 = tpu.matmul %52, %53, %cst_37 {dimension_numbers = #tpu.dot_dimension_numbers<[1], [1], [0], [0], [0, 0, 1, 0], [], []>} : vector<12x5xf32>, vector<12x5xf32>, vector<12x12xf32> -> vector<12x12xf32>
    %c1 = arith.constant 1 : index
    %c0_38 = arith.constant 0 : index
    %c0_39 = arith.constant 0 : index
    %56 = vector.load %arg14[%c1, %c0_38, %c0_39] : memref<3x12x1xf32, #tpu.memory_space<vmem>>, vector<1x12x1xf32>
    %57 = vector.shape_cast %56 : vector<1x12x1xf32> to vector<12x1xf32>
    %cst_40 = arith.constant dense<0xFF800000> : vector<12xf32>
    %58 = vector.multi_reduction <maximumf>, %55, %cst_40 [1] : vector<12x12xf32> to vector<12xf32>
    %59 = vector.shape_cast %58 : vector<12xf32> to vector<12x1xf32>
    %60 = arith.maximumf %57, %59 : vector<12x1xf32>
    %61 = arith.subf %57, %60 : vector<12x1xf32>
    %62 = math.exp %61 : vector<12x1xf32>
    %63 = vector.broadcast %60 : vector<12x1xf32> to vector<12x12xf32>
    %64 = arith.subf %55, %63 : vector<12x12xf32>
    %65 = math.exp %64 : vector<12x12xf32>
    %c1_41 = arith.constant 1 : index
    %c0_42 = arith.constant 0 : index
    %c0_43 = arith.constant 0 : index
    %66 = vector.load %arg15[%c1_41, %c0_42, %c0_43] : memref<3x12x1xf32, #tpu.memory_space<vmem>>, vector<1x12x1xf32>
    %67 = vector.shape_cast %66 : vector<1x12x1xf32> to vector<12x1xf32>
    %68 = arith.mulf %62, %67 : vector<12x1xf32>
    %cst_44 = arith.constant dense<0.000000e+00> : vector<12xf32>
    %69 = vector.multi_reduction <add>, %65, %cst_44 [1] : vector<12x12xf32> to vector<12xf32>
    %70 = vector.shape_cast %69 : vector<12xf32> to vector<12x1xf32>
    %71 = arith.addf %68, %70 : vector<12x1xf32>
    %c1_45 = arith.constant 1 : index
    %c0_46 = arith.constant 0 : index
    %c0_47 = arith.constant 0 : index
    %72 = vector.load %arg15[%c1_45, %c0_46, %c0_47] : memref<3x12x1xf32, #tpu.memory_space<vmem>>, vector<1x12x1xf32>
    %73 = vector.shape_cast %72 : vector<1x12x1xf32> to vector<12x1xf32>
    %74 = vector.shape_cast %71 : vector<12x1xf32> to vector<1x12x1xf32>
    tpu.vector_store %arg15[%c1_45, %c0_46, %c0_47], %74 {strides = array<i32>} : memref<3x12x1xf32, #tpu.memory_space<vmem>>, vector<1x12x1xf32>,
    %c1_48 = arith.constant 1 : index
    %c0_49 = arith.constant 0 : index
    %c0_50 = arith.constant 0 : index
    %75 = vector.load %arg16[%c1_48, %c0_49, %c0_50] : memref<3x12x5xf32, #tpu.memory_space<vmem>>, vector<1x12x5xf32>
    %76 = vector.shape_cast %75 : vector<1x12x5xf32> to vector<12x5xf32>
    %77 = vector.broadcast %62 : vector<12x1xf32> to vector<12x5xf32>
    %78 = arith.mulf %77, %76 : vector<12x5xf32>
    %cst_51 = arith.constant dense<0.000000e+00> : vector<12x5xf32>
    %79 = tpu.matmul %65, %54, %cst_51 {dimension_numbers = #tpu.dot_dimension_numbers<[1], [0], [0], [1], [0, 0, 1, 1], [], []>} : vector<12x12xf32>, vector<12x5xf32>, vector<12x5xf32> -> vector<12x5xf32>
    %80 = arith.addf %78, %79 : vector<12x5xf32>
    %c1_52 = arith.constant 1 : index
    %c0_53 = arith.constant 0 : index
    %c0_54 = arith.constant 0 : index
    %81 = vector.load %arg16[%c1_52, %c0_53, %c0_54] : memref<3x12x5xf32, #tpu.memory_space<vmem>>, vector<1x12x5xf32>
    %82 = vector.shape_cast %81 : vector<1x12x5xf32> to vector<12x5xf32>
    %83 = vector.shape_cast %80 : vector<12x5xf32> to vector<1x12x5xf32>
    tpu.vector_store %arg16[%c1_52, %c0_53, %c0_54], %83 {strides = array<i32>} : memref<3x12x5xf32, #tpu.memory_space<vmem>>, vector<1x12x5xf32>,
    %c1_55 = arith.constant 1 : index
    %c0_56 = arith.constant 0 : index
    %c0_57 = arith.constant 0 : index
    %84 = vector.load %arg14[%c1_55, %c0_56, %c0_57] : memref<3x12x1xf32, #tpu.memory_space<vmem>>, vector<1x12x1xf32>
    %85 = vector.shape_cast %84 : vector<1x12x1xf32> to vector<12x1xf32>
    %86 = vector.shape_cast %60 : vector<12x1xf32> to vector<1x12x1xf32>
    tpu.vector_store %arg14[%c1_55, %c0_56, %c0_57], %86 {strides = array<i32>} : memref<3x12x1xf32, #tpu.memory_space<vmem>>, vector<1x12x1xf32>,
    %87 = vector.extract_strided_slice %9 {offsets = [0, 10], sizes = [12, 5], strides = [1, 1]} : vector<12x15xf32> to vector<12x5xf32>
    %88 = vector.extract_strided_slice %16 {offsets = [0, 10], sizes = [12, 5], strides = [1, 1]} : vector<12x30xf32> to vector<12x5xf32>
    %89 = vector.extract_strided_slice %16 {offsets = [0, 25], sizes = [12, 5], strides = [1, 1]} : vector<12x30xf32> to vector<12x5xf32>
    %cst_58 = arith.constant dense<0.000000e+00> : vector<12x12xf32>
    %90 = tpu.matmul %87, %88, %cst_58 {dimension_numbers = #tpu.dot_dimension_numbers<[1], [1], [0], [0], [0, 0, 1, 0], [], []>} : vector<12x5xf32>, vector<12x5xf32>, vector<12x12xf32> -> vector<12x12xf32>
    %c2 = arith.constant 2 : index
    %c0_59 = arith.constant 0 : index
    %c0_60 = arith.constant 0 : index
    %91 = vector.load %arg14[%c2, %c0_59, %c0_60] : memref<3x12x1xf32, #tpu.memory_space<vmem>>, vector<1x12x1xf32>
    %92 = vector.shape_cast %91 : vector<1x12x1xf32> to vector<12x1xf32>
    %cst_61 = arith.constant dense<0xFF800000> : vector<12xf32>
    %93 = vector.multi_reduction <maximumf>, %90, %cst_61 [1] : vector<12x12xf32> to vector<12xf32>
    %94 = vector.shape_cast %93 : vector<12xf32> to vector<12x1xf32>
    %95 = arith.maximumf %92, %94 : vector<12x1xf32>
    %96 = arith.subf %92, %95 : vector<12x1xf32>
    %97 = math.exp %96 : vector<12x1xf32>
    %98 = vector.broadcast %95 : vector<12x1xf32> to vector<12x12xf32>
    %99 = arith.subf %90, %98 : vector<12x12xf32>
    %100 = math.exp %99 : vector<12x12xf32>
    %c2_62 = arith.constant 2 : index
    %c0_63 = arith.constant 0 : index
    %c0_64 = arith.constant 0 : index
    %101 = vector.load %arg15[%c2_62, %c0_63, %c0_64] : memref<3x12x1xf32, #tpu.memory_space<vmem>>, vector<1x12x1xf32>
    %102 = vector.shape_cast %101 : vector<1x12x1xf32> to vector<12x1xf32>
    %103 = arith.mulf %97, %102 : vector<12x1xf32>
    %cst_65 = arith.constant dense<0.000000e+00> : vector<12xf32>
    %104 = vector.multi_reduction <add>, %100, %cst_65 [1] : vector<12x12xf32> to vector<12xf32>
    %105 = vector.shape_cast %104 : vector<12xf32> to vector<12x1xf32>
    %106 = arith.addf %103, %105 : vector<12x1xf32>
    %c2_66 = arith.constant 2 : index
    %c0_67 = arith.constant 0 : index
    %c0_68 = arith.constant 0 : index
    %107 = vector.load %arg15[%c2_66, %c0_67, %c0_68] : memref<3x12x1xf32, #tpu.memory_space<vmem>>, vector<1x12x1xf32>
    %108 = vector.shape_cast %107 : vector<1x12x1xf32> to vector<12x1xf32>
    %109 = vector.shape_cast %106 : vector<12x1xf32> to vector<1x12x1xf32>
    tpu.vector_store %arg15[%c2_66, %c0_67, %c0_68], %109 {strides = array<i32>} : memref<3x12x1xf32, #tpu.memory_space<vmem>>, vector<1x12x1xf32>,
    %c2_69 = arith.constant 2 : index
    %c0_70 = arith.constant 0 : index
    %c0_71 = arith.constant 0 : index
    %110 = vector.load %arg16[%c2_69, %c0_70, %c0_71] : memref<3x12x5xf32, #tpu.memory_space<vmem>>, vector<1x12x5xf32>
    %111 = vector.shape_cast %110 : vector<1x12x5xf32> to vector<12x5xf32>
    %112 = vector.broadcast %97 : vector<12x1xf32> to vector<12x5xf32>
    %113 = arith.mulf %112, %111 : vector<12x5xf32>
    %cst_72 = arith.constant dense<0.000000e+00> : vector<12x5xf32>
    %114 = tpu.matmul %100, %89, %cst_72 {dimension_numbers = #tpu.dot_dimension_numbers<[1], [0], [0], [1], [0, 0, 1, 1], [], []>} : vector<12x12xf32>, vector<12x5xf32>, vector<12x5xf32> -> vector<12x5xf32>
    %115 = arith.addf %113, %114 : vector<12x5xf32>
    %c2_73 = arith.constant 2 : index
    %c0_74 = arith.constant 0 : index
    %c0_75 = arith.constant 0 : index
    %116 = vector.load %arg16[%c2_73, %c0_74, %c0_75] : memref<3x12x5xf32, #tpu.memory_space<vmem>>, vector<1x12x5xf32>
    %117 = vector.shape_cast %116 : vector<1x12x5xf32> to vector<12x5xf32>
    %118 = vector.shape_cast %115 : vector<12x5xf32> to vector<1x12x5xf32>
    tpu.vector_store %arg16[%c2_73, %c0_74, %c0_75], %118 {strides = array<i32>} : memref<3x12x5xf32, #tpu.memory_space<vmem>>, vector<1x12x5xf32>,
    %c2_76 = arith.constant 2 : index
    %c0_77 = arith.constant 0 : index
    %c0_78 = arith.constant 0 : index
    %119 = vector.load %arg14[%c2_76, %c0_77, %c0_78] : memref<3x12x1xf32, #tpu.memory_space<vmem>>, vector<1x12x1xf32>
    %120 = vector.shape_cast %119 : vector<1x12x1xf32> to vector<12x1xf32>
    %121 = vector.shape_cast %95 : vector<12x1xf32> to vector<1x12x1xf32>
    tpu.vector_store %arg14[%c2_76, %c0_77, %c0_78], %121 {strides = array<i32>} : memref<3x12x1xf32, #tpu.memory_space<vmem>>, vector<1x12x1xf32>,
    %c0_i32_79 = arith.constant 0 : i32
    %122 = arith.cmpi eq, %arg2, %c0_i32_79 : i32
    %123 = arith.extui %122 : i1 to i32
    %c0_i32_80 = arith.constant 0 : i32
    %124 = arith.cmpi ne, %123, %c0_i32_80 : i32
    scf.if %124 {
      %c0_81 = arith.constant 0 : index
      %c0_82 = arith.constant 0 : index
      %c0_83 = arith.constant 0 : index
      %125 = vector.load %arg16[%c0_81, %c0_82, %c0_83] : memref<3x12x5xf32, #tpu.memory_space<vmem>>, vector<1x12x5xf32>
      %126 = vector.shape_cast %125 : vector<1x12x5xf32> to vector<12x5xf32>
      %c0_84 = arith.constant 0 : index
      %c0_85 = arith.constant 0 : index
      %c0_86 = arith.constant 0 : index
      %127 = vector.load %arg15[%c0_84, %c0_85, %c0_86] : memref<3x12x1xf32, #tpu.memory_space<vmem>>, vector<1x12x1xf32>
      %128 = vector.shape_cast %127 : vector<1x12x1xf32> to vector<12x1xf32>
      %129 = vector.broadcast %128 : vector<12x1xf32> to vector<12x5xf32>
      %130 = arith.divf %126, %129 : vector<12x5xf32>
      %c1_87 = arith.constant 1 : index
      %c0_88 = arith.constant 0 : index
      %c0_89 = arith.constant 0 : index
      %131 = vector.load %arg16[%c1_87, %c0_88, %c0_89] : memref<3x12x5xf32, #tpu.memory_space<vmem>>, vector<1x12x5xf32>
      %132 = vector.shape_cast %131 : vector<1x12x5xf32> to vector<12x5xf32>
      %c1_90 = arith.constant 1 : index
      %c0_91 = arith.constant 0 : index
      %c0_92 = arith.constant 0 : index
      %133 = vector.load %arg15[%c1_90, %c0_91, %c0_92] : memref<3x12x1xf32, #tpu.memory_space<vmem>>, vector<1x12x1xf32>
      %134 = vector.shape_cast %133 : vector<1x12x1xf32> to vector<12x1xf32>
      %135 = vector.broadcast %134 : vector<12x1xf32> to vector<12x5xf32>
      %136 = arith.divf %132, %135 : vector<12x5xf32>
      %c2_93 = arith.constant 2 : index
      %c0_94 = arith.constant 0 : index
      %c0_95 = arith.constant 0 : index
      %137 = vector.load %arg16[%c2_93, %c0_94, %c0_95] : memref<3x12x5xf32, #tpu.memory_space<vmem>>, vector<1x12x5xf32>
      %138 = vector.shape_cast %137 : vector<1x12x5xf32> to vector<12x5xf32>
      %c2_96 = arith.constant 2 : index
      %c0_97 = arith.constant 0 : index
      %c0_98 = arith.constant 0 : index
      %139 = vector.load %arg15[%c2_96, %c0_97, %c0_98] : memref<3x12x1xf32, #tpu.memory_space<vmem>>, vector<1x12x1xf32>
      %140 = vector.shape_cast %139 : vector<1x12x1xf32> to vector<12x1xf32>
      %141 = vector.broadcast %140 : vector<12x1xf32> to vector<12x5xf32>
      %142 = arith.divf %138, %141 : vector<12x5xf32>
      %143 = tpu.concatenate %130, %136, %142 in 1 : vector<12x5xf32>, vector<12x5xf32>, vector<12x5xf32> -> vector<12x15xf32>
      %c0_99 = arith.constant 0 : index
      %c0_100 = arith.constant 0 : index
      %144 = vector.load %arg9[%c0_99, %c0_100] : memref<15x15xf32, #tpu.memory_space<vmem>>, vector<15x15xf32>
      %cst_101 = arith.constant dense<0.000000e+00> : vector<12x15xf32>
      %145 = tpu.matmul %143, %144, %cst_101 {dimension_numbers = #tpu.dot_dimension_numbers<[1], [0], [0], [1], [0, 0, 1, 1], [], []>} : vector<12x15xf32>, vector<15x15xf32>, vector<12x15xf32> -> vector<12x15xf32>
      %c0_102 = arith.constant 0 : index
      %c0_103 = arith.constant 0 : index
      %146 = vector.load %arg10[%c0_102, %c0_103] : memref<1x15xf32, #tpu.memory_space<vmem>>, vector<1x15xf32>
      %147 = vector.broadcast %146 : vector<1x15xf32> to vector<12x15xf32>
      %148 = arith.addf %145, %147 : vector<12x15xf32>
      %c0_104 = arith.constant 0 : index
      %c0_105 = arith.constant 0 : index
      %149 = vector.load %arg11[%c0_104, %c0_105] : memref<15x45xf32, #tpu.memory_space<vmem>>, vector<15x45xf32>
      %cst_106 = arith.constant dense<0.000000e+00> : vector<12x45xf32>
      %150 = tpu.matmul %148, %149, %cst_106 {dimension_numbers = #tpu.dot_dimension_numbers<[1], [0], [0], [1], [0, 0, 1, 1], [], []>} : vector<12x15xf32>, vector<15x45xf32>, vector<12x45xf32> -> vector<12x45xf32>
      %c0_107 = arith.constant 0 : index
      %c0_108 = arith.constant 0 : index
      %151 = vector.load %arg12[%c0_107, %c0_108] : memref<1x45xf32, #tpu.memory_space<vmem>>, vector<1x45xf32>
      %152 = vector.broadcast %151 : vector<1x45xf32> to vector<12x45xf32>
      %153 = arith.addf %150, %152 : vector<12x45xf32>
      %c0_109 = arith.constant 0 : index
      %c0_110 = arith.constant 0 : index
      %c0_111 = arith.constant 0 : index
      %154 = vector.load %arg13[%c0_109, %c0_110, %c0_111] : memref<1x12x45xf32, #tpu.memory_space<vmem>>, vector<1x12x45xf32>
      %155 = vector.shape_cast %154 : vector<1x12x45xf32> to vector<12x45xf32>
      %156 = vector.shape_cast %153 : vector<12x45xf32> to vector<1x12x45xf32>
      tpu.vector_store %arg13[%c0_109, %c0_110, %c0_111], %156 {strides = array<i32>} : memref<1x12x45xf32, #tpu.memory_space<vmem>>, vector<1x12x45xf32>,
    } else {
    }
    return
  }
  func.func @transform_0(%arg0: i32, %arg1: i32, %arg2: i32) -> (i32, i32) {
    %c0_i32 = arith.constant 0 : i32
    %c0_i32_0 = arith.constant 0 : i32
    return %arg1, %c0_i32 : i32, i32
  }
  func.func @transform_1(%arg0: i32, %arg1: i32, %arg2: i32) -> (i32, i32) {
    %c0_i32 = arith.constant 0 : i32
    %c0_i32_0 = arith.constant 0 : i32
    return %arg2, %c0_i32 : i32, i32
  }
  func.func @transform_2(%arg0: i32, %arg1: i32, %arg2: i32) -> (i32, i32, i32) {
    %c0_i32 = arith.constant 0 : i32
    %c0_i32_0 = arith.constant 0 : i32
    %c0_i32_1 = arith.constant 0 : i32
    return %arg0, %c0_i32, %c0_i32_0 : i32, i32, i32
  }
  func.func @transform_3(%arg0: i32, %arg1: i32, %arg2: i32) -> (i32, i32) {
    %c0_i32 = arith.constant 0 : i32
    %c0_i32_0 = arith.constant 0 : i32
    %c0_i32_1 = arith.constant 0 : i32
    return %c0_i32, %c0_i32_0 : i32, i32
  }
  func.func @transform_4(%arg0: i32, %arg1: i32, %arg2: i32) -> (i32, i32, i32) {
    %c0_i32 = arith.constant 0 : i32
    %c0_i32_0 = arith.constant 0 : i32
    %c0_i32_1 = arith.constant 0 : i32
    return %arg0, %c0_i32, %c0_i32_0 : i32, i32, i32
  }
  func.func @transform_5(%arg0: i32, %arg1: i32, %arg2: i32) -> (i32, i32) {
    %c0_i32 = arith.constant 0 : i32
    %c0_i32_0 = arith.constant 0 : i32
    %c0_i32_1 = arith.constant 0 : i32
    return %c0_i32, %c0_i32_0 : i32, i32
  }
  func.func @transform_6(%arg0: i32, %arg1: i32, %arg2: i32) -> (i32, i32) {
    %c0_i32 = arith.constant 0 : i32
    %c0_i32_0 = arith.constant 0 : i32
    %c0_i32_1 = arith.constant 0 : i32
    return %c0_i32, %c0_i32_0 : i32, i32
  }
  func.func @transform_7(%arg0: i32, %arg1: i32, %arg2: i32) -> (i32, i32) {
    %c0_i32 = arith.constant 0 : i32
    %c0_i32_0 = arith.constant 0 : i32
    %c0_i32_1 = arith.constant 0 : i32
    return %c0_i32, %c0_i32_0 : i32, i32
  }
  func.func @transform_8(%arg0: i32, %arg1: i32, %arg2: i32) -> (i32, i32) {
    %c0_i32 = arith.constant 0 : i32
    %c0_i32_0 = arith.constant 0 : i32
    %c0_i32_1 = arith.constant 0 : i32
    return %c0_i32, %c0_i32_0 : i32, i32
  }
  func.func @transform_9(%arg0: i32, %arg1: i32, %arg2: i32) -> (i32, i32) {
    %c0_i32 = arith.constant 0 : i32
    %c0_i32_0 = arith.constant 0 : i32
    %c0_i32_1 = arith.constant 0 : i32
    return %c0_i32, %c0_i32_0 : i32, i32
  }
  func.func @transform_10(%arg0: i32, %arg1: i32, %arg2: i32) -> (i32, i32, i32) {
    %c0_i32 = arith.constant 0 : i32
    %c0_i32_0 = arith.constant 0 : i32
    return %arg0, %arg1, %c0_i32 : i32, i32, i32
  }
}

module attributes {stable_mosaic.version = 11 : i64} {
  func.func @_ac_gcn_kernel(%arg0: i32, %arg1: memref<3x12x45xf32, #tpu.memory_space<vmem>>, %arg2: memref<15x60xf32, #tpu.memory_space<vmem>>, %arg3: memref<1x60xf32, #tpu.memory_space<vmem>>, %arg4: memref<60x8xf32, #tpu.memory_space<vmem>>, %arg5: memref<24x36xf32, #tpu.memory_space<vmem>>, %arg6: memref<4x60xf32, #tpu.memory_space<vmem>>, %arg7: memref<60x15xf32, #tpu.memory_space<vmem>>, %arg8: memref<1x45xf32, #tpu.memory_space<vmem>>, %arg9: memref<12x45xf32, #tpu.memory_space<vmem>>) attributes {dimension_semantics = [#tpu.dimension_semantics<parallel>], iteration_bounds = array<i64: 1>, scalar_prefetch = 0 : i64, scratch_operands = 0 : i64, tpu.core_type = #tpu.core_type<tc>, window_params = [{transform_indices = @transform_0, window_bounds = array<i64: 3, 12, 45>}, {pipeline_mode = #tpu.pipeline_mode<synchronous>, transform_indices = @transform_1, window_bounds = array<i64: 15, 60>}, {pipeline_mode = #tpu.pipeline_mode<synchronous>, transform_indices = @transform_2, window_bounds = array<i64: 1, 60>}, {pipeline_mode = #tpu.pipeline_mode<synchronous>, transform_indices = @transform_3, window_bounds = array<i64: 60, 8>}, {pipeline_mode = #tpu.pipeline_mode<synchronous>, transform_indices = @transform_4, window_bounds = array<i64: 24, 36>}, {pipeline_mode = #tpu.pipeline_mode<synchronous>, transform_indices = @transform_5, window_bounds = array<i64: 4, 60>}, {pipeline_mode = #tpu.pipeline_mode<synchronous>, transform_indices = @transform_6, window_bounds = array<i64: 60, 15>}, {pipeline_mode = #tpu.pipeline_mode<synchronous>, transform_indices = @transform_7, window_bounds = array<i64: 1, 45>}, {transform_indices = @transform_8, window_bounds = array<i64: 12, 45>}]} {
    %0 = tpu.iota {dimensions = array<i32: 0>} : vector<12x1xi32>
    %c6_i32 = arith.constant 6 : i32
    %c0_i32 = arith.constant 0 : i32
    %1 = arith.cmpi eq, %c6_i32, %c0_i32 : i32
    %c1_i32 = arith.constant 1 : i32
    %2 = arith.select %1, %c1_i32, %c6_i32 : i32
    %3 = vector.broadcast %2 : i32 to vector<12x1xi32>
    %4 = arith.remsi %0, %3 : vector<12x1xi32>
    %c0_i32_0 = arith.constant 0 : i32
    %5 = vector.broadcast %c0_i32_0 : i32 to vector<12x1xi32>
    %6 = arith.cmpi ne, %4, %5 : vector<12x1xi32>
    %c0_i32_1 = arith.constant 0 : i32
    %7 = vector.broadcast %c0_i32_1 : i32 to vector<12x1xi32>
    %8 = arith.cmpi slt, %4, %7 : vector<12x1xi32>
    %c0_i32_2 = arith.constant 0 : i32
    %9 = arith.cmpi slt, %2, %c0_i32_2 : i32
    %10 = vector.broadcast %9 : i1 to vector<12x1xi1>
    %11 = vector.broadcast %10 : vector<12x1xi1> to vector<12x1xi1>
    %12 = arith.xori %8, %11 : vector<12x1xi1>
    %13 = arith.andi %12, %6 : vector<12x1xi1>
    %14 = vector.broadcast %2 : i32 to vector<12x1xi32>
    %15 = arith.addi %4, %14 : vector<12x1xi32>
    %16 = arith.select %13, %15, %4 : vector<12x1xi1>, vector<12x1xi32>
    %c0 = arith.constant 0 : index
    %c0_3 = arith.constant 0 : index
    %c0_4 = arith.constant 0 : index
    %17 = vector.load %arg1[%c0, %c0_3, %c0_4] : memref<3x12x45xf32, #tpu.memory_space<vmem>>, vector<1x12x45xf32>
    %18 = vector.shape_cast %17 : vector<1x12x45xf32> to vector<12x45xf32>
    %19 = vector.extract_strided_slice %18 {offsets = [0, 0], sizes = [12, 15], strides = [1, 1]} : vector<12x45xf32> to vector<12x15xf32>
    %20 = vector.extract_strided_slice %18 {offsets = [0, 15], sizes = [12, 15], strides = [1, 1]} : vector<12x45xf32> to vector<12x15xf32>
    %21 = vector.extract_strided_slice %18 {offsets = [0, 30], sizes = [12, 15], strides = [1, 1]} : vector<12x45xf32> to vector<12x15xf32>
    %22 = arith.mulf %19, %20 : vector<12x15xf32>
    %cst = arith.constant dense<0.000000e+00> : vector<12xf32>
    %23 = vector.multi_reduction <add>, %22, %cst [1] : vector<12x15xf32> to vector<12xf32>
    %24 = vector.shape_cast %23 : vector<12xf32> to vector<12x1xf32>
    %25 = vector.extract_strided_slice %19 {offsets = [1, 0], sizes = [11, 15], strides = [1, 1]} : vector<12x15xf32> to vector<11x15xf32>
    %26 = vector.extract_strided_slice %19 {offsets = [0, 0], sizes = [1, 15], strides = [1, 1]} : vector<12x15xf32> to vector<1x15xf32>
    %27 = tpu.concatenate %25, %26 in 0 : vector<11x15xf32>, vector<1x15xf32> -> vector<12x15xf32>
    %28 = vector.extract_strided_slice %19 {offsets = [7, 0], sizes = [5, 15], strides = [1, 1]} : vector<12x15xf32> to vector<5x15xf32>
    %29 = vector.extract_strided_slice %19 {offsets = [0, 0], sizes = [7, 15], strides = [1, 1]} : vector<12x15xf32> to vector<7x15xf32>
    %30 = tpu.concatenate %28, %29 in 0 : vector<5x15xf32>, vector<7x15xf32> -> vector<12x15xf32>
    %c5_i32 = arith.constant 5 : i32
    %31 = vector.broadcast %c5_i32 : i32 to vector<12x1xi32>
    %32 = arith.cmpi slt, %16, %31 : vector<12x1xi32>
    %33 = vector.shape_cast %32 : vector<12x1xi1> to vector<12x1xi1>
    %34 = vector.broadcast %33 : vector<12x1xi1> to vector<12x15xi1>
    %35 = arith.select %34, %27, %30 : vector<12x15xi1>, vector<12x15xf32>
    %36 = arith.mulf %35, %20 : vector<12x15xf32>
    %cst_5 = arith.constant dense<0.000000e+00> : vector<12xf32>
    %37 = vector.multi_reduction <add>, %36, %cst_5 [1] : vector<12x15xf32> to vector<12xf32>
    %38 = vector.shape_cast %37 : vector<12xf32> to vector<12x1xf32>
    %39 = vector.extract_strided_slice %19 {offsets = [2, 0], sizes = [10, 15], strides = [1, 1]} : vector<12x15xf32> to vector<10x15xf32>
    %40 = vector.extract_strided_slice %19 {offsets = [0, 0], sizes = [2, 15], strides = [1, 1]} : vector<12x15xf32> to vector<2x15xf32>
    %41 = tpu.concatenate %39, %40 in 0 : vector<10x15xf32>, vector<2x15xf32> -> vector<12x15xf32>
    %42 = vector.extract_strided_slice %19 {offsets = [8, 0], sizes = [4, 15], strides = [1, 1]} : vector<12x15xf32> to vector<4x15xf32>
    %43 = vector.extract_strided_slice %19 {offsets = [0, 0], sizes = [8, 15], strides = [1, 1]} : vector<12x15xf32> to vector<8x15xf32>
    %44 = tpu.concatenate %42, %43 in 0 : vector<4x15xf32>, vector<8x15xf32> -> vector<12x15xf32>
    %c4_i32 = arith.constant 4 : i32
    %45 = vector.broadcast %c4_i32 : i32 to vector<12x1xi32>
    %46 = arith.cmpi slt, %16, %45 : vector<12x1xi32>
    %47 = vector.shape_cast %46 : vector<12x1xi1> to vector<12x1xi1>
    %48 = vector.broadcast %47 : vector<12x1xi1> to vector<12x15xi1>
    %49 = arith.select %48, %41, %44 : vector<12x15xi1>, vector<12x15xf32>
    %50 = arith.mulf %49, %20 : vector<12x15xf32>
    %cst_6 = arith.constant dense<0.000000e+00> : vector<12xf32>
    %51 = vector.multi_reduction <add>, %50, %cst_6 [1] : vector<12x15xf32> to vector<12xf32>
    %52 = vector.shape_cast %51 : vector<12xf32> to vector<12x1xf32>
    %53 = vector.extract_strided_slice %19 {offsets = [3, 0], sizes = [9, 15], strides = [1, 1]} : vector<12x15xf32> to vector<9x15xf32>
    %54 = vector.extract_strided_slice %19 {offsets = [0, 0], sizes = [3, 15], strides = [1, 1]} : vector<12x15xf32> to vector<3x15xf32>
    %55 = tpu.concatenate %53, %54 in 0 : vector<9x15xf32>, vector<3x15xf32> -> vector<12x15xf32>
    %56 = vector.extract_strided_slice %19 {offsets = [9, 0], sizes = [3, 15], strides = [1, 1]} : vector<12x15xf32> to vector<3x15xf32>
    %57 = vector.extract_strided_slice %19 {offsets = [0, 0], sizes = [9, 15], strides = [1, 1]} : vector<12x15xf32> to vector<9x15xf32>
    %58 = tpu.concatenate %56, %57 in 0 : vector<3x15xf32>, vector<9x15xf32> -> vector<12x15xf32>
    %c3_i32 = arith.constant 3 : i32
    %59 = vector.broadcast %c3_i32 : i32 to vector<12x1xi32>
    %60 = arith.cmpi slt, %16, %59 : vector<12x1xi32>
    %61 = vector.shape_cast %60 : vector<12x1xi1> to vector<12x1xi1>
    %62 = vector.broadcast %61 : vector<12x1xi1> to vector<12x15xi1>
    %63 = arith.select %62, %55, %58 : vector<12x15xi1>, vector<12x15xf32>
    %64 = arith.mulf %63, %20 : vector<12x15xf32>
    %cst_7 = arith.constant dense<0.000000e+00> : vector<12xf32>
    %65 = vector.multi_reduction <add>, %64, %cst_7 [1] : vector<12x15xf32> to vector<12xf32>
    %66 = vector.shape_cast %65 : vector<12xf32> to vector<12x1xf32>
    %67 = vector.extract_strided_slice %19 {offsets = [4, 0], sizes = [8, 15], strides = [1, 1]} : vector<12x15xf32> to vector<8x15xf32>
    %68 = vector.extract_strided_slice %19 {offsets = [0, 0], sizes = [4, 15], strides = [1, 1]} : vector<12x15xf32> to vector<4x15xf32>
    %69 = tpu.concatenate %67, %68 in 0 : vector<8x15xf32>, vector<4x15xf32> -> vector<12x15xf32>
    %70 = vector.extract_strided_slice %19 {offsets = [10, 0], sizes = [2, 15], strides = [1, 1]} : vector<12x15xf32> to vector<2x15xf32>
    %71 = vector.extract_strided_slice %19 {offsets = [0, 0], sizes = [10, 15], strides = [1, 1]} : vector<12x15xf32> to vector<10x15xf32>
    %72 = tpu.concatenate %70, %71 in 0 : vector<2x15xf32>, vector<10x15xf32> -> vector<12x15xf32>
    %c2_i32 = arith.constant 2 : i32
    %73 = vector.broadcast %c2_i32 : i32 to vector<12x1xi32>
    %74 = arith.cmpi slt, %16, %73 : vector<12x1xi32>
    %75 = vector.shape_cast %74 : vector<12x1xi1> to vector<12x1xi1>
    %76 = vector.broadcast %75 : vector<12x1xi1> to vector<12x15xi1>
    %77 = arith.select %76, %69, %72 : vector<12x15xi1>, vector<12x15xf32>
    %78 = arith.mulf %77, %20 : vector<12x15xf32>
    %cst_8 = arith.constant dense<0.000000e+00> : vector<12xf32>
    %79 = vector.multi_reduction <add>, %78, %cst_8 [1] : vector<12x15xf32> to vector<12xf32>
    %80 = vector.shape_cast %79 : vector<12xf32> to vector<12x1xf32>
    %81 = vector.extract_strided_slice %19 {offsets = [5, 0], sizes = [7, 15], strides = [1, 1]} : vector<12x15xf32> to vector<7x15xf32>
    %82 = vector.extract_strided_slice %19 {offsets = [0, 0], sizes = [5, 15], strides = [1, 1]} : vector<12x15xf32> to vector<5x15xf32>
    %83 = tpu.concatenate %81, %82 in 0 : vector<7x15xf32>, vector<5x15xf32> -> vector<12x15xf32>
    %84 = vector.extract_strided_slice %19 {offsets = [11, 0], sizes = [1, 15], strides = [1, 1]} : vector<12x15xf32> to vector<1x15xf32>
    %85 = vector.extract_strided_slice %19 {offsets = [0, 0], sizes = [11, 15], strides = [1, 1]} : vector<12x15xf32> to vector<11x15xf32>
    %86 = tpu.concatenate %84, %85 in 0 : vector<1x15xf32>, vector<11x15xf32> -> vector<12x15xf32>
    %c1_i32_9 = arith.constant 1 : i32
    %87 = vector.broadcast %c1_i32_9 : i32 to vector<12x1xi32>
    %88 = arith.cmpi slt, %16, %87 : vector<12x1xi32>
    %89 = vector.shape_cast %88 : vector<12x1xi1> to vector<12x1xi1>
    %90 = vector.broadcast %89 : vector<12x1xi1> to vector<12x15xi1>
    %91 = arith.select %90, %83, %86 : vector<12x15xi1>, vector<12x15xf32>
    %92 = arith.mulf %91, %20 : vector<12x15xf32>
    %cst_10 = arith.constant dense<0.000000e+00> : vector<12xf32>
    %93 = vector.multi_reduction <add>, %92, %cst_10 [1] : vector<12x15xf32> to vector<12xf32>
    %94 = vector.shape_cast %93 : vector<12xf32> to vector<12x1xf32>
    %95 = tpu.concatenate %24, %38, %52, %66, %80, %94 in 1 : vector<12x1xf32>, vector<12x1xf32>, vector<12x1xf32>, vector<12x1xf32>, vector<12x1xf32>, vector<12x1xf32> -> vector<12x6xf32>
    %96 = vector.extract_strided_slice %95 {offsets = [1, 0], sizes = [11, 6], strides = [1, 1]} : vector<12x6xf32> to vector<11x6xf32>
    %97 = vector.extract_strided_slice %95 {offsets = [0, 0], sizes = [1, 6], strides = [1, 1]} : vector<12x6xf32> to vector<1x6xf32>
    %98 = tpu.concatenate %96, %97 in 0 : vector<11x6xf32>, vector<1x6xf32> -> vector<12x6xf32>
    %99 = vector.extract_strided_slice %95 {offsets = [7, 0], sizes = [5, 6], strides = [1, 1]} : vector<12x6xf32> to vector<5x6xf32>
    %100 = vector.extract_strided_slice %95 {offsets = [0, 0], sizes = [7, 6], strides = [1, 1]} : vector<12x6xf32> to vector<7x6xf32>
    %101 = tpu.concatenate %99, %100 in 0 : vector<5x6xf32>, vector<7x6xf32> -> vector<12x6xf32>
    %c5_i32_11 = arith.constant 5 : i32
    %102 = vector.broadcast %c5_i32_11 : i32 to vector<12x1xi32>
    %103 = arith.cmpi slt, %16, %102 : vector<12x1xi32>
    %104 = vector.shape_cast %103 : vector<12x1xi1> to vector<12x1xi1>
    %105 = vector.broadcast %104 : vector<12x1xi1> to vector<12x6xi1>
    %106 = arith.select %105, %98, %101 : vector<12x6xi1>, vector<12x6xf32>
    %107 = arith.addf %95, %106 : vector<12x6xf32>
    %108 = vector.extract_strided_slice %95 {offsets = [2, 0], sizes = [10, 6], strides = [1, 1]} : vector<12x6xf32> to vector<10x6xf32>
    %109 = vector.extract_strided_slice %95 {offsets = [0, 0], sizes = [2, 6], strides = [1, 1]} : vector<12x6xf32> to vector<2x6xf32>
    %110 = tpu.concatenate %108, %109 in 0 : vector<10x6xf32>, vector<2x6xf32> -> vector<12x6xf32>
    %111 = vector.extract_strided_slice %95 {offsets = [8, 0], sizes = [4, 6], strides = [1, 1]} : vector<12x6xf32> to vector<4x6xf32>
    %112 = vector.extract_strided_slice %95 {offsets = [0, 0], sizes = [8, 6], strides = [1, 1]} : vector<12x6xf32> to vector<8x6xf32>
    %113 = tpu.concatenate %111, %112 in 0 : vector<4x6xf32>, vector<8x6xf32> -> vector<12x6xf32>
    %c4_i32_12 = arith.constant 4 : i32
    %114 = vector.broadcast %c4_i32_12 : i32 to vector<12x1xi32>
    %115 = arith.cmpi slt, %16, %114 : vector<12x1xi32>
    %116 = vector.shape_cast %115 : vector<12x1xi1> to vector<12x1xi1>
    %117 = vector.broadcast %116 : vector<12x1xi1> to vector<12x6xi1>
    %118 = arith.select %117, %110, %113 : vector<12x6xi1>, vector<12x6xf32>
    %119 = arith.addf %107, %118 : vector<12x6xf32>
    %120 = vector.extract_strided_slice %95 {offsets = [3, 0], sizes = [9, 6], strides = [1, 1]} : vector<12x6xf32> to vector<9x6xf32>
    %121 = vector.extract_strided_slice %95 {offsets = [0, 0], sizes = [3, 6], strides = [1, 1]} : vector<12x6xf32> to vector<3x6xf32>
    %122 = tpu.concatenate %120, %121 in 0 : vector<9x6xf32>, vector<3x6xf32> -> vector<12x6xf32>
    %123 = vector.extract_strided_slice %95 {offsets = [9, 0], sizes = [3, 6], strides = [1, 1]} : vector<12x6xf32> to vector<3x6xf32>
    %124 = vector.extract_strided_slice %95 {offsets = [0, 0], sizes = [9, 6], strides = [1, 1]} : vector<12x6xf32> to vector<9x6xf32>
    %125 = tpu.concatenate %123, %124 in 0 : vector<3x6xf32>, vector<9x6xf32> -> vector<12x6xf32>
    %c3_i32_13 = arith.constant 3 : i32
    %126 = vector.broadcast %c3_i32_13 : i32 to vector<12x1xi32>
    %127 = arith.cmpi slt, %16, %126 : vector<12x1xi32>
    %128 = vector.shape_cast %127 : vector<12x1xi1> to vector<12x1xi1>
    %129 = vector.broadcast %128 : vector<12x1xi1> to vector<12x6xi1>
    %130 = arith.select %129, %122, %125 : vector<12x6xi1>, vector<12x6xf32>
    %131 = arith.addf %119, %130 : vector<12x6xf32>
    %132 = vector.extract_strided_slice %95 {offsets = [4, 0], sizes = [8, 6], strides = [1, 1]} : vector<12x6xf32> to vector<8x6xf32>
    %133 = vector.extract_strided_slice %95 {offsets = [0, 0], sizes = [4, 6], strides = [1, 1]} : vector<12x6xf32> to vector<4x6xf32>
    %134 = tpu.concatenate %132, %133 in 0 : vector<8x6xf32>, vector<4x6xf32> -> vector<12x6xf32>
    %135 = vector.extract_strided_slice %95 {offsets = [10, 0], sizes = [2, 6], strides = [1, 1]} : vector<12x6xf32> to vector<2x6xf32>
    %136 = vector.extract_strided_slice %95 {offsets = [0, 0], sizes = [10, 6], strides = [1, 1]} : vector<12x6xf32> to vector<10x6xf32>
    %137 = tpu.concatenate %135, %136 in 0 : vector<2x6xf32>, vector<10x6xf32> -> vector<12x6xf32>
    %c2_i32_14 = arith.constant 2 : i32
    %138 = vector.broadcast %c2_i32_14 : i32 to vector<12x1xi32>
    %139 = arith.cmpi slt, %16, %138 : vector<12x1xi32>
    %140 = vector.shape_cast %139 : vector<12x1xi1> to vector<12x1xi1>
    %141 = vector.broadcast %140 : vector<12x1xi1> to vector<12x6xi1>
    %142 = arith.select %141, %134, %137 : vector<12x6xi1>, vector<12x6xf32>
    %143 = arith.addf %131, %142 : vector<12x6xf32>
    %144 = vector.extract_strided_slice %95 {offsets = [5, 0], sizes = [7, 6], strides = [1, 1]} : vector<12x6xf32> to vector<7x6xf32>
    %145 = vector.extract_strided_slice %95 {offsets = [0, 0], sizes = [5, 6], strides = [1, 1]} : vector<12x6xf32> to vector<5x6xf32>
    %146 = tpu.concatenate %144, %145 in 0 : vector<7x6xf32>, vector<5x6xf32> -> vector<12x6xf32>
    %147 = vector.extract_strided_slice %95 {offsets = [11, 0], sizes = [1, 6], strides = [1, 1]} : vector<12x6xf32> to vector<1x6xf32>
    %148 = vector.extract_strided_slice %95 {offsets = [0, 0], sizes = [11, 6], strides = [1, 1]} : vector<12x6xf32> to vector<11x6xf32>
    %149 = tpu.concatenate %147, %148 in 0 : vector<1x6xf32>, vector<11x6xf32> -> vector<12x6xf32>
    %c1_i32_15 = arith.constant 1 : i32
    %150 = vector.broadcast %c1_i32_15 : i32 to vector<12x1xi32>
    %151 = arith.cmpi slt, %16, %150 : vector<12x1xi32>
    %152 = vector.shape_cast %151 : vector<12x1xi1> to vector<12x1xi1>
    %153 = vector.broadcast %152 : vector<12x1xi1> to vector<12x6xi1>
    %154 = arith.select %153, %146, %149 : vector<12x6xi1>, vector<12x6xf32>
    %155 = arith.addf %143, %154 : vector<12x6xf32>
    %156 = tpu.iota {dimensions = array<i32: 1>} : vector<12x6xi32>
    %cst_16 = arith.constant dense<0xFF800000> : vector<12xf32>
    %157 = vector.multi_reduction <maximumf>, %155, %cst_16 [1] : vector<12x6xf32> to vector<12xf32>
    %158 = vector.shape_cast %157 : vector<12xf32> to vector<12x1xf32>
    %159 = vector.broadcast %158 : vector<12x1xf32> to vector<12x6xf32>
    %160 = arith.cmpf oge, %155, %159 : vector<12x6xf32>
    %c6_i32_17 = arith.constant 6 : i32
    %161 = vector.broadcast %c6_i32_17 : i32 to vector<12x6xi32>
    %162 = arith.select %160, %156, %161 : vector<12x6xi1>, vector<12x6xi32>
    %cst_18 = arith.constant dense<2147483647> : vector<12xi32>
    %163 = vector.multi_reduction <minsi>, %162, %cst_18 [1] : vector<12x6xi32> to vector<12xi32>
    %164 = vector.shape_cast %163 : vector<12xi32> to vector<12x1xi32>
    %cst_19 = arith.constant 0.000000e+00 : f32
    %165 = vector.broadcast %cst_19 : f32 to vector<12x15xf32>
    %c0_i32_20 = arith.constant 0 : i32
    %166 = vector.broadcast %c0_i32_20 : i32 to vector<12x1xi32>
    %167 = arith.cmpi eq, %164, %166 : vector<12x1xi32>
    %cst_21 = arith.constant 1.000000e+00 : f32
    %cst_22 = arith.constant 0.000000e+00 : f32
    %168 = vector.broadcast %cst_21 : f32 to vector<12x1xf32>
    %169 = vector.broadcast %cst_22 : f32 to vector<12x1xf32>
    %170 = arith.select %167, %168, %169 : vector<12x1xi1>, vector<12x1xf32>
    %171 = vector.broadcast %170 : vector<12x1xf32> to vector<12x15xf32>
    %172 = arith.mulf %171, %21 : vector<12x15xf32>
    %173 = arith.addf %165, %172 : vector<12x15xf32>
    %c1_i32_23 = arith.constant 1 : i32
    %174 = vector.broadcast %c1_i32_23 : i32 to vector<12x1xi32>
    %175 = arith.cmpi eq, %164, %174 : vector<12x1xi32>
    %cst_24 = arith.constant 1.000000e+00 : f32
    %cst_25 = arith.constant 0.000000e+00 : f32
    %176 = vector.broadcast %cst_24 : f32 to vector<12x1xf32>
    %177 = vector.broadcast %cst_25 : f32 to vector<12x1xf32>
    %178 = arith.select %175, %176, %177 : vector<12x1xi1>, vector<12x1xf32>
    %179 = vector.extract_strided_slice %21 {offsets = [1, 0], sizes = [11, 15], strides = [1, 1]} : vector<12x15xf32> to vector<11x15xf32>
    %180 = vector.extract_strided_slice %21 {offsets = [0, 0], sizes = [1, 15], strides = [1, 1]} : vector<12x15xf32> to vector<1x15xf32>
    %181 = tpu.concatenate %179, %180 in 0 : vector<11x15xf32>, vector<1x15xf32> -> vector<12x15xf32>
    %182 = vector.extract_strided_slice %21 {offsets = [7, 0], sizes = [5, 15], strides = [1, 1]} : vector<12x15xf32> to vector<5x15xf32>
    %183 = vector.extract_strided_slice %21 {offsets = [0, 0], sizes = [7, 15], strides = [1, 1]} : vector<12x15xf32> to vector<7x15xf32>
    %184 = tpu.concatenate %182, %183 in 0 : vector<5x15xf32>, vector<7x15xf32> -> vector<12x15xf32>
    %c5_i32_26 = arith.constant 5 : i32
    %185 = vector.broadcast %c5_i32_26 : i32 to vector<12x1xi32>
    %186 = arith.cmpi slt, %16, %185 : vector<12x1xi32>
    %187 = vector.shape_cast %186 : vector<12x1xi1> to vector<12x1xi1>
    %188 = vector.broadcast %187 : vector<12x1xi1> to vector<12x15xi1>
    %189 = arith.select %188, %181, %184 : vector<12x15xi1>, vector<12x15xf32>
    %190 = vector.broadcast %178 : vector<12x1xf32> to vector<12x15xf32>
    %191 = arith.mulf %190, %189 : vector<12x15xf32>
    %192 = arith.addf %173, %191 : vector<12x15xf32>
    %c2_i32_27 = arith.constant 2 : i32
    %193 = vector.broadcast %c2_i32_27 : i32 to vector<12x1xi32>
    %194 = arith.cmpi eq, %164, %193 : vector<12x1xi32>
    %cst_28 = arith.constant 1.000000e+00 : f32
    %cst_29 = arith.constant 0.000000e+00 : f32
    %195 = vector.broadcast %cst_28 : f32 to vector<12x1xf32>
    %196 = vector.broadcast %cst_29 : f32 to vector<12x1xf32>
    %197 = arith.select %194, %195, %196 : vector<12x1xi1>, vector<12x1xf32>
    %198 = vector.extract_strided_slice %21 {offsets = [2, 0], sizes = [10, 15], strides = [1, 1]} : vector<12x15xf32> to vector<10x15xf32>
    %199 = vector.extract_strided_slice %21 {offsets = [0, 0], sizes = [2, 15], strides = [1, 1]} : vector<12x15xf32> to vector<2x15xf32>
    %200 = tpu.concatenate %198, %199 in 0 : vector<10x15xf32>, vector<2x15xf32> -> vector<12x15xf32>
    %201 = vector.extract_strided_slice %21 {offsets = [8, 0], sizes = [4, 15], strides = [1, 1]} : vector<12x15xf32> to vector<4x15xf32>
    %202 = vector.extract_strided_slice %21 {offsets = [0, 0], sizes = [8, 15], strides = [1, 1]} : vector<12x15xf32> to vector<8x15xf32>
    %203 = tpu.concatenate %201, %202 in 0 : vector<4x15xf32>, vector<8x15xf32> -> vector<12x15xf32>
    %c4_i32_30 = arith.constant 4 : i32
    %204 = vector.broadcast %c4_i32_30 : i32 to vector<12x1xi32>
    %205 = arith.cmpi slt, %16, %204 : vector<12x1xi32>
    %206 = vector.shape_cast %205 : vector<12x1xi1> to vector<12x1xi1>
    %207 = vector.broadcast %206 : vector<12x1xi1> to vector<12x15xi1>
    %208 = arith.select %207, %200, %203 : vector<12x15xi1>, vector<12x15xf32>
    %209 = vector.broadcast %197 : vector<12x1xf32> to vector<12x15xf32>
    %210 = arith.mulf %209, %208 : vector<12x15xf32>
    %211 = arith.addf %192, %210 : vector<12x15xf32>
    %c3_i32_31 = arith.constant 3 : i32
    %212 = vector.broadcast %c3_i32_31 : i32 to vector<12x1xi32>
    %213 = arith.cmpi eq, %164, %212 : vector<12x1xi32>
    %cst_32 = arith.constant 1.000000e+00 : f32
    %cst_33 = arith.constant 0.000000e+00 : f32
    %214 = vector.broadcast %cst_32 : f32 to vector<12x1xf32>
    %215 = vector.broadcast %cst_33 : f32 to vector<12x1xf32>
    %216 = arith.select %213, %214, %215 : vector<12x1xi1>, vector<12x1xf32>
    %217 = vector.extract_strided_slice %21 {offsets = [3, 0], sizes = [9, 15], strides = [1, 1]} : vector<12x15xf32> to vector<9x15xf32>
    %218 = vector.extract_strided_slice %21 {offsets = [0, 0], sizes = [3, 15], strides = [1, 1]} : vector<12x15xf32> to vector<3x15xf32>
    %219 = tpu.concatenate %217, %218 in 0 : vector<9x15xf32>, vector<3x15xf32> -> vector<12x15xf32>
    %220 = vector.extract_strided_slice %21 {offsets = [9, 0], sizes = [3, 15], strides = [1, 1]} : vector<12x15xf32> to vector<3x15xf32>
    %221 = vector.extract_strided_slice %21 {offsets = [0, 0], sizes = [9, 15], strides = [1, 1]} : vector<12x15xf32> to vector<9x15xf32>
    %222 = tpu.concatenate %220, %221 in 0 : vector<3x15xf32>, vector<9x15xf32> -> vector<12x15xf32>
    %c3_i32_34 = arith.constant 3 : i32
    %223 = vector.broadcast %c3_i32_34 : i32 to vector<12x1xi32>
    %224 = arith.cmpi slt, %16, %223 : vector<12x1xi32>
    %225 = vector.shape_cast %224 : vector<12x1xi1> to vector<12x1xi1>
    %226 = vector.broadcast %225 : vector<12x1xi1> to vector<12x15xi1>
    %227 = arith.select %226, %219, %222 : vector<12x15xi1>, vector<12x15xf32>
    %228 = vector.broadcast %216 : vector<12x1xf32> to vector<12x15xf32>
    %229 = arith.mulf %228, %227 : vector<12x15xf32>
    %230 = arith.addf %211, %229 : vector<12x15xf32>
    %c4_i32_35 = arith.constant 4 : i32
    %231 = vector.broadcast %c4_i32_35 : i32 to vector<12x1xi32>
    %232 = arith.cmpi eq, %164, %231 : vector<12x1xi32>
    %cst_36 = arith.constant 1.000000e+00 : f32
    %cst_37 = arith.constant 0.000000e+00 : f32
    %233 = vector.broadcast %cst_36 : f32 to vector<12x1xf32>
    %234 = vector.broadcast %cst_37 : f32 to vector<12x1xf32>
    %235 = arith.select %232, %233, %234 : vector<12x1xi1>, vector<12x1xf32>
    %236 = vector.extract_strided_slice %21 {offsets = [4, 0], sizes = [8, 15], strides = [1, 1]} : vector<12x15xf32> to vector<8x15xf32>
    %237 = vector.extract_strided_slice %21 {offsets = [0, 0], sizes = [4, 15], strides = [1, 1]} : vector<12x15xf32> to vector<4x15xf32>
    %238 = tpu.concatenate %236, %237 in 0 : vector<8x15xf32>, vector<4x15xf32> -> vector<12x15xf32>
    %239 = vector.extract_strided_slice %21 {offsets = [10, 0], sizes = [2, 15], strides = [1, 1]} : vector<12x15xf32> to vector<2x15xf32>
    %240 = vector.extract_strided_slice %21 {offsets = [0, 0], sizes = [10, 15], strides = [1, 1]} : vector<12x15xf32> to vector<10x15xf32>
    %241 = tpu.concatenate %239, %240 in 0 : vector<2x15xf32>, vector<10x15xf32> -> vector<12x15xf32>
    %c2_i32_38 = arith.constant 2 : i32
    %242 = vector.broadcast %c2_i32_38 : i32 to vector<12x1xi32>
    %243 = arith.cmpi slt, %16, %242 : vector<12x1xi32>
    %244 = vector.shape_cast %243 : vector<12x1xi1> to vector<12x1xi1>
    %245 = vector.broadcast %244 : vector<12x1xi1> to vector<12x15xi1>
    %246 = arith.select %245, %238, %241 : vector<12x15xi1>, vector<12x15xf32>
    %247 = vector.broadcast %235 : vector<12x1xf32> to vector<12x15xf32>
    %248 = arith.mulf %247, %246 : vector<12x15xf32>
    %249 = arith.addf %230, %248 : vector<12x15xf32>
    %c5_i32_39 = arith.constant 5 : i32
    %250 = vector.broadcast %c5_i32_39 : i32 to vector<12x1xi32>
    %251 = arith.cmpi eq, %164, %250 : vector<12x1xi32>
    %cst_40 = arith.constant 1.000000e+00 : f32
    %cst_41 = arith.constant 0.000000e+00 : f32
    %252 = vector.broadcast %cst_40 : f32 to vector<12x1xf32>
    %253 = vector.broadcast %cst_41 : f32 to vector<12x1xf32>
    %254 = arith.select %251, %252, %253 : vector<12x1xi1>, vector<12x1xf32>
    %255 = vector.extract_strided_slice %21 {offsets = [5, 0], sizes = [7, 15], strides = [1, 1]} : vector<12x15xf32> to vector<7x15xf32>
    %256 = vector.extract_strided_slice %21 {offsets = [0, 0], sizes = [5, 15], strides = [1, 1]} : vector<12x15xf32> to vector<5x15xf32>
    %257 = tpu.concatenate %255, %256 in 0 : vector<7x15xf32>, vector<5x15xf32> -> vector<12x15xf32>
    %258 = vector.extract_strided_slice %21 {offsets = [11, 0], sizes = [1, 15], strides = [1, 1]} : vector<12x15xf32> to vector<1x15xf32>
    %259 = vector.extract_strided_slice %21 {offsets = [0, 0], sizes = [11, 15], strides = [1, 1]} : vector<12x15xf32> to vector<11x15xf32>
    %260 = tpu.concatenate %258, %259 in 0 : vector<1x15xf32>, vector<11x15xf32> -> vector<12x15xf32>
    %c1_i32_42 = arith.constant 1 : i32
    %261 = vector.broadcast %c1_i32_42 : i32 to vector<12x1xi32>
    %262 = arith.cmpi slt, %16, %261 : vector<12x1xi32>
    %263 = vector.shape_cast %262 : vector<12x1xi1> to vector<12x1xi1>
    %264 = vector.broadcast %263 : vector<12x1xi1> to vector<12x15xi1>
    %265 = arith.select %264, %257, %260 : vector<12x15xi1>, vector<12x15xf32>
    %266 = vector.broadcast %254 : vector<12x1xf32> to vector<12x15xf32>
    %267 = arith.mulf %266, %265 : vector<12x15xf32>
    %268 = arith.addf %249, %267 : vector<12x15xf32>
    %c0_43 = arith.constant 0 : index
    %c0_44 = arith.constant 0 : index
    %269 = vector.load %arg2[%c0_43, %c0_44] : memref<15x60xf32, #tpu.memory_space<vmem>>, vector<15x60xf32>
    %cst_45 = arith.constant dense<0.000000e+00> : vector<12x60xf32>
    %270 = tpu.matmul %268, %269, %cst_45 {dimension_numbers = #tpu.dot_dimension_numbers<[1], [0], [0], [1], [0, 0, 1, 1], [], []>} : vector<12x15xf32>, vector<15x60xf32>, vector<12x60xf32> -> vector<12x60xf32>
    %c0_46 = arith.constant 0 : index
    %c0_47 = arith.constant 0 : index
    %271 = vector.load %arg3[%c0_46, %c0_47] : memref<1x60xf32, #tpu.memory_space<vmem>>, vector<1x60xf32>
    %272 = vector.broadcast %271 : vector<1x60xf32> to vector<12x60xf32>
    %273 = arith.addf %270, %272 : vector<12x60xf32>
    %c0_48 = arith.constant 0 : index
    %c0_49 = arith.constant 0 : index
    %274 = vector.load %arg4[%c0_48, %c0_49] : memref<60x8xf32, #tpu.memory_space<vmem>>, vector<60x8xf32>
    %cst_50 = arith.constant dense<0.000000e+00> : vector<12x8xf32>
    %275 = tpu.matmul %273, %274, %cst_50 {dimension_numbers = #tpu.dot_dimension_numbers<[1], [0], [0], [1], [0, 0, 1, 1], [], []>} : vector<12x60xf32>, vector<60x8xf32>, vector<12x8xf32> -> vector<12x8xf32>
    %c1 = arith.constant 1 : index
    %c0_51 = arith.constant 0 : index
    %c0_52 = arith.constant 0 : index
    %276 = vector.load %arg1[%c1, %c0_51, %c0_52] : memref<3x12x45xf32, #tpu.memory_space<vmem>>, vector<1x12x45xf32>
    %277 = vector.shape_cast %276 : vector<1x12x45xf32> to vector<12x45xf32>
    %278 = vector.extract_strided_slice %277 {offsets = [0, 0], sizes = [12, 15], strides = [1, 1]} : vector<12x45xf32> to vector<12x15xf32>
    %279 = vector.extract_strided_slice %277 {offsets = [0, 15], sizes = [12, 15], strides = [1, 1]} : vector<12x45xf32> to vector<12x15xf32>
    %280 = vector.extract_strided_slice %277 {offsets = [0, 30], sizes = [12, 15], strides = [1, 1]} : vector<12x45xf32> to vector<12x15xf32>
    %281 = arith.mulf %278, %279 : vector<12x15xf32>
    %cst_53 = arith.constant dense<0.000000e+00> : vector<12xf32>
    %282 = vector.multi_reduction <add>, %281, %cst_53 [1] : vector<12x15xf32> to vector<12xf32>
    %283 = vector.shape_cast %282 : vector<12xf32> to vector<12x1xf32>
    %284 = vector.extract_strided_slice %278 {offsets = [1, 0], sizes = [11, 15], strides = [1, 1]} : vector<12x15xf32> to vector<11x15xf32>
    %285 = vector.extract_strided_slice %278 {offsets = [0, 0], sizes = [1, 15], strides = [1, 1]} : vector<12x15xf32> to vector<1x15xf32>
    %286 = tpu.concatenate %284, %285 in 0 : vector<11x15xf32>, vector<1x15xf32> -> vector<12x15xf32>
    %287 = vector.extract_strided_slice %278 {offsets = [7, 0], sizes = [5, 15], strides = [1, 1]} : vector<12x15xf32> to vector<5x15xf32>
    %288 = vector.extract_strided_slice %278 {offsets = [0, 0], sizes = [7, 15], strides = [1, 1]} : vector<12x15xf32> to vector<7x15xf32>
    %289 = tpu.concatenate %287, %288 in 0 : vector<5x15xf32>, vector<7x15xf32> -> vector<12x15xf32>
    %c5_i32_54 = arith.constant 5 : i32
    %290 = vector.broadcast %c5_i32_54 : i32 to vector<12x1xi32>
    %291 = arith.cmpi slt, %16, %290 : vector<12x1xi32>
    %292 = vector.shape_cast %291 : vector<12x1xi1> to vector<12x1xi1>
    %293 = vector.broadcast %292 : vector<12x1xi1> to vector<12x15xi1>
    %294 = arith.select %293, %286, %289 : vector<12x15xi1>, vector<12x15xf32>
    %295 = arith.mulf %294, %279 : vector<12x15xf32>
    %cst_55 = arith.constant dense<0.000000e+00> : vector<12xf32>
    %296 = vector.multi_reduction <add>, %295, %cst_55 [1] : vector<12x15xf32> to vector<12xf32>
    %297 = vector.shape_cast %296 : vector<12xf32> to vector<12x1xf32>
    %298 = vector.extract_strided_slice %278 {offsets = [2, 0], sizes = [10, 15], strides = [1, 1]} : vector<12x15xf32> to vector<10x15xf32>
    %299 = vector.extract_strided_slice %278 {offsets = [0, 0], sizes = [2, 15], strides = [1, 1]} : vector<12x15xf32> to vector<2x15xf32>
    %300 = tpu.concatenate %298, %299 in 0 : vector<10x15xf32>, vector<2x15xf32> -> vector<12x15xf32>
    %301 = vector.extract_strided_slice %278 {offsets = [8, 0], sizes = [4, 15], strides = [1, 1]} : vector<12x15xf32> to vector<4x15xf32>
    %302 = vector.extract_strided_slice %278 {offsets = [0, 0], sizes = [8, 15], strides = [1, 1]} : vector<12x15xf32> to vector<8x15xf32>
    %303 = tpu.concatenate %301, %302 in 0 : vector<4x15xf32>, vector<8x15xf32> -> vector<12x15xf32>
    %c4_i32_56 = arith.constant 4 : i32
    %304 = vector.broadcast %c4_i32_56 : i32 to vector<12x1xi32>
    %305 = arith.cmpi slt, %16, %304 : vector<12x1xi32>
    %306 = vector.shape_cast %305 : vector<12x1xi1> to vector<12x1xi1>
    %307 = vector.broadcast %306 : vector<12x1xi1> to vector<12x15xi1>
    %308 = arith.select %307, %300, %303 : vector<12x15xi1>, vector<12x15xf32>
    %309 = arith.mulf %308, %279 : vector<12x15xf32>
    %cst_57 = arith.constant dense<0.000000e+00> : vector<12xf32>
    %310 = vector.multi_reduction <add>, %309, %cst_57 [1] : vector<12x15xf32> to vector<12xf32>
    %311 = vector.shape_cast %310 : vector<12xf32> to vector<12x1xf32>
    %312 = vector.extract_strided_slice %278 {offsets = [3, 0], sizes = [9, 15], strides = [1, 1]} : vector<12x15xf32> to vector<9x15xf32>
    %313 = vector.extract_strided_slice %278 {offsets = [0, 0], sizes = [3, 15], strides = [1, 1]} : vector<12x15xf32> to vector<3x15xf32>
    %314 = tpu.concatenate %312, %313 in 0 : vector<9x15xf32>, vector<3x15xf32> -> vector<12x15xf32>
    %315 = vector.extract_strided_slice %278 {offsets = [9, 0], sizes = [3, 15], strides = [1, 1]} : vector<12x15xf32> to vector<3x15xf32>
    %316 = vector.extract_strided_slice %278 {offsets = [0, 0], sizes = [9, 15], strides = [1, 1]} : vector<12x15xf32> to vector<9x15xf32>
    %317 = tpu.concatenate %315, %316 in 0 : vector<3x15xf32>, vector<9x15xf32> -> vector<12x15xf32>
    %c3_i32_58 = arith.constant 3 : i32
    %318 = vector.broadcast %c3_i32_58 : i32 to vector<12x1xi32>
    %319 = arith.cmpi slt, %16, %318 : vector<12x1xi32>
    %320 = vector.shape_cast %319 : vector<12x1xi1> to vector<12x1xi1>
    %321 = vector.broadcast %320 : vector<12x1xi1> to vector<12x15xi1>
    %322 = arith.select %321, %314, %317 : vector<12x15xi1>, vector<12x15xf32>
    %323 = arith.mulf %322, %279 : vector<12x15xf32>
    %cst_59 = arith.constant dense<0.000000e+00> : vector<12xf32>
    %324 = vector.multi_reduction <add>, %323, %cst_59 [1] : vector<12x15xf32> to vector<12xf32>
    %325 = vector.shape_cast %324 : vector<12xf32> to vector<12x1xf32>
    %326 = vector.extract_strided_slice %278 {offsets = [4, 0], sizes = [8, 15], strides = [1, 1]} : vector<12x15xf32> to vector<8x15xf32>
    %327 = vector.extract_strided_slice %278 {offsets = [0, 0], sizes = [4, 15], strides = [1, 1]} : vector<12x15xf32> to vector<4x15xf32>
    %328 = tpu.concatenate %326, %327 in 0 : vector<8x15xf32>, vector<4x15xf32> -> vector<12x15xf32>
    %329 = vector.extract_strided_slice %278 {offsets = [10, 0], sizes = [2, 15], strides = [1, 1]} : vector<12x15xf32> to vector<2x15xf32>
    %330 = vector.extract_strided_slice %278 {offsets = [0, 0], sizes = [10, 15], strides = [1, 1]} : vector<12x15xf32> to vector<10x15xf32>
    %331 = tpu.concatenate %329, %330 in 0 : vector<2x15xf32>, vector<10x15xf32> -> vector<12x15xf32>
    %c2_i32_60 = arith.constant 2 : i32
    %332 = vector.broadcast %c2_i32_60 : i32 to vector<12x1xi32>
    %333 = arith.cmpi slt, %16, %332 : vector<12x1xi32>
    %334 = vector.shape_cast %333 : vector<12x1xi1> to vector<12x1xi1>
    %335 = vector.broadcast %334 : vector<12x1xi1> to vector<12x15xi1>
    %336 = arith.select %335, %328, %331 : vector<12x15xi1>, vector<12x15xf32>
    %337 = arith.mulf %336, %279 : vector<12x15xf32>
    %cst_61 = arith.constant dense<0.000000e+00> : vector<12xf32>
    %338 = vector.multi_reduction <add>, %337, %cst_61 [1] : vector<12x15xf32> to vector<12xf32>
    %339 = vector.shape_cast %338 : vector<12xf32> to vector<12x1xf32>
    %340 = vector.extract_strided_slice %278 {offsets = [5, 0], sizes = [7, 15], strides = [1, 1]} : vector<12x15xf32> to vector<7x15xf32>
    %341 = vector.extract_strided_slice %278 {offsets = [0, 0], sizes = [5, 15], strides = [1, 1]} : vector<12x15xf32> to vector<5x15xf32>
    %342 = tpu.concatenate %340, %341 in 0 : vector<7x15xf32>, vector<5x15xf32> -> vector<12x15xf32>
    %343 = vector.extract_strided_slice %278 {offsets = [11, 0], sizes = [1, 15], strides = [1, 1]} : vector<12x15xf32> to vector<1x15xf32>
    %344 = vector.extract_strided_slice %278 {offsets = [0, 0], sizes = [11, 15], strides = [1, 1]} : vector<12x15xf32> to vector<11x15xf32>
    %345 = tpu.concatenate %343, %344 in 0 : vector<1x15xf32>, vector<11x15xf32> -> vector<12x15xf32>
    %c1_i32_62 = arith.constant 1 : i32
    %346 = vector.broadcast %c1_i32_62 : i32 to vector<12x1xi32>
    %347 = arith.cmpi slt, %16, %346 : vector<12x1xi32>
    %348 = vector.shape_cast %347 : vector<12x1xi1> to vector<12x1xi1>
    %349 = vector.broadcast %348 : vector<12x1xi1> to vector<12x15xi1>
    %350 = arith.select %349, %342, %345 : vector<12x15xi1>, vector<12x15xf32>
    %351 = arith.mulf %350, %279 : vector<12x15xf32>
    %cst_63 = arith.constant dense<0.000000e+00> : vector<12xf32>
    %352 = vector.multi_reduction <add>, %351, %cst_63 [1] : vector<12x15xf32> to vector<12xf32>
    %353 = vector.shape_cast %352 : vector<12xf32> to vector<12x1xf32>
    %354 = tpu.concatenate %283, %297, %311, %325, %339, %353 in 1 : vector<12x1xf32>, vector<12x1xf32>, vector<12x1xf32>, vector<12x1xf32>, vector<12x1xf32>, vector<12x1xf32> -> vector<12x6xf32>
    %355 = vector.extract_strided_slice %354 {offsets = [1, 0], sizes = [11, 6], strides = [1, 1]} : vector<12x6xf32> to vector<11x6xf32>
    %356 = vector.extract_strided_slice %354 {offsets = [0, 0], sizes = [1, 6], strides = [1, 1]} : vector<12x6xf32> to vector<1x6xf32>
    %357 = tpu.concatenate %355, %356 in 0 : vector<11x6xf32>, vector<1x6xf32> -> vector<12x6xf32>
    %358 = vector.extract_strided_slice %354 {offsets = [7, 0], sizes = [5, 6], strides = [1, 1]} : vector<12x6xf32> to vector<5x6xf32>
    %359 = vector.extract_strided_slice %354 {offsets = [0, 0], sizes = [7, 6], strides = [1, 1]} : vector<12x6xf32> to vector<7x6xf32>
    %360 = tpu.concatenate %358, %359 in 0 : vector<5x6xf32>, vector<7x6xf32> -> vector<12x6xf32>
    %c5_i32_64 = arith.constant 5 : i32
    %361 = vector.broadcast %c5_i32_64 : i32 to vector<12x1xi32>
    %362 = arith.cmpi slt, %16, %361 : vector<12x1xi32>
    %363 = vector.shape_cast %362 : vector<12x1xi1> to vector<12x1xi1>
    %364 = vector.broadcast %363 : vector<12x1xi1> to vector<12x6xi1>
    %365 = arith.select %364, %357, %360 : vector<12x6xi1>, vector<12x6xf32>
    %366 = arith.addf %354, %365 : vector<12x6xf32>
    %367 = vector.extract_strided_slice %354 {offsets = [2, 0], sizes = [10, 6], strides = [1, 1]} : vector<12x6xf32> to vector<10x6xf32>
    %368 = vector.extract_strided_slice %354 {offsets = [0, 0], sizes = [2, 6], strides = [1, 1]} : vector<12x6xf32> to vector<2x6xf32>
    %369 = tpu.concatenate %367, %368 in 0 : vector<10x6xf32>, vector<2x6xf32> -> vector<12x6xf32>
    %370 = vector.extract_strided_slice %354 {offsets = [8, 0], sizes = [4, 6], strides = [1, 1]} : vector<12x6xf32> to vector<4x6xf32>
    %371 = vector.extract_strided_slice %354 {offsets = [0, 0], sizes = [8, 6], strides = [1, 1]} : vector<12x6xf32> to vector<8x6xf32>
    %372 = tpu.concatenate %370, %371 in 0 : vector<4x6xf32>, vector<8x6xf32> -> vector<12x6xf32>
    %c4_i32_65 = arith.constant 4 : i32
    %373 = vector.broadcast %c4_i32_65 : i32 to vector<12x1xi32>
    %374 = arith.cmpi slt, %16, %373 : vector<12x1xi32>
    %375 = vector.shape_cast %374 : vector<12x1xi1> to vector<12x1xi1>
    %376 = vector.broadcast %375 : vector<12x1xi1> to vector<12x6xi1>
    %377 = arith.select %376, %369, %372 : vector<12x6xi1>, vector<12x6xf32>
    %378 = arith.addf %366, %377 : vector<12x6xf32>
    %379 = vector.extract_strided_slice %354 {offsets = [3, 0], sizes = [9, 6], strides = [1, 1]} : vector<12x6xf32> to vector<9x6xf32>
    %380 = vector.extract_strided_slice %354 {offsets = [0, 0], sizes = [3, 6], strides = [1, 1]} : vector<12x6xf32> to vector<3x6xf32>
    %381 = tpu.concatenate %379, %380 in 0 : vector<9x6xf32>, vector<3x6xf32> -> vector<12x6xf32>
    %382 = vector.extract_strided_slice %354 {offsets = [9, 0], sizes = [3, 6], strides = [1, 1]} : vector<12x6xf32> to vector<3x6xf32>
    %383 = vector.extract_strided_slice %354 {offsets = [0, 0], sizes = [9, 6], strides = [1, 1]} : vector<12x6xf32> to vector<9x6xf32>
    %384 = tpu.concatenate %382, %383 in 0 : vector<3x6xf32>, vector<9x6xf32> -> vector<12x6xf32>
    %c3_i32_66 = arith.constant 3 : i32
    %385 = vector.broadcast %c3_i32_66 : i32 to vector<12x1xi32>
    %386 = arith.cmpi slt, %16, %385 : vector<12x1xi32>
    %387 = vector.shape_cast %386 : vector<12x1xi1> to vector<12x1xi1>
    %388 = vector.broadcast %387 : vector<12x1xi1> to vector<12x6xi1>
    %389 = arith.select %388, %381, %384 : vector<12x6xi1>, vector<12x6xf32>
    %390 = arith.addf %378, %389 : vector<12x6xf32>
    %391 = vector.extract_strided_slice %354 {offsets = [4, 0], sizes = [8, 6], strides = [1, 1]} : vector<12x6xf32> to vector<8x6xf32>
    %392 = vector.extract_strided_slice %354 {offsets = [0, 0], sizes = [4, 6], strides = [1, 1]} : vector<12x6xf32> to vector<4x6xf32>
    %393 = tpu.concatenate %391, %392 in 0 : vector<8x6xf32>, vector<4x6xf32> -> vector<12x6xf32>
    %394 = vector.extract_strided_slice %354 {offsets = [10, 0], sizes = [2, 6], strides = [1, 1]} : vector<12x6xf32> to vector<2x6xf32>
    %395 = vector.extract_strided_slice %354 {offsets = [0, 0], sizes = [10, 6], strides = [1, 1]} : vector<12x6xf32> to vector<10x6xf32>
    %396 = tpu.concatenate %394, %395 in 0 : vector<2x6xf32>, vector<10x6xf32> -> vector<12x6xf32>
    %c2_i32_67 = arith.constant 2 : i32
    %397 = vector.broadcast %c2_i32_67 : i32 to vector<12x1xi32>
    %398 = arith.cmpi slt, %16, %397 : vector<12x1xi32>
    %399 = vector.shape_cast %398 : vector<12x1xi1> to vector<12x1xi1>
    %400 = vector.broadcast %399 : vector<12x1xi1> to vector<12x6xi1>
    %401 = arith.select %400, %393, %396 : vector<12x6xi1>, vector<12x6xf32>
    %402 = arith.addf %390, %401 : vector<12x6xf32>
    %403 = vector.extract_strided_slice %354 {offsets = [5, 0], sizes = [7, 6], strides = [1, 1]} : vector<12x6xf32> to vector<7x6xf32>
    %404 = vector.extract_strided_slice %354 {offsets = [0, 0], sizes = [5, 6], strides = [1, 1]} : vector<12x6xf32> to vector<5x6xf32>
    %405 = tpu.concatenate %403, %404 in 0 : vector<7x6xf32>, vector<5x6xf32> -> vector<12x6xf32>
    %406 = vector.extract_strided_slice %354 {offsets = [11, 0], sizes = [1, 6], strides = [1, 1]} : vector<12x6xf32> to vector<1x6xf32>
    %407 = vector.extract_strided_slice %354 {offsets = [0, 0], sizes = [11, 6], strides = [1, 1]} : vector<12x6xf32> to vector<11x6xf32>
    %408 = tpu.concatenate %406, %407 in 0 : vector<1x6xf32>, vector<11x6xf32> -> vector<12x6xf32>
    %c1_i32_68 = arith.constant 1 : i32
    %409 = vector.broadcast %c1_i32_68 : i32 to vector<12x1xi32>
    %410 = arith.cmpi slt, %16, %409 : vector<12x1xi32>
    %411 = vector.shape_cast %410 : vector<12x1xi1> to vector<12x1xi1>
    %412 = vector.broadcast %411 : vector<12x1xi1> to vector<12x6xi1>
    %413 = arith.select %412, %405, %408 : vector<12x6xi1>, vector<12x6xf32>
    %414 = arith.addf %402, %413 : vector<12x6xf32>
    %415 = tpu.iota {dimensions = array<i32: 1>} : vector<12x6xi32>
    %cst_69 = arith.constant dense<0xFF800000> : vector<12xf32>
    %416 = vector.multi_reduction <maximumf>, %414, %cst_69 [1] : vector<12x6xf32> to vector<12xf32>
    %417 = vector.shape_cast %416 : vector<12xf32> to vector<12x1xf32>
    %418 = vector.broadcast %417 : vector<12x1xf32> to vector<12x6xf32>
    %419 = arith.cmpf oge, %414, %418 : vector<12x6xf32>
    %c6_i32_70 = arith.constant 6 : i32
    %420 = vector.broadcast %c6_i32_70 : i32 to vector<12x6xi32>
    %421 = arith.select %419, %415, %420 : vector<12x6xi1>, vector<12x6xi32>
    %cst_71 = arith.constant dense<2147483647> : vector<12xi32>
    %422 = vector.multi_reduction <minsi>, %421, %cst_71 [1] : vector<12x6xi32> to vector<12xi32>
    %423 = vector.shape_cast %422 : vector<12xi32> to vector<12x1xi32>
    %cst_72 = arith.constant 0.000000e+00 : f32
    %424 = vector.broadcast %cst_72 : f32 to vector<12x15xf32>
    %c0_i32_73 = arith.constant 0 : i32
    %425 = vector.broadcast %c0_i32_73 : i32 to vector<12x1xi32>
    %426 = arith.cmpi eq, %423, %425 : vector<12x1xi32>
    %cst_74 = arith.constant 1.000000e+00 : f32
    %cst_75 = arith.constant 0.000000e+00 : f32
    %427 = vector.broadcast %cst_74 : f32 to vector<12x1xf32>
    %428 = vector.broadcast %cst_75 : f32 to vector<12x1xf32>
    %429 = arith.select %426, %427, %428 : vector<12x1xi1>, vector<12x1xf32>
    %430 = vector.broadcast %429 : vector<12x1xf32> to vector<12x15xf32>
    %431 = arith.mulf %430, %280 : vector<12x15xf32>
    %432 = arith.addf %424, %431 : vector<12x15xf32>
    %c1_i32_76 = arith.constant 1 : i32
    %433 = vector.broadcast %c1_i32_76 : i32 to vector<12x1xi32>
    %434 = arith.cmpi eq, %423, %433 : vector<12x1xi32>
    %cst_77 = arith.constant 1.000000e+00 : f32
    %cst_78 = arith.constant 0.000000e+00 : f32
    %435 = vector.broadcast %cst_77 : f32 to vector<12x1xf32>
    %436 = vector.broadcast %cst_78 : f32 to vector<12x1xf32>
    %437 = arith.select %434, %435, %436 : vector<12x1xi1>, vector<12x1xf32>
    %438 = vector.extract_strided_slice %280 {offsets = [1, 0], sizes = [11, 15], strides = [1, 1]} : vector<12x15xf32> to vector<11x15xf32>
    %439 = vector.extract_strided_slice %280 {offsets = [0, 0], sizes = [1, 15], strides = [1, 1]} : vector<12x15xf32> to vector<1x15xf32>
    %440 = tpu.concatenate %438, %439 in 0 : vector<11x15xf32>, vector<1x15xf32> -> vector<12x15xf32>
    %441 = vector.extract_strided_slice %280 {offsets = [7, 0], sizes = [5, 15], strides = [1, 1]} : vector<12x15xf32> to vector<5x15xf32>
    %442 = vector.extract_strided_slice %280 {offsets = [0, 0], sizes = [7, 15], strides = [1, 1]} : vector<12x15xf32> to vector<7x15xf32>
    %443 = tpu.concatenate %441, %442 in 0 : vector<5x15xf32>, vector<7x15xf32> -> vector<12x15xf32>
    %c5_i32_79 = arith.constant 5 : i32
    %444 = vector.broadcast %c5_i32_79 : i32 to vector<12x1xi32>
    %445 = arith.cmpi slt, %16, %444 : vector<12x1xi32>
    %446 = vector.shape_cast %445 : vector<12x1xi1> to vector<12x1xi1>
    %447 = vector.broadcast %446 : vector<12x1xi1> to vector<12x15xi1>
    %448 = arith.select %447, %440, %443 : vector<12x15xi1>, vector<12x15xf32>
    %449 = vector.broadcast %437 : vector<12x1xf32> to vector<12x15xf32>
    %450 = arith.mulf %449, %448 : vector<12x15xf32>
    %451 = arith.addf %432, %450 : vector<12x15xf32>
    %c2_i32_80 = arith.constant 2 : i32
    %452 = vector.broadcast %c2_i32_80 : i32 to vector<12x1xi32>
    %453 = arith.cmpi eq, %423, %452 : vector<12x1xi32>
    %cst_81 = arith.constant 1.000000e+00 : f32
    %cst_82 = arith.constant 0.000000e+00 : f32
    %454 = vector.broadcast %cst_81 : f32 to vector<12x1xf32>
    %455 = vector.broadcast %cst_82 : f32 to vector<12x1xf32>
    %456 = arith.select %453, %454, %455 : vector<12x1xi1>, vector<12x1xf32>
    %457 = vector.extract_strided_slice %280 {offsets = [2, 0], sizes = [10, 15], strides = [1, 1]} : vector<12x15xf32> to vector<10x15xf32>
    %458 = vector.extract_strided_slice %280 {offsets = [0, 0], sizes = [2, 15], strides = [1, 1]} : vector<12x15xf32> to vector<2x15xf32>
    %459 = tpu.concatenate %457, %458 in 0 : vector<10x15xf32>, vector<2x15xf32> -> vector<12x15xf32>
    %460 = vector.extract_strided_slice %280 {offsets = [8, 0], sizes = [4, 15], strides = [1, 1]} : vector<12x15xf32> to vector<4x15xf32>
    %461 = vector.extract_strided_slice %280 {offsets = [0, 0], sizes = [8, 15], strides = [1, 1]} : vector<12x15xf32> to vector<8x15xf32>
    %462 = tpu.concatenate %460, %461 in 0 : vector<4x15xf32>, vector<8x15xf32> -> vector<12x15xf32>
    %c4_i32_83 = arith.constant 4 : i32
    %463 = vector.broadcast %c4_i32_83 : i32 to vector<12x1xi32>
    %464 = arith.cmpi slt, %16, %463 : vector<12x1xi32>
    %465 = vector.shape_cast %464 : vector<12x1xi1> to vector<12x1xi1>
    %466 = vector.broadcast %465 : vector<12x1xi1> to vector<12x15xi1>
    %467 = arith.select %466, %459, %462 : vector<12x15xi1>, vector<12x15xf32>
    %468 = vector.broadcast %456 : vector<12x1xf32> to vector<12x15xf32>
    %469 = arith.mulf %468, %467 : vector<12x15xf32>
    %470 = arith.addf %451, %469 : vector<12x15xf32>
    %c3_i32_84 = arith.constant 3 : i32
    %471 = vector.broadcast %c3_i32_84 : i32 to vector<12x1xi32>
    %472 = arith.cmpi eq, %423, %471 : vector<12x1xi32>
    %cst_85 = arith.constant 1.000000e+00 : f32
    %cst_86 = arith.constant 0.000000e+00 : f32
    %473 = vector.broadcast %cst_85 : f32 to vector<12x1xf32>
    %474 = vector.broadcast %cst_86 : f32 to vector<12x1xf32>
    %475 = arith.select %472, %473, %474 : vector<12x1xi1>, vector<12x1xf32>
    %476 = vector.extract_strided_slice %280 {offsets = [3, 0], sizes = [9, 15], strides = [1, 1]} : vector<12x15xf32> to vector<9x15xf32>
    %477 = vector.extract_strided_slice %280 {offsets = [0, 0], sizes = [3, 15], strides = [1, 1]} : vector<12x15xf32> to vector<3x15xf32>
    %478 = tpu.concatenate %476, %477 in 0 : vector<9x15xf32>, vector<3x15xf32> -> vector<12x15xf32>
    %479 = vector.extract_strided_slice %280 {offsets = [9, 0], sizes = [3, 15], strides = [1, 1]} : vector<12x15xf32> to vector<3x15xf32>
    %480 = vector.extract_strided_slice %280 {offsets = [0, 0], sizes = [9, 15], strides = [1, 1]} : vector<12x15xf32> to vector<9x15xf32>
    %481 = tpu.concatenate %479, %480 in 0 : vector<3x15xf32>, vector<9x15xf32> -> vector<12x15xf32>
    %c3_i32_87 = arith.constant 3 : i32
    %482 = vector.broadcast %c3_i32_87 : i32 to vector<12x1xi32>
    %483 = arith.cmpi slt, %16, %482 : vector<12x1xi32>
    %484 = vector.shape_cast %483 : vector<12x1xi1> to vector<12x1xi1>
    %485 = vector.broadcast %484 : vector<12x1xi1> to vector<12x15xi1>
    %486 = arith.select %485, %478, %481 : vector<12x15xi1>, vector<12x15xf32>
    %487 = vector.broadcast %475 : vector<12x1xf32> to vector<12x15xf32>
    %488 = arith.mulf %487, %486 : vector<12x15xf32>
    %489 = arith.addf %470, %488 : vector<12x15xf32>
    %c4_i32_88 = arith.constant 4 : i32
    %490 = vector.broadcast %c4_i32_88 : i32 to vector<12x1xi32>
    %491 = arith.cmpi eq, %423, %490 : vector<12x1xi32>
    %cst_89 = arith.constant 1.000000e+00 : f32
    %cst_90 = arith.constant 0.000000e+00 : f32
    %492 = vector.broadcast %cst_89 : f32 to vector<12x1xf32>
    %493 = vector.broadcast %cst_90 : f32 to vector<12x1xf32>
    %494 = arith.select %491, %492, %493 : vector<12x1xi1>, vector<12x1xf32>
    %495 = vector.extract_strided_slice %280 {offsets = [4, 0], sizes = [8, 15], strides = [1, 1]} : vector<12x15xf32> to vector<8x15xf32>
    %496 = vector.extract_strided_slice %280 {offsets = [0, 0], sizes = [4, 15], strides = [1, 1]} : vector<12x15xf32> to vector<4x15xf32>
    %497 = tpu.concatenate %495, %496 in 0 : vector<8x15xf32>, vector<4x15xf32> -> vector<12x15xf32>
    %498 = vector.extract_strided_slice %280 {offsets = [10, 0], sizes = [2, 15], strides = [1, 1]} : vector<12x15xf32> to vector<2x15xf32>
    %499 = vector.extract_strided_slice %280 {offsets = [0, 0], sizes = [10, 15], strides = [1, 1]} : vector<12x15xf32> to vector<10x15xf32>
    %500 = tpu.concatenate %498, %499 in 0 : vector<2x15xf32>, vector<10x15xf32> -> vector<12x15xf32>
    %c2_i32_91 = arith.constant 2 : i32
    %501 = vector.broadcast %c2_i32_91 : i32 to vector<12x1xi32>
    %502 = arith.cmpi slt, %16, %501 : vector<12x1xi32>
    %503 = vector.shape_cast %502 : vector<12x1xi1> to vector<12x1xi1>
    %504 = vector.broadcast %503 : vector<12x1xi1> to vector<12x15xi1>
    %505 = arith.select %504, %497, %500 : vector<12x15xi1>, vector<12x15xf32>
    %506 = vector.broadcast %494 : vector<12x1xf32> to vector<12x15xf32>
    %507 = arith.mulf %506, %505 : vector<12x15xf32>
    %508 = arith.addf %489, %507 : vector<12x15xf32>
    %c5_i32_92 = arith.constant 5 : i32
    %509 = vector.broadcast %c5_i32_92 : i32 to vector<12x1xi32>
    %510 = arith.cmpi eq, %423, %509 : vector<12x1xi32>
    %cst_93 = arith.constant 1.000000e+00 : f32
    %cst_94 = arith.constant 0.000000e+00 : f32
    %511 = vector.broadcast %cst_93 : f32 to vector<12x1xf32>
    %512 = vector.broadcast %cst_94 : f32 to vector<12x1xf32>
    %513 = arith.select %510, %511, %512 : vector<12x1xi1>, vector<12x1xf32>
    %514 = vector.extract_strided_slice %280 {offsets = [5, 0], sizes = [7, 15], strides = [1, 1]} : vector<12x15xf32> to vector<7x15xf32>
    %515 = vector.extract_strided_slice %280 {offsets = [0, 0], sizes = [5, 15], strides = [1, 1]} : vector<12x15xf32> to vector<5x15xf32>
    %516 = tpu.concatenate %514, %515 in 0 : vector<7x15xf32>, vector<5x15xf32> -> vector<12x15xf32>
    %517 = vector.extract_strided_slice %280 {offsets = [11, 0], sizes = [1, 15], strides = [1, 1]} : vector<12x15xf32> to vector<1x15xf32>
    %518 = vector.extract_strided_slice %280 {offsets = [0, 0], sizes = [11, 15], strides = [1, 1]} : vector<12x15xf32> to vector<11x15xf32>
    %519 = tpu.concatenate %517, %518 in 0 : vector<1x15xf32>, vector<11x15xf32> -> vector<12x15xf32>
    %c1_i32_95 = arith.constant 1 : i32
    %520 = vector.broadcast %c1_i32_95 : i32 to vector<12x1xi32>
    %521 = arith.cmpi slt, %16, %520 : vector<12x1xi32>
    %522 = vector.shape_cast %521 : vector<12x1xi1> to vector<12x1xi1>
    %523 = vector.broadcast %522 : vector<12x1xi1> to vector<12x15xi1>
    %524 = arith.select %523, %516, %519 : vector<12x15xi1>, vector<12x15xf32>
    %525 = vector.broadcast %513 : vector<12x1xf32> to vector<12x15xf32>
    %526 = arith.mulf %525, %524 : vector<12x15xf32>
    %527 = arith.addf %508, %526 : vector<12x15xf32>
    %c0_96 = arith.constant 0 : index
    %c0_97 = arith.constant 0 : index
    %528 = vector.load %arg2[%c0_96, %c0_97] : memref<15x60xf32, #tpu.memory_space<vmem>>, vector<15x60xf32>
    %cst_98 = arith.constant dense<0.000000e+00> : vector<12x60xf32>
    %529 = tpu.matmul %527, %528, %cst_98 {dimension_numbers = #tpu.dot_dimension_numbers<[1], [0], [0], [1], [0, 0, 1, 1], [], []>} : vector<12x15xf32>, vector<15x60xf32>, vector<12x60xf32> -> vector<12x60xf32>
    %c0_99 = arith.constant 0 : index
    %c0_100 = arith.constant 0 : index
    %530 = vector.load %arg3[%c0_99, %c0_100] : memref<1x60xf32, #tpu.memory_space<vmem>>, vector<1x60xf32>
    %531 = vector.broadcast %530 : vector<1x60xf32> to vector<12x60xf32>
    %532 = arith.addf %529, %531 : vector<12x60xf32>
    %c0_101 = arith.constant 0 : index
    %c0_102 = arith.constant 0 : index
    %533 = vector.load %arg4[%c0_101, %c0_102] : memref<60x8xf32, #tpu.memory_space<vmem>>, vector<60x8xf32>
    %cst_103 = arith.constant dense<0.000000e+00> : vector<12x8xf32>
    %534 = tpu.matmul %532, %533, %cst_103 {dimension_numbers = #tpu.dot_dimension_numbers<[1], [0], [0], [1], [0, 0, 1, 1], [], []>} : vector<12x60xf32>, vector<60x8xf32>, vector<12x8xf32> -> vector<12x8xf32>
    %c2 = arith.constant 2 : index
    %c0_104 = arith.constant 0 : index
    %c0_105 = arith.constant 0 : index
    %535 = vector.load %arg1[%c2, %c0_104, %c0_105] : memref<3x12x45xf32, #tpu.memory_space<vmem>>, vector<1x12x45xf32>
    %536 = vector.shape_cast %535 : vector<1x12x45xf32> to vector<12x45xf32>
    %537 = vector.extract_strided_slice %536 {offsets = [0, 0], sizes = [12, 15], strides = [1, 1]} : vector<12x45xf32> to vector<12x15xf32>
    %538 = vector.extract_strided_slice %536 {offsets = [0, 15], sizes = [12, 15], strides = [1, 1]} : vector<12x45xf32> to vector<12x15xf32>
    %539 = vector.extract_strided_slice %536 {offsets = [0, 30], sizes = [12, 15], strides = [1, 1]} : vector<12x45xf32> to vector<12x15xf32>
    %540 = arith.mulf %537, %538 : vector<12x15xf32>
    %cst_106 = arith.constant dense<0.000000e+00> : vector<12xf32>
    %541 = vector.multi_reduction <add>, %540, %cst_106 [1] : vector<12x15xf32> to vector<12xf32>
    %542 = vector.shape_cast %541 : vector<12xf32> to vector<12x1xf32>
    %543 = vector.extract_strided_slice %537 {offsets = [1, 0], sizes = [11, 15], strides = [1, 1]} : vector<12x15xf32> to vector<11x15xf32>
    %544 = vector.extract_strided_slice %537 {offsets = [0, 0], sizes = [1, 15], strides = [1, 1]} : vector<12x15xf32> to vector<1x15xf32>
    %545 = tpu.concatenate %543, %544 in 0 : vector<11x15xf32>, vector<1x15xf32> -> vector<12x15xf32>
    %546 = vector.extract_strided_slice %537 {offsets = [7, 0], sizes = [5, 15], strides = [1, 1]} : vector<12x15xf32> to vector<5x15xf32>
    %547 = vector.extract_strided_slice %537 {offsets = [0, 0], sizes = [7, 15], strides = [1, 1]} : vector<12x15xf32> to vector<7x15xf32>
    %548 = tpu.concatenate %546, %547 in 0 : vector<5x15xf32>, vector<7x15xf32> -> vector<12x15xf32>
    %c5_i32_107 = arith.constant 5 : i32
    %549 = vector.broadcast %c5_i32_107 : i32 to vector<12x1xi32>
    %550 = arith.cmpi slt, %16, %549 : vector<12x1xi32>
    %551 = vector.shape_cast %550 : vector<12x1xi1> to vector<12x1xi1>
    %552 = vector.broadcast %551 : vector<12x1xi1> to vector<12x15xi1>
    %553 = arith.select %552, %545, %548 : vector<12x15xi1>, vector<12x15xf32>
    %554 = arith.mulf %553, %538 : vector<12x15xf32>
    %cst_108 = arith.constant dense<0.000000e+00> : vector<12xf32>
    %555 = vector.multi_reduction <add>, %554, %cst_108 [1] : vector<12x15xf32> to vector<12xf32>
    %556 = vector.shape_cast %555 : vector<12xf32> to vector<12x1xf32>
    %557 = vector.extract_strided_slice %537 {offsets = [2, 0], sizes = [10, 15], strides = [1, 1]} : vector<12x15xf32> to vector<10x15xf32>
    %558 = vector.extract_strided_slice %537 {offsets = [0, 0], sizes = [2, 15], strides = [1, 1]} : vector<12x15xf32> to vector<2x15xf32>
    %559 = tpu.concatenate %557, %558 in 0 : vector<10x15xf32>, vector<2x15xf32> -> vector<12x15xf32>
    %560 = vector.extract_strided_slice %537 {offsets = [8, 0], sizes = [4, 15], strides = [1, 1]} : vector<12x15xf32> to vector<4x15xf32>
    %561 = vector.extract_strided_slice %537 {offsets = [0, 0], sizes = [8, 15], strides = [1, 1]} : vector<12x15xf32> to vector<8x15xf32>
    %562 = tpu.concatenate %560, %561 in 0 : vector<4x15xf32>, vector<8x15xf32> -> vector<12x15xf32>
    %c4_i32_109 = arith.constant 4 : i32
    %563 = vector.broadcast %c4_i32_109 : i32 to vector<12x1xi32>
    %564 = arith.cmpi slt, %16, %563 : vector<12x1xi32>
    %565 = vector.shape_cast %564 : vector<12x1xi1> to vector<12x1xi1>
    %566 = vector.broadcast %565 : vector<12x1xi1> to vector<12x15xi1>
    %567 = arith.select %566, %559, %562 : vector<12x15xi1>, vector<12x15xf32>
    %568 = arith.mulf %567, %538 : vector<12x15xf32>
    %cst_110 = arith.constant dense<0.000000e+00> : vector<12xf32>
    %569 = vector.multi_reduction <add>, %568, %cst_110 [1] : vector<12x15xf32> to vector<12xf32>
    %570 = vector.shape_cast %569 : vector<12xf32> to vector<12x1xf32>
    %571 = vector.extract_strided_slice %537 {offsets = [3, 0], sizes = [9, 15], strides = [1, 1]} : vector<12x15xf32> to vector<9x15xf32>
    %572 = vector.extract_strided_slice %537 {offsets = [0, 0], sizes = [3, 15], strides = [1, 1]} : vector<12x15xf32> to vector<3x15xf32>
    %573 = tpu.concatenate %571, %572 in 0 : vector<9x15xf32>, vector<3x15xf32> -> vector<12x15xf32>
    %574 = vector.extract_strided_slice %537 {offsets = [9, 0], sizes = [3, 15], strides = [1, 1]} : vector<12x15xf32> to vector<3x15xf32>
    %575 = vector.extract_strided_slice %537 {offsets = [0, 0], sizes = [9, 15], strides = [1, 1]} : vector<12x15xf32> to vector<9x15xf32>
    %576 = tpu.concatenate %574, %575 in 0 : vector<3x15xf32>, vector<9x15xf32> -> vector<12x15xf32>
    %c3_i32_111 = arith.constant 3 : i32
    %577 = vector.broadcast %c3_i32_111 : i32 to vector<12x1xi32>
    %578 = arith.cmpi slt, %16, %577 : vector<12x1xi32>
    %579 = vector.shape_cast %578 : vector<12x1xi1> to vector<12x1xi1>
    %580 = vector.broadcast %579 : vector<12x1xi1> to vector<12x15xi1>
    %581 = arith.select %580, %573, %576 : vector<12x15xi1>, vector<12x15xf32>
    %582 = arith.mulf %581, %538 : vector<12x15xf32>
    %cst_112 = arith.constant dense<0.000000e+00> : vector<12xf32>
    %583 = vector.multi_reduction <add>, %582, %cst_112 [1] : vector<12x15xf32> to vector<12xf32>
    %584 = vector.shape_cast %583 : vector<12xf32> to vector<12x1xf32>
    %585 = vector.extract_strided_slice %537 {offsets = [4, 0], sizes = [8, 15], strides = [1, 1]} : vector<12x15xf32> to vector<8x15xf32>
    %586 = vector.extract_strided_slice %537 {offsets = [0, 0], sizes = [4, 15], strides = [1, 1]} : vector<12x15xf32> to vector<4x15xf32>
    %587 = tpu.concatenate %585, %586 in 0 : vector<8x15xf32>, vector<4x15xf32> -> vector<12x15xf32>
    %588 = vector.extract_strided_slice %537 {offsets = [10, 0], sizes = [2, 15], strides = [1, 1]} : vector<12x15xf32> to vector<2x15xf32>
    %589 = vector.extract_strided_slice %537 {offsets = [0, 0], sizes = [10, 15], strides = [1, 1]} : vector<12x15xf32> to vector<10x15xf32>
    %590 = tpu.concatenate %588, %589 in 0 : vector<2x15xf32>, vector<10x15xf32> -> vector<12x15xf32>
    %c2_i32_113 = arith.constant 2 : i32
    %591 = vector.broadcast %c2_i32_113 : i32 to vector<12x1xi32>
    %592 = arith.cmpi slt, %16, %591 : vector<12x1xi32>
    %593 = vector.shape_cast %592 : vector<12x1xi1> to vector<12x1xi1>
    %594 = vector.broadcast %593 : vector<12x1xi1> to vector<12x15xi1>
    %595 = arith.select %594, %587, %590 : vector<12x15xi1>, vector<12x15xf32>
    %596 = arith.mulf %595, %538 : vector<12x15xf32>
    %cst_114 = arith.constant dense<0.000000e+00> : vector<12xf32>
    %597 = vector.multi_reduction <add>, %596, %cst_114 [1] : vector<12x15xf32> to vector<12xf32>
    %598 = vector.shape_cast %597 : vector<12xf32> to vector<12x1xf32>
    %599 = vector.extract_strided_slice %537 {offsets = [5, 0], sizes = [7, 15], strides = [1, 1]} : vector<12x15xf32> to vector<7x15xf32>
    %600 = vector.extract_strided_slice %537 {offsets = [0, 0], sizes = [5, 15], strides = [1, 1]} : vector<12x15xf32> to vector<5x15xf32>
    %601 = tpu.concatenate %599, %600 in 0 : vector<7x15xf32>, vector<5x15xf32> -> vector<12x15xf32>
    %602 = vector.extract_strided_slice %537 {offsets = [11, 0], sizes = [1, 15], strides = [1, 1]} : vector<12x15xf32> to vector<1x15xf32>
    %603 = vector.extract_strided_slice %537 {offsets = [0, 0], sizes = [11, 15], strides = [1, 1]} : vector<12x15xf32> to vector<11x15xf32>
    %604 = tpu.concatenate %602, %603 in 0 : vector<1x15xf32>, vector<11x15xf32> -> vector<12x15xf32>
    %c1_i32_115 = arith.constant 1 : i32
    %605 = vector.broadcast %c1_i32_115 : i32 to vector<12x1xi32>
    %606 = arith.cmpi slt, %16, %605 : vector<12x1xi32>
    %607 = vector.shape_cast %606 : vector<12x1xi1> to vector<12x1xi1>
    %608 = vector.broadcast %607 : vector<12x1xi1> to vector<12x15xi1>
    %609 = arith.select %608, %601, %604 : vector<12x15xi1>, vector<12x15xf32>
    %610 = arith.mulf %609, %538 : vector<12x15xf32>
    %cst_116 = arith.constant dense<0.000000e+00> : vector<12xf32>
    %611 = vector.multi_reduction <add>, %610, %cst_116 [1] : vector<12x15xf32> to vector<12xf32>
    %612 = vector.shape_cast %611 : vector<12xf32> to vector<12x1xf32>
    %613 = tpu.concatenate %542, %556, %570, %584, %598, %612 in 1 : vector<12x1xf32>, vector<12x1xf32>, vector<12x1xf32>, vector<12x1xf32>, vector<12x1xf32>, vector<12x1xf32> -> vector<12x6xf32>
    %614 = vector.extract_strided_slice %613 {offsets = [1, 0], sizes = [11, 6], strides = [1, 1]} : vector<12x6xf32> to vector<11x6xf32>
    %615 = vector.extract_strided_slice %613 {offsets = [0, 0], sizes = [1, 6], strides = [1, 1]} : vector<12x6xf32> to vector<1x6xf32>
    %616 = tpu.concatenate %614, %615 in 0 : vector<11x6xf32>, vector<1x6xf32> -> vector<12x6xf32>
    %617 = vector.extract_strided_slice %613 {offsets = [7, 0], sizes = [5, 6], strides = [1, 1]} : vector<12x6xf32> to vector<5x6xf32>
    %618 = vector.extract_strided_slice %613 {offsets = [0, 0], sizes = [7, 6], strides = [1, 1]} : vector<12x6xf32> to vector<7x6xf32>
    %619 = tpu.concatenate %617, %618 in 0 : vector<5x6xf32>, vector<7x6xf32> -> vector<12x6xf32>
    %c5_i32_117 = arith.constant 5 : i32
    %620 = vector.broadcast %c5_i32_117 : i32 to vector<12x1xi32>
    %621 = arith.cmpi slt, %16, %620 : vector<12x1xi32>
    %622 = vector.shape_cast %621 : vector<12x1xi1> to vector<12x1xi1>
    %623 = vector.broadcast %622 : vector<12x1xi1> to vector<12x6xi1>
    %624 = arith.select %623, %616, %619 : vector<12x6xi1>, vector<12x6xf32>
    %625 = arith.addf %613, %624 : vector<12x6xf32>
    %626 = vector.extract_strided_slice %613 {offsets = [2, 0], sizes = [10, 6], strides = [1, 1]} : vector<12x6xf32> to vector<10x6xf32>
    %627 = vector.extract_strided_slice %613 {offsets = [0, 0], sizes = [2, 6], strides = [1, 1]} : vector<12x6xf32> to vector<2x6xf32>
    %628 = tpu.concatenate %626, %627 in 0 : vector<10x6xf32>, vector<2x6xf32> -> vector<12x6xf32>
    %629 = vector.extract_strided_slice %613 {offsets = [8, 0], sizes = [4, 6], strides = [1, 1]} : vector<12x6xf32> to vector<4x6xf32>
    %630 = vector.extract_strided_slice %613 {offsets = [0, 0], sizes = [8, 6], strides = [1, 1]} : vector<12x6xf32> to vector<8x6xf32>
    %631 = tpu.concatenate %629, %630 in 0 : vector<4x6xf32>, vector<8x6xf32> -> vector<12x6xf32>
    %c4_i32_118 = arith.constant 4 : i32
    %632 = vector.broadcast %c4_i32_118 : i32 to vector<12x1xi32>
    %633 = arith.cmpi slt, %16, %632 : vector<12x1xi32>
    %634 = vector.shape_cast %633 : vector<12x1xi1> to vector<12x1xi1>
    %635 = vector.broadcast %634 : vector<12x1xi1> to vector<12x6xi1>
    %636 = arith.select %635, %628, %631 : vector<12x6xi1>, vector<12x6xf32>
    %637 = arith.addf %625, %636 : vector<12x6xf32>
    %638 = vector.extract_strided_slice %613 {offsets = [3, 0], sizes = [9, 6], strides = [1, 1]} : vector<12x6xf32> to vector<9x6xf32>
    %639 = vector.extract_strided_slice %613 {offsets = [0, 0], sizes = [3, 6], strides = [1, 1]} : vector<12x6xf32> to vector<3x6xf32>
    %640 = tpu.concatenate %638, %639 in 0 : vector<9x6xf32>, vector<3x6xf32> -> vector<12x6xf32>
    %641 = vector.extract_strided_slice %613 {offsets = [9, 0], sizes = [3, 6], strides = [1, 1]} : vector<12x6xf32> to vector<3x6xf32>
    %642 = vector.extract_strided_slice %613 {offsets = [0, 0], sizes = [9, 6], strides = [1, 1]} : vector<12x6xf32> to vector<9x6xf32>
    %643 = tpu.concatenate %641, %642 in 0 : vector<3x6xf32>, vector<9x6xf32> -> vector<12x6xf32>
    %c3_i32_119 = arith.constant 3 : i32
    %644 = vector.broadcast %c3_i32_119 : i32 to vector<12x1xi32>
    %645 = arith.cmpi slt, %16, %644 : vector<12x1xi32>
    %646 = vector.shape_cast %645 : vector<12x1xi1> to vector<12x1xi1>
    %647 = vector.broadcast %646 : vector<12x1xi1> to vector<12x6xi1>
    %648 = arith.select %647, %640, %643 : vector<12x6xi1>, vector<12x6xf32>
    %649 = arith.addf %637, %648 : vector<12x6xf32>
    %650 = vector.extract_strided_slice %613 {offsets = [4, 0], sizes = [8, 6], strides = [1, 1]} : vector<12x6xf32> to vector<8x6xf32>
    %651 = vector.extract_strided_slice %613 {offsets = [0, 0], sizes = [4, 6], strides = [1, 1]} : vector<12x6xf32> to vector<4x6xf32>
    %652 = tpu.concatenate %650, %651 in 0 : vector<8x6xf32>, vector<4x6xf32> -> vector<12x6xf32>
    %653 = vector.extract_strided_slice %613 {offsets = [10, 0], sizes = [2, 6], strides = [1, 1]} : vector<12x6xf32> to vector<2x6xf32>
    %654 = vector.extract_strided_slice %613 {offsets = [0, 0], sizes = [10, 6], strides = [1, 1]} : vector<12x6xf32> to vector<10x6xf32>
    %655 = tpu.concatenate %653, %654 in 0 : vector<2x6xf32>, vector<10x6xf32> -> vector<12x6xf32>
    %c2_i32_120 = arith.constant 2 : i32
    %656 = vector.broadcast %c2_i32_120 : i32 to vector<12x1xi32>
    %657 = arith.cmpi slt, %16, %656 : vector<12x1xi32>
    %658 = vector.shape_cast %657 : vector<12x1xi1> to vector<12x1xi1>
    %659 = vector.broadcast %658 : vector<12x1xi1> to vector<12x6xi1>
    %660 = arith.select %659, %652, %655 : vector<12x6xi1>, vector<12x6xf32>
    %661 = arith.addf %649, %660 : vector<12x6xf32>
    %662 = vector.extract_strided_slice %613 {offsets = [5, 0], sizes = [7, 6], strides = [1, 1]} : vector<12x6xf32> to vector<7x6xf32>
    %663 = vector.extract_strided_slice %613 {offsets = [0, 0], sizes = [5, 6], strides = [1, 1]} : vector<12x6xf32> to vector<5x6xf32>
    %664 = tpu.concatenate %662, %663 in 0 : vector<7x6xf32>, vector<5x6xf32> -> vector<12x6xf32>
    %665 = vector.extract_strided_slice %613 {offsets = [11, 0], sizes = [1, 6], strides = [1, 1]} : vector<12x6xf32> to vector<1x6xf32>
    %666 = vector.extract_strided_slice %613 {offsets = [0, 0], sizes = [11, 6], strides = [1, 1]} : vector<12x6xf32> to vector<11x6xf32>
    %667 = tpu.concatenate %665, %666 in 0 : vector<1x6xf32>, vector<11x6xf32> -> vector<12x6xf32>
    %c1_i32_121 = arith.constant 1 : i32
    %668 = vector.broadcast %c1_i32_121 : i32 to vector<12x1xi32>
    %669 = arith.cmpi slt, %16, %668 : vector<12x1xi32>
    %670 = vector.shape_cast %669 : vector<12x1xi1> to vector<12x1xi1>
    %671 = vector.broadcast %670 : vector<12x1xi1> to vector<12x6xi1>
    %672 = arith.select %671, %664, %667 : vector<12x6xi1>, vector<12x6xf32>
    %673 = arith.addf %661, %672 : vector<12x6xf32>
    %674 = tpu.iota {dimensions = array<i32: 1>} : vector<12x6xi32>
    %cst_122 = arith.constant dense<0xFF800000> : vector<12xf32>
    %675 = vector.multi_reduction <maximumf>, %673, %cst_122 [1] : vector<12x6xf32> to vector<12xf32>
    %676 = vector.shape_cast %675 : vector<12xf32> to vector<12x1xf32>
    %677 = vector.broadcast %676 : vector<12x1xf32> to vector<12x6xf32>
    %678 = arith.cmpf oge, %673, %677 : vector<12x6xf32>
    %c6_i32_123 = arith.constant 6 : i32
    %679 = vector.broadcast %c6_i32_123 : i32 to vector<12x6xi32>
    %680 = arith.select %678, %674, %679 : vector<12x6xi1>, vector<12x6xi32>
    %cst_124 = arith.constant dense<2147483647> : vector<12xi32>
    %681 = vector.multi_reduction <minsi>, %680, %cst_124 [1] : vector<12x6xi32> to vector<12xi32>
    %682 = vector.shape_cast %681 : vector<12xi32> to vector<12x1xi32>
    %cst_125 = arith.constant 0.000000e+00 : f32
    %683 = vector.broadcast %cst_125 : f32 to vector<12x15xf32>
    %c0_i32_126 = arith.constant 0 : i32
    %684 = vector.broadcast %c0_i32_126 : i32 to vector<12x1xi32>
    %685 = arith.cmpi eq, %682, %684 : vector<12x1xi32>
    %cst_127 = arith.constant 1.000000e+00 : f32
    %cst_128 = arith.constant 0.000000e+00 : f32
    %686 = vector.broadcast %cst_127 : f32 to vector<12x1xf32>
    %687 = vector.broadcast %cst_128 : f32 to vector<12x1xf32>
    %688 = arith.select %685, %686, %687 : vector<12x1xi1>, vector<12x1xf32>
    %689 = vector.broadcast %688 : vector<12x1xf32> to vector<12x15xf32>
    %690 = arith.mulf %689, %539 : vector<12x15xf32>
    %691 = arith.addf %683, %690 : vector<12x15xf32>
    %c1_i32_129 = arith.constant 1 : i32
    %692 = vector.broadcast %c1_i32_129 : i32 to vector<12x1xi32>
    %693 = arith.cmpi eq, %682, %692 : vector<12x1xi32>
    %cst_130 = arith.constant 1.000000e+00 : f32
    %cst_131 = arith.constant 0.000000e+00 : f32
    %694 = vector.broadcast %cst_130 : f32 to vector<12x1xf32>
    %695 = vector.broadcast %cst_131 : f32 to vector<12x1xf32>
    %696 = arith.select %693, %694, %695 : vector<12x1xi1>, vector<12x1xf32>
    %697 = vector.extract_strided_slice %539 {offsets = [1, 0], sizes = [11, 15], strides = [1, 1]} : vector<12x15xf32> to vector<11x15xf32>
    %698 = vector.extract_strided_slice %539 {offsets = [0, 0], sizes = [1, 15], strides = [1, 1]} : vector<12x15xf32> to vector<1x15xf32>
    %699 = tpu.concatenate %697, %698 in 0 : vector<11x15xf32>, vector<1x15xf32> -> vector<12x15xf32>
    %700 = vector.extract_strided_slice %539 {offsets = [7, 0], sizes = [5, 15], strides = [1, 1]} : vector<12x15xf32> to vector<5x15xf32>
    %701 = vector.extract_strided_slice %539 {offsets = [0, 0], sizes = [7, 15], strides = [1, 1]} : vector<12x15xf32> to vector<7x15xf32>
    %702 = tpu.concatenate %700, %701 in 0 : vector<5x15xf32>, vector<7x15xf32> -> vector<12x15xf32>
    %c5_i32_132 = arith.constant 5 : i32
    %703 = vector.broadcast %c5_i32_132 : i32 to vector<12x1xi32>
    %704 = arith.cmpi slt, %16, %703 : vector<12x1xi32>
    %705 = vector.shape_cast %704 : vector<12x1xi1> to vector<12x1xi1>
    %706 = vector.broadcast %705 : vector<12x1xi1> to vector<12x15xi1>
    %707 = arith.select %706, %699, %702 : vector<12x15xi1>, vector<12x15xf32>
    %708 = vector.broadcast %696 : vector<12x1xf32> to vector<12x15xf32>
    %709 = arith.mulf %708, %707 : vector<12x15xf32>
    %710 = arith.addf %691, %709 : vector<12x15xf32>
    %c2_i32_133 = arith.constant 2 : i32
    %711 = vector.broadcast %c2_i32_133 : i32 to vector<12x1xi32>
    %712 = arith.cmpi eq, %682, %711 : vector<12x1xi32>
    %cst_134 = arith.constant 1.000000e+00 : f32
    %cst_135 = arith.constant 0.000000e+00 : f32
    %713 = vector.broadcast %cst_134 : f32 to vector<12x1xf32>
    %714 = vector.broadcast %cst_135 : f32 to vector<12x1xf32>
    %715 = arith.select %712, %713, %714 : vector<12x1xi1>, vector<12x1xf32>
    %716 = vector.extract_strided_slice %539 {offsets = [2, 0], sizes = [10, 15], strides = [1, 1]} : vector<12x15xf32> to vector<10x15xf32>
    %717 = vector.extract_strided_slice %539 {offsets = [0, 0], sizes = [2, 15], strides = [1, 1]} : vector<12x15xf32> to vector<2x15xf32>
    %718 = tpu.concatenate %716, %717 in 0 : vector<10x15xf32>, vector<2x15xf32> -> vector<12x15xf32>
    %719 = vector.extract_strided_slice %539 {offsets = [8, 0], sizes = [4, 15], strides = [1, 1]} : vector<12x15xf32> to vector<4x15xf32>
    %720 = vector.extract_strided_slice %539 {offsets = [0, 0], sizes = [8, 15], strides = [1, 1]} : vector<12x15xf32> to vector<8x15xf32>
    %721 = tpu.concatenate %719, %720 in 0 : vector<4x15xf32>, vector<8x15xf32> -> vector<12x15xf32>
    %c4_i32_136 = arith.constant 4 : i32
    %722 = vector.broadcast %c4_i32_136 : i32 to vector<12x1xi32>
    %723 = arith.cmpi slt, %16, %722 : vector<12x1xi32>
    %724 = vector.shape_cast %723 : vector<12x1xi1> to vector<12x1xi1>
    %725 = vector.broadcast %724 : vector<12x1xi1> to vector<12x15xi1>
    %726 = arith.select %725, %718, %721 : vector<12x15xi1>, vector<12x15xf32>
    %727 = vector.broadcast %715 : vector<12x1xf32> to vector<12x15xf32>
    %728 = arith.mulf %727, %726 : vector<12x15xf32>
    %729 = arith.addf %710, %728 : vector<12x15xf32>
    %c3_i32_137 = arith.constant 3 : i32
    %730 = vector.broadcast %c3_i32_137 : i32 to vector<12x1xi32>
    %731 = arith.cmpi eq, %682, %730 : vector<12x1xi32>
    %cst_138 = arith.constant 1.000000e+00 : f32
    %cst_139 = arith.constant 0.000000e+00 : f32
    %732 = vector.broadcast %cst_138 : f32 to vector<12x1xf32>
    %733 = vector.broadcast %cst_139 : f32 to vector<12x1xf32>
    %734 = arith.select %731, %732, %733 : vector<12x1xi1>, vector<12x1xf32>
    %735 = vector.extract_strided_slice %539 {offsets = [3, 0], sizes = [9, 15], strides = [1, 1]} : vector<12x15xf32> to vector<9x15xf32>
    %736 = vector.extract_strided_slice %539 {offsets = [0, 0], sizes = [3, 15], strides = [1, 1]} : vector<12x15xf32> to vector<3x15xf32>
    %737 = tpu.concatenate %735, %736 in 0 : vector<9x15xf32>, vector<3x15xf32> -> vector<12x15xf32>
    %738 = vector.extract_strided_slice %539 {offsets = [9, 0], sizes = [3, 15], strides = [1, 1]} : vector<12x15xf32> to vector<3x15xf32>
    %739 = vector.extract_strided_slice %539 {offsets = [0, 0], sizes = [9, 15], strides = [1, 1]} : vector<12x15xf32> to vector<9x15xf32>
    %740 = tpu.concatenate %738, %739 in 0 : vector<3x15xf32>, vector<9x15xf32> -> vector<12x15xf32>
    %c3_i32_140 = arith.constant 3 : i32
    %741 = vector.broadcast %c3_i32_140 : i32 to vector<12x1xi32>
    %742 = arith.cmpi slt, %16, %741 : vector<12x1xi32>
    %743 = vector.shape_cast %742 : vector<12x1xi1> to vector<12x1xi1>
    %744 = vector.broadcast %743 : vector<12x1xi1> to vector<12x15xi1>
    %745 = arith.select %744, %737, %740 : vector<12x15xi1>, vector<12x15xf32>
    %746 = vector.broadcast %734 : vector<12x1xf32> to vector<12x15xf32>
    %747 = arith.mulf %746, %745 : vector<12x15xf32>
    %748 = arith.addf %729, %747 : vector<12x15xf32>
    %c4_i32_141 = arith.constant 4 : i32
    %749 = vector.broadcast %c4_i32_141 : i32 to vector<12x1xi32>
    %750 = arith.cmpi eq, %682, %749 : vector<12x1xi32>
    %cst_142 = arith.constant 1.000000e+00 : f32
    %cst_143 = arith.constant 0.000000e+00 : f32
    %751 = vector.broadcast %cst_142 : f32 to vector<12x1xf32>
    %752 = vector.broadcast %cst_143 : f32 to vector<12x1xf32>
    %753 = arith.select %750, %751, %752 : vector<12x1xi1>, vector<12x1xf32>
    %754 = vector.extract_strided_slice %539 {offsets = [4, 0], sizes = [8, 15], strides = [1, 1]} : vector<12x15xf32> to vector<8x15xf32>
    %755 = vector.extract_strided_slice %539 {offsets = [0, 0], sizes = [4, 15], strides = [1, 1]} : vector<12x15xf32> to vector<4x15xf32>
    %756 = tpu.concatenate %754, %755 in 0 : vector<8x15xf32>, vector<4x15xf32> -> vector<12x15xf32>
    %757 = vector.extract_strided_slice %539 {offsets = [10, 0], sizes = [2, 15], strides = [1, 1]} : vector<12x15xf32> to vector<2x15xf32>
    %758 = vector.extract_strided_slice %539 {offsets = [0, 0], sizes = [10, 15], strides = [1, 1]} : vector<12x15xf32> to vector<10x15xf32>
    %759 = tpu.concatenate %757, %758 in 0 : vector<2x15xf32>, vector<10x15xf32> -> vector<12x15xf32>
    %c2_i32_144 = arith.constant 2 : i32
    %760 = vector.broadcast %c2_i32_144 : i32 to vector<12x1xi32>
    %761 = arith.cmpi slt, %16, %760 : vector<12x1xi32>
    %762 = vector.shape_cast %761 : vector<12x1xi1> to vector<12x1xi1>
    %763 = vector.broadcast %762 : vector<12x1xi1> to vector<12x15xi1>
    %764 = arith.select %763, %756, %759 : vector<12x15xi1>, vector<12x15xf32>
    %765 = vector.broadcast %753 : vector<12x1xf32> to vector<12x15xf32>
    %766 = arith.mulf %765, %764 : vector<12x15xf32>
    %767 = arith.addf %748, %766 : vector<12x15xf32>
    %c5_i32_145 = arith.constant 5 : i32
    %768 = vector.broadcast %c5_i32_145 : i32 to vector<12x1xi32>
    %769 = arith.cmpi eq, %682, %768 : vector<12x1xi32>
    %cst_146 = arith.constant 1.000000e+00 : f32
    %cst_147 = arith.constant 0.000000e+00 : f32
    %770 = vector.broadcast %cst_146 : f32 to vector<12x1xf32>
    %771 = vector.broadcast %cst_147 : f32 to vector<12x1xf32>
    %772 = arith.select %769, %770, %771 : vector<12x1xi1>, vector<12x1xf32>
    %773 = vector.extract_strided_slice %539 {offsets = [5, 0], sizes = [7, 15], strides = [1, 1]} : vector<12x15xf32> to vector<7x15xf32>
    %774 = vector.extract_strided_slice %539 {offsets = [0, 0], sizes = [5, 15], strides = [1, 1]} : vector<12x15xf32> to vector<5x15xf32>
    %775 = tpu.concatenate %773, %774 in 0 : vector<7x15xf32>, vector<5x15xf32> -> vector<12x15xf32>
    %776 = vector.extract_strided_slice %539 {offsets = [11, 0], sizes = [1, 15], strides = [1, 1]} : vector<12x15xf32> to vector<1x15xf32>
    %777 = vector.extract_strided_slice %539 {offsets = [0, 0], sizes = [11, 15], strides = [1, 1]} : vector<12x15xf32> to vector<11x15xf32>
    %778 = tpu.concatenate %776, %777 in 0 : vector<1x15xf32>, vector<11x15xf32> -> vector<12x15xf32>
    %c1_i32_148 = arith.constant 1 : i32
    %779 = vector.broadcast %c1_i32_148 : i32 to vector<12x1xi32>
    %780 = arith.cmpi slt, %16, %779 : vector<12x1xi32>
    %781 = vector.shape_cast %780 : vector<12x1xi1> to vector<12x1xi1>
    %782 = vector.broadcast %781 : vector<12x1xi1> to vector<12x15xi1>
    %783 = arith.select %782, %775, %778 : vector<12x15xi1>, vector<12x15xf32>
    %784 = vector.broadcast %772 : vector<12x1xf32> to vector<12x15xf32>
    %785 = arith.mulf %784, %783 : vector<12x15xf32>
    %786 = arith.addf %767, %785 : vector<12x15xf32>
    %c0_149 = arith.constant 0 : index
    %c0_150 = arith.constant 0 : index
    %787 = vector.load %arg2[%c0_149, %c0_150] : memref<15x60xf32, #tpu.memory_space<vmem>>, vector<15x60xf32>
    %cst_151 = arith.constant dense<0.000000e+00> : vector<12x60xf32>
    %788 = tpu.matmul %786, %787, %cst_151 {dimension_numbers = #tpu.dot_dimension_numbers<[1], [0], [0], [1], [0, 0, 1, 1], [], []>} : vector<12x15xf32>, vector<15x60xf32>, vector<12x60xf32> -> vector<12x60xf32>
    %c0_152 = arith.constant 0 : index
    %c0_153 = arith.constant 0 : index
    %789 = vector.load %arg3[%c0_152, %c0_153] : memref<1x60xf32, #tpu.memory_space<vmem>>, vector<1x60xf32>
    %790 = vector.broadcast %789 : vector<1x60xf32> to vector<12x60xf32>
    %791 = arith.addf %788, %790 : vector<12x60xf32>
    %c0_154 = arith.constant 0 : index
    %c0_155 = arith.constant 0 : index
    %792 = vector.load %arg4[%c0_154, %c0_155] : memref<60x8xf32, #tpu.memory_space<vmem>>, vector<60x8xf32>
    %cst_156 = arith.constant dense<0.000000e+00> : vector<12x8xf32>
    %793 = tpu.matmul %791, %792, %cst_156 {dimension_numbers = #tpu.dot_dimension_numbers<[1], [0], [0], [1], [0, 0, 1, 1], [], []>} : vector<12x60xf32>, vector<60x8xf32>, vector<12x8xf32> -> vector<12x8xf32>
    %794 = tpu.concatenate %275, %534, %793 in 1 : vector<12x8xf32>, vector<12x8xf32>, vector<12x8xf32> -> vector<12x24xf32>
    %c0_157 = arith.constant 0 : index
    %c0_158 = arith.constant 0 : index
    %795 = vector.load %arg5[%c0_157, %c0_158] : memref<24x36xf32, #tpu.memory_space<vmem>>, vector<24x36xf32>
    %cst_159 = arith.constant dense<0.000000e+00> : vector<12x36xf32>
    %796 = tpu.matmul %794, %795, %cst_159 {dimension_numbers = #tpu.dot_dimension_numbers<[1], [0], [0], [1], [0, 0, 1, 1], [], []>} : vector<12x24xf32>, vector<24x36xf32>, vector<12x36xf32> -> vector<12x36xf32>
    %cst_160 = arith.constant 0.000000e+00 : f32
    %797 = vector.broadcast %cst_160 : f32 to vector<12x36xf32>
    %798 = arith.cmpf ogt, %796, %797 : vector<12x36xf32>
    %cst_161 = arith.constant 2.000000e-01 : f32
    %799 = vector.broadcast %cst_161 : f32 to vector<12x36xf32>
    %800 = arith.mulf %799, %796 : vector<12x36xf32>
    %801 = arith.select %798, %796, %800 : vector<12x36xi1>, vector<12x36xf32>
    %802 = vector.extract_strided_slice %801 {offsets = [0, 0], sizes = [12, 12], strides = [1, 1]} : vector<12x36xf32> to vector<12x12xf32>
    %803 = vector.extract_strided_slice %802 {offsets = [0, 0], sizes = [12, 4], strides = [1, 1]} : vector<12x12xf32> to vector<12x4xf32>
    %804 = vector.extract_strided_slice %802 {offsets = [0, 4], sizes = [12, 4], strides = [1, 1]} : vector<12x12xf32> to vector<12x4xf32>
    %805 = arith.maximumf %803, %804 : vector<12x4xf32>
    %806 = vector.extract_strided_slice %802 {offsets = [0, 8], sizes = [12, 4], strides = [1, 1]} : vector<12x12xf32> to vector<12x4xf32>
    %807 = arith.maximumf %805, %806 : vector<12x4xf32>
    %808 = vector.extract_strided_slice %802 {offsets = [0, 0], sizes = [12, 4], strides = [1, 1]} : vector<12x12xf32> to vector<12x4xf32>
    %809 = arith.subf %808, %807 : vector<12x4xf32>
    %810 = math.exp %809 : vector<12x4xf32>
    %811 = vector.extract_strided_slice %802 {offsets = [0, 4], sizes = [12, 4], strides = [1, 1]} : vector<12x12xf32> to vector<12x4xf32>
    %812 = arith.subf %811, %807 : vector<12x4xf32>
    %813 = math.exp %812 : vector<12x4xf32>
    %814 = vector.extract_strided_slice %802 {offsets = [0, 8], sizes = [12, 4], strides = [1, 1]} : vector<12x12xf32> to vector<12x4xf32>
    %815 = arith.subf %814, %807 : vector<12x4xf32>
    %816 = math.exp %815 : vector<12x4xf32>
    %817 = arith.addf %810, %813 : vector<12x4xf32>
    %818 = arith.addf %817, %816 : vector<12x4xf32>
    %cst_162 = arith.constant 1.000000e+00 : f32
    %819 = vector.broadcast %cst_162 : f32 to vector<12x4xf32>
    %820 = arith.divf %819, %818 : vector<12x4xf32>
    %cst_163 = arith.constant 0.000000e+00 : f32
    %821 = vector.broadcast %cst_163 : f32 to vector<12x60xf32>
    %822 = arith.mulf %810, %820 : vector<12x4xf32>
    %c0_164 = arith.constant 0 : index
    %c0_165 = arith.constant 0 : index
    %823 = vector.load %arg6[%c0_164, %c0_165] : memref<4x60xf32, #tpu.memory_space<vmem>>, vector<4x60xf32>
    %cst_166 = arith.constant dense<0.000000e+00> : vector<12x60xf32>
    %824 = tpu.matmul %822, %823, %cst_166 {dimension_numbers = #tpu.dot_dimension_numbers<[1], [0], [0], [1], [0, 0, 1, 1], [], []>} : vector<12x4xf32>, vector<4x60xf32>, vector<12x60xf32> -> vector<12x60xf32>
    %825 = arith.mulf %824, %273 : vector<12x60xf32>
    %826 = arith.addf %821, %825 : vector<12x60xf32>
    %827 = arith.mulf %813, %820 : vector<12x4xf32>
    %c0_167 = arith.constant 0 : index
    %c0_168 = arith.constant 0 : index
    %828 = vector.load %arg6[%c0_167, %c0_168] : memref<4x60xf32, #tpu.memory_space<vmem>>, vector<4x60xf32>
    %cst_169 = arith.constant dense<0.000000e+00> : vector<12x60xf32>
    %829 = tpu.matmul %827, %828, %cst_169 {dimension_numbers = #tpu.dot_dimension_numbers<[1], [0], [0], [1], [0, 0, 1, 1], [], []>} : vector<12x4xf32>, vector<4x60xf32>, vector<12x60xf32> -> vector<12x60xf32>
    %830 = arith.mulf %829, %532 : vector<12x60xf32>
    %831 = arith.addf %826, %830 : vector<12x60xf32>
    %832 = arith.mulf %816, %820 : vector<12x4xf32>
    %c0_170 = arith.constant 0 : index
    %c0_171 = arith.constant 0 : index
    %833 = vector.load %arg6[%c0_170, %c0_171] : memref<4x60xf32, #tpu.memory_space<vmem>>, vector<4x60xf32>
    %cst_172 = arith.constant dense<0.000000e+00> : vector<12x60xf32>
    %834 = tpu.matmul %832, %833, %cst_172 {dimension_numbers = #tpu.dot_dimension_numbers<[1], [0], [0], [1], [0, 0, 1, 1], [], []>} : vector<12x4xf32>, vector<4x60xf32>, vector<12x60xf32> -> vector<12x60xf32>
    %835 = arith.mulf %834, %791 : vector<12x60xf32>
    %836 = arith.addf %831, %835 : vector<12x60xf32>
    %c0_173 = arith.constant 0 : index
    %c0_174 = arith.constant 0 : index
    %837 = vector.load %arg7[%c0_173, %c0_174] : memref<60x15xf32, #tpu.memory_space<vmem>>, vector<60x15xf32>
    %cst_175 = arith.constant dense<0.000000e+00> : vector<12x15xf32>
    %838 = tpu.matmul %836, %837, %cst_175 {dimension_numbers = #tpu.dot_dimension_numbers<[1], [0], [0], [1], [0, 0, 1, 1], [], []>} : vector<12x60xf32>, vector<60x15xf32>, vector<12x15xf32> -> vector<12x15xf32>
    %839 = vector.extract_strided_slice %801 {offsets = [0, 12], sizes = [12, 12], strides = [1, 1]} : vector<12x36xf32> to vector<12x12xf32>
    %840 = vector.extract_strided_slice %839 {offsets = [0, 0], sizes = [12, 4], strides = [1, 1]} : vector<12x12xf32> to vector<12x4xf32>
    %841 = vector.extract_strided_slice %839 {offsets = [0, 4], sizes = [12, 4], strides = [1, 1]} : vector<12x12xf32> to vector<12x4xf32>
    %842 = arith.maximumf %840, %841 : vector<12x4xf32>
    %843 = vector.extract_strided_slice %839 {offsets = [0, 8], sizes = [12, 4], strides = [1, 1]} : vector<12x12xf32> to vector<12x4xf32>
    %844 = arith.maximumf %842, %843 : vector<12x4xf32>
    %845 = vector.extract_strided_slice %839 {offsets = [0, 0], sizes = [12, 4], strides = [1, 1]} : vector<12x12xf32> to vector<12x4xf32>
    %846 = arith.subf %845, %844 : vector<12x4xf32>
    %847 = math.exp %846 : vector<12x4xf32>
    %848 = vector.extract_strided_slice %839 {offsets = [0, 4], sizes = [12, 4], strides = [1, 1]} : vector<12x12xf32> to vector<12x4xf32>
    %849 = arith.subf %848, %844 : vector<12x4xf32>
    %850 = math.exp %849 : vector<12x4xf32>
    %851 = vector.extract_strided_slice %839 {offsets = [0, 8], sizes = [12, 4], strides = [1, 1]} : vector<12x12xf32> to vector<12x4xf32>
    %852 = arith.subf %851, %844 : vector<12x4xf32>
    %853 = math.exp %852 : vector<12x4xf32>
    %854 = arith.addf %847, %850 : vector<12x4xf32>
    %855 = arith.addf %854, %853 : vector<12x4xf32>
    %cst_176 = arith.constant 1.000000e+00 : f32
    %856 = vector.broadcast %cst_176 : f32 to vector<12x4xf32>
    %857 = arith.divf %856, %855 : vector<12x4xf32>
    %cst_177 = arith.constant 0.000000e+00 : f32
    %858 = vector.broadcast %cst_177 : f32 to vector<12x60xf32>
    %859 = arith.mulf %847, %857 : vector<12x4xf32>
    %c0_178 = arith.constant 0 : index
    %c0_179 = arith.constant 0 : index
    %860 = vector.load %arg6[%c0_178, %c0_179] : memref<4x60xf32, #tpu.memory_space<vmem>>, vector<4x60xf32>
    %cst_180 = arith.constant dense<0.000000e+00> : vector<12x60xf32>
    %861 = tpu.matmul %859, %860, %cst_180 {dimension_numbers = #tpu.dot_dimension_numbers<[1], [0], [0], [1], [0, 0, 1, 1], [], []>} : vector<12x4xf32>, vector<4x60xf32>, vector<12x60xf32> -> vector<12x60xf32>
    %862 = arith.mulf %861, %273 : vector<12x60xf32>
    %863 = arith.addf %858, %862 : vector<12x60xf32>
    %864 = arith.mulf %850, %857 : vector<12x4xf32>
    %c0_181 = arith.constant 0 : index
    %c0_182 = arith.constant 0 : index
    %865 = vector.load %arg6[%c0_181, %c0_182] : memref<4x60xf32, #tpu.memory_space<vmem>>, vector<4x60xf32>
    %cst_183 = arith.constant dense<0.000000e+00> : vector<12x60xf32>
    %866 = tpu.matmul %864, %865, %cst_183 {dimension_numbers = #tpu.dot_dimension_numbers<[1], [0], [0], [1], [0, 0, 1, 1], [], []>} : vector<12x4xf32>, vector<4x60xf32>, vector<12x60xf32> -> vector<12x60xf32>
    %867 = arith.mulf %866, %532 : vector<12x60xf32>
    %868 = arith.addf %863, %867 : vector<12x60xf32>
    %869 = arith.mulf %853, %857 : vector<12x4xf32>
    %c0_184 = arith.constant 0 : index
    %c0_185 = arith.constant 0 : index
    %870 = vector.load %arg6[%c0_184, %c0_185] : memref<4x60xf32, #tpu.memory_space<vmem>>, vector<4x60xf32>
    %cst_186 = arith.constant dense<0.000000e+00> : vector<12x60xf32>
    %871 = tpu.matmul %869, %870, %cst_186 {dimension_numbers = #tpu.dot_dimension_numbers<[1], [0], [0], [1], [0, 0, 1, 1], [], []>} : vector<12x4xf32>, vector<4x60xf32>, vector<12x60xf32> -> vector<12x60xf32>
    %872 = arith.mulf %871, %791 : vector<12x60xf32>
    %873 = arith.addf %868, %872 : vector<12x60xf32>
    %c0_187 = arith.constant 0 : index
    %c0_188 = arith.constant 0 : index
    %874 = vector.load %arg7[%c0_187, %c0_188] : memref<60x15xf32, #tpu.memory_space<vmem>>, vector<60x15xf32>
    %cst_189 = arith.constant dense<0.000000e+00> : vector<12x15xf32>
    %875 = tpu.matmul %873, %874, %cst_189 {dimension_numbers = #tpu.dot_dimension_numbers<[1], [0], [0], [1], [0, 0, 1, 1], [], []>} : vector<12x60xf32>, vector<60x15xf32>, vector<12x15xf32> -> vector<12x15xf32>
    %876 = vector.extract_strided_slice %801 {offsets = [0, 24], sizes = [12, 12], strides = [1, 1]} : vector<12x36xf32> to vector<12x12xf32>
    %877 = vector.extract_strided_slice %876 {offsets = [0, 0], sizes = [12, 4], strides = [1, 1]} : vector<12x12xf32> to vector<12x4xf32>
    %878 = vector.extract_strided_slice %876 {offsets = [0, 4], sizes = [12, 4], strides = [1, 1]} : vector<12x12xf32> to vector<12x4xf32>
    %879 = arith.maximumf %877, %878 : vector<12x4xf32>
    %880 = vector.extract_strided_slice %876 {offsets = [0, 8], sizes = [12, 4], strides = [1, 1]} : vector<12x12xf32> to vector<12x4xf32>
    %881 = arith.maximumf %879, %880 : vector<12x4xf32>
    %882 = vector.extract_strided_slice %876 {offsets = [0, 0], sizes = [12, 4], strides = [1, 1]} : vector<12x12xf32> to vector<12x4xf32>
    %883 = arith.subf %882, %881 : vector<12x4xf32>
    %884 = math.exp %883 : vector<12x4xf32>
    %885 = vector.extract_strided_slice %876 {offsets = [0, 4], sizes = [12, 4], strides = [1, 1]} : vector<12x12xf32> to vector<12x4xf32>
    %886 = arith.subf %885, %881 : vector<12x4xf32>
    %887 = math.exp %886 : vector<12x4xf32>
    %888 = vector.extract_strided_slice %876 {offsets = [0, 8], sizes = [12, 4], strides = [1, 1]} : vector<12x12xf32> to vector<12x4xf32>
    %889 = arith.subf %888, %881 : vector<12x4xf32>
    %890 = math.exp %889 : vector<12x4xf32>
    %891 = arith.addf %884, %887 : vector<12x4xf32>
    %892 = arith.addf %891, %890 : vector<12x4xf32>
    %cst_190 = arith.constant 1.000000e+00 : f32
    %893 = vector.broadcast %cst_190 : f32 to vector<12x4xf32>
    %894 = arith.divf %893, %892 : vector<12x4xf32>
    %cst_191 = arith.constant 0.000000e+00 : f32
    %895 = vector.broadcast %cst_191 : f32 to vector<12x60xf32>
    %896 = arith.mulf %884, %894 : vector<12x4xf32>
    %c0_192 = arith.constant 0 : index
    %c0_193 = arith.constant 0 : index
    %897 = vector.load %arg6[%c0_192, %c0_193] : memref<4x60xf32, #tpu.memory_space<vmem>>, vector<4x60xf32>
    %cst_194 = arith.constant dense<0.000000e+00> : vector<12x60xf32>
    %898 = tpu.matmul %896, %897, %cst_194 {dimension_numbers = #tpu.dot_dimension_numbers<[1], [0], [0], [1], [0, 0, 1, 1], [], []>} : vector<12x4xf32>, vector<4x60xf32>, vector<12x60xf32> -> vector<12x60xf32>
    %899 = arith.mulf %898, %273 : vector<12x60xf32>
    %900 = arith.addf %895, %899 : vector<12x60xf32>
    %901 = arith.mulf %887, %894 : vector<12x4xf32>
    %c0_195 = arith.constant 0 : index
    %c0_196 = arith.constant 0 : index
    %902 = vector.load %arg6[%c0_195, %c0_196] : memref<4x60xf32, #tpu.memory_space<vmem>>, vector<4x60xf32>
    %cst_197 = arith.constant dense<0.000000e+00> : vector<12x60xf32>
    %903 = tpu.matmul %901, %902, %cst_197 {dimension_numbers = #tpu.dot_dimension_numbers<[1], [0], [0], [1], [0, 0, 1, 1], [], []>} : vector<12x4xf32>, vector<4x60xf32>, vector<12x60xf32> -> vector<12x60xf32>
    %904 = arith.mulf %903, %532 : vector<12x60xf32>
    %905 = arith.addf %900, %904 : vector<12x60xf32>
    %906 = arith.mulf %890, %894 : vector<12x4xf32>
    %c0_198 = arith.constant 0 : index
    %c0_199 = arith.constant 0 : index
    %907 = vector.load %arg6[%c0_198, %c0_199] : memref<4x60xf32, #tpu.memory_space<vmem>>, vector<4x60xf32>
    %cst_200 = arith.constant dense<0.000000e+00> : vector<12x60xf32>
    %908 = tpu.matmul %906, %907, %cst_200 {dimension_numbers = #tpu.dot_dimension_numbers<[1], [0], [0], [1], [0, 0, 1, 1], [], []>} : vector<12x4xf32>, vector<4x60xf32>, vector<12x60xf32> -> vector<12x60xf32>
    %909 = arith.mulf %908, %791 : vector<12x60xf32>
    %910 = arith.addf %905, %909 : vector<12x60xf32>
    %c0_201 = arith.constant 0 : index
    %c0_202 = arith.constant 0 : index
    %911 = vector.load %arg7[%c0_201, %c0_202] : memref<60x15xf32, #tpu.memory_space<vmem>>, vector<60x15xf32>
    %cst_203 = arith.constant dense<0.000000e+00> : vector<12x15xf32>
    %912 = tpu.matmul %910, %911, %cst_203 {dimension_numbers = #tpu.dot_dimension_numbers<[1], [0], [0], [1], [0, 0, 1, 1], [], []>} : vector<12x60xf32>, vector<60x15xf32>, vector<12x15xf32> -> vector<12x15xf32>
    %913 = tpu.concatenate %838, %875, %912 in 1 : vector<12x15xf32>, vector<12x15xf32>, vector<12x15xf32> -> vector<12x45xf32>
    %c0_204 = arith.constant 0 : index
    %c0_205 = arith.constant 0 : index
    %914 = vector.load %arg8[%c0_204, %c0_205] : memref<1x45xf32, #tpu.memory_space<vmem>>, vector<1x45xf32>
    %915 = vector.broadcast %914 : vector<1x45xf32> to vector<12x45xf32>
    %916 = arith.addf %913, %915 : vector<12x45xf32>
    %cst_206 = arith.constant 0.000000e+00 : f32
    %917 = vector.broadcast %cst_206 : f32 to vector<12x45xf32>
    %918 = arith.maximumf %916, %917 : vector<12x45xf32>
    %c0_207 = arith.constant 0 : index
    %c0_208 = arith.constant 0 : index
    %919 = vector.load %arg9[%c0_207, %c0_208] : memref<12x45xf32, #tpu.memory_space<vmem>>, vector<12x45xf32>
    tpu.vector_store %arg9[%c0_207, %c0_208], %918 {strides = array<i32>} : memref<12x45xf32, #tpu.memory_space<vmem>>, vector<12x45xf32>,
    return
  }
  func.func @transform_0(%arg0: i32) -> (i32, i32, i32) {
    %c0_i32 = arith.constant 0 : i32
    %c0_i32_0 = arith.constant 0 : i32
    %c0_i32_1 = arith.constant 0 : i32
    return %c0_i32, %arg0, %c0_i32_0 : i32, i32, i32
  }
  func.func @transform_1(%arg0: i32) -> (i32, i32) {
    %c0_i32 = arith.constant 0 : i32
    %c0_i32_0 = arith.constant 0 : i32
    %c0_i32_1 = arith.constant 0 : i32
    return %c0_i32, %c0_i32_0 : i32, i32
  }
  func.func @transform_2(%arg0: i32) -> (i32, i32) {
    %c0_i32 = arith.constant 0 : i32
    %c0_i32_0 = arith.constant 0 : i32
    %c0_i32_1 = arith.constant 0 : i32
    return %c0_i32, %c0_i32_0 : i32, i32
  }
  func.func @transform_3(%arg0: i32) -> (i32, i32) {
    %c0_i32 = arith.constant 0 : i32
    %c0_i32_0 = arith.constant 0 : i32
    %c0_i32_1 = arith.constant 0 : i32
    return %c0_i32, %c0_i32_0 : i32, i32
  }
  func.func @transform_4(%arg0: i32) -> (i32, i32) {
    %c0_i32 = arith.constant 0 : i32
    %c0_i32_0 = arith.constant 0 : i32
    %c0_i32_1 = arith.constant 0 : i32
    return %c0_i32, %c0_i32_0 : i32, i32
  }
  func.func @transform_5(%arg0: i32) -> (i32, i32) {
    %c0_i32 = arith.constant 0 : i32
    %c0_i32_0 = arith.constant 0 : i32
    %c0_i32_1 = arith.constant 0 : i32
    return %c0_i32, %c0_i32_0 : i32, i32
  }
  func.func @transform_6(%arg0: i32) -> (i32, i32) {
    %c0_i32 = arith.constant 0 : i32
    %c0_i32_0 = arith.constant 0 : i32
    %c0_i32_1 = arith.constant 0 : i32
    return %c0_i32, %c0_i32_0 : i32, i32
  }
  func.func @transform_7(%arg0: i32) -> (i32, i32) {
    %c0_i32 = arith.constant 0 : i32
    %c0_i32_0 = arith.constant 0 : i32
    %c0_i32_1 = arith.constant 0 : i32
    return %c0_i32, %c0_i32_0 : i32, i32
  }
  func.func @transform_8(%arg0: i32) -> (i32, i32) {
    %c0_i32 = arith.constant 0 : i32
    %c0_i32_0 = arith.constant 0 : i32
    return %arg0, %c0_i32 : i32, i32
  }
}

</mosaic_0001>

<bundles_post_ra>
// kernel: dam_forward.2
= control target key start
LH: loop header
LB: loop body
LE: loop exit
PB: predicated region body
PF: predicated region fallthrough
CT: control target
= control target key end

     0   :  { %s1581_s13 = smov 0   ;;  %s1583_s14 = smov 0   ;;  %s1860_s0 = inlined_call_operand.vmem [shape: f32[12,45], index: 0, kind: input, shape index: {}, may-alias: {0,1}]   ;;  %s1861_s1 = inlined_call_operand.vmem [shape: f32[12,45], index: 1, kind: input, shape index: {}, may-alias: {0,1}]   ;;  %s1862_s2 = inlined_call_operand.vmem [shape: f32[3,45,15], index: 2, kind: input, shape index: {}]   ;;  %s1863_s3 = inlined_call_operand.vmem [shape: f32[1,15], index: 3, kind: input, shape index: {}]   ;;  %s1864_s4 = inlined_call_operand.vmem [shape: f32[3,45,30], index: 4, kind: input, shape index: {}]   ;;  %s1865_s5 = inlined_call_operand.vmem [shape: f32[1,30], index: 5, kind: input, shape index: {}]   ;;  %s1866_s6 = inlined_call_operand.vmem [shape: f32[15,15], index: 6, kind: input, shape index: {}]   ;;  %s1867_s7 = inlined_call_operand.vmem [shape: f32[1,15], index: 7, kind: input, shape index: {}]   ;;  %s1868_s8 = inlined_call_operand.vmem [shape: f32[15,45], index: 8, kind: input, shape index: {}]   ;;  %s1869_s9 = inlined_call_operand.vmem [shape: f32[1,45], index: 9, kind: input, shape index: {}]   ;;  %s1870_s10 = inlined_call_operand.vmem [shape: f32[3,12,45], index: 10, kind: output, shape index: {}]  }
   0x1   :  { %s1585_s15 = smov 0  }
   0x2 LB: > { %s39_s16 = sadd.s32 1, %s1510_s14  ;;  %p1371_p0 = scmp.ge.s32.totalorder %s1514_s15, 1  ;;  %s1514_s15 = sphi %s1585_s15, %s20_s15   ;;  %s1510_s14 = sphi %s1583_s14, %s1872_s14   ;;  %s1506_s13 = sphi %s1581_s13, %s1871_s13  }
   0x3   : > { %p41_p1 = scmp.ge.s32.totalorder %s39_s16, 3  ;;  %p365_p2 = scmp.lt.s32.totalorder %s1514_s15, 4 }
   0x5   : > { %s1874_s16 = smov (%p41_p1, %s39_s16), 0  ;;  %p366_p3 = pnand %p1371_p0, %p365_p2 }
   0x6   : > { %p434_p4 = scmp.lt.s32.totalorder (!%p366_p3), %s1506_s13, 2  ;;  %s1516_s18 = smov (!%p366_p3), 113  }
   0x7   : > { %369 = sbr.rel (%p366_p3) target bundleno = 1597 (0x63d), region = 60  ;;  %s1517_s21 = smov (!%p366_p3), 123  }
   0x8   : > { %s1518_s22 = smov (!%p366_p3), 118   ;;  %s1523_s24 = smov (!%p366_p3), 103  }
   0x9   : > { %s1524_s25 = smov (!%p366_p3), 5   ;;  %s1525_s26 = smov (!%p366_p3), 10  }
   0xc   : > { %s1876_s13 = smov (!%p434_p4, %s1506_s13), 2  ;;  %vm499_vm0 = vcmask 1044480   ;;  %vm492_vm1 = vcmask 367616   ;;  %v526_v11 = vld [vmem:[%s1861_s1] sm:$0xff]  ;;  %v527_v14 = vld [vmem:[%s1861_s1 + $0x8] sm:$0xf] }
   0xd   : > { %s1414_s17 = smul.u32 48, %s1876_s13  ;;  %v480_v13 = vld [vmem:[%s1860_s0] sm:$0xff]  ;;  %v481_v15 = vld [vmem:[%s1860_s0 + $0x8] sm:$0xf]  ;;  %vm472_vm2 = vcmask 39936   ;;  %vm681_vm3 = vcmask 1043456  }
   0xe   : > { %v1452_v18 = vld [vmem:[%s1865_s5] ss:$0 sm:$0xff]  ;;  %vm608_vm4 = vcmask 97280   ;;  %vm612_vm5 = vcmask 93184   ;;  %vm458_vm6 = vcmask 7168   ;;  %v1519_v31 = vmov -inf  }
   0xf   : > { %s443_s20 = scalar_lea.vmem %s1864_s4, %s1414_s17  ;;  %s438_s23 = scalar_lea.vmem %s1862_s2, %s1414_s17  ;;  %v1453_v21 = vld [vmem:[%s1863_s3] ss:$0 sm:$0xff]  ;;  %459 = vst.msk [vmem:[#allocation2] sm:$0xff] %vm458_vm6, %v1519_v31  ;;  %vm460_vm7 = vcmask 3072   ;;  %v1520_v33 = vmov 0   ;;  %v1521_v34 = vmov 0.0  }
  0x10   : > { %v533_v0 = vld [vmem:[%s443_s20 + $0x28] sm:$0x1f]  ;;  %v532_v1 = vld [vmem:[%s443_s20 + $0x20] sm:$0xff]  ;;  %v531_v3 = vld [vmem:[%s443_s20 + $0x18] sm:$0xff]  ;;  %462 = vst.msk [vmem:[#allocation2 + $0x10] sm:$0xff] %vm458_vm6, %v1519_v31  ;;  %1449 = vset.pattern.permute.xlu1 %v1520_v33  ;;  %1450 = vset.pattern.permute.xlu0 %v1520_v33  ;;  %vm474_vm8 = vcmask 35840  }
  0x11   : > { %1379 = vmatpush.msk.msra.mxu1 %vm499_vm0, %v533_v0  ;;  %v487_v2 = vld [vmem:[%s438_s23 + $0x28] sm:$0x1f]  ;;  %v486_v4 = vld [vmem:[%s438_s23 + $0x20] sm:$0xff]  ;;  %v485_v5 = vld [vmem:[%s438_s23 + $0x18] sm:$0xff]  ;;  %464 = vst.msk [vmem:[#allocation2 + $0x20] sm:$0xff] %vm458_vm6, %v1519_v31  ;;  %1451 = vset.pattern.permute.xlu2 %v1520_v33 }
  0x12   : > { %1376 = vmatpush.msk.msra.mxu0 %vm499_vm0, %v487_v2  ;;  %v530_v6 = vld [vmem:[%s443_s20 + $0x10] sm:$0xff]  ;;  %v529_v8 = vld [vmem:[%s443_s20 + $0x8] sm:$0xff]  ;;  %v528_v10 = vld [vmem:[%s443_s20] sm:$0xff]  ;;  %461 = vst.msk [vmem:[#allocation2 + $0x8] sm:$0xf] %vm460_vm7, %v1519_v31 }
  0x13   : > { %558 = vmatpush.msra.mxu1 %v532_v1  ;;  %v484_v7 = vld [vmem:[%s438_s23 + $0x10] sm:$0xff]  ;;  %v483_v9 = vld [vmem:[%s438_s23 + $0x8] sm:$0xff]  ;;  %v482_v12 = vld [vmem:[%s438_s23] sm:$0xff]  ;;  %463 = vst.msk [vmem:[#allocation2 + $0x18] sm:$0xf] %vm460_vm7, %v1519_v31  ;;  %s1522_s23 = smov 108  }
  0x14   : > { %514 = vmatpush.msra.mxu0 %v486_v4  ;;  %465 = vst.msk [vmem:[#allocation2 + $0x28] sm:$0xf] %vm460_vm7, %v1519_v31 }
  0x15   : > { %559 = vmatpush.msra.mxu1 %v531_v3  ;;  %469 = vst.msk [vmem:[#allocation3 + $0x18] sm:$0xf] %vm460_vm7, %v1521_v34 }
  0x16   : > { %515 = vmatpush.msra.mxu0 %v485_v5  ;;  %466 = vst.msk [vmem:[#allocation3] sm:$0xff] %vm458_vm6, %v1521_v34  ;;  %v1679_v35 = vld [vmem:[#allocation2] sm:$0xff] }
  0x17   : > { %560 = vmatpush.msra.mxu1 %v530_v6  ;;  %467 = vst.msk [vmem:[#allocation3 + $0x8] sm:$0xf] %vm460_vm7, %v1521_v34  ;;  %v754_v5 = vld [vmem:[#allocation2 + $0x10] sm:$0xff] }
  0x18   : > { %516 = vmatpush.msra.mxu0 %v484_v7  ;;  %468 = vst.msk [vmem:[#allocation3 + $0x10] sm:$0xff] %vm458_vm6, %v1521_v34  ;;  %v1733_v7 = vld [vmem:[#allocation2 + $0x20] sm:$0xff] }
  0x19   : > { %561 = vmatpush.msra.mxu1 %v529_v8  ;;  %470 = vst.msk [vmem:[#allocation3 + $0x20] sm:$0xff] %vm458_vm6, %v1521_v34  ;;  %v1689_v39 = vld [vmem:[#allocation2 + $0x8] sm:$0xf] }
  0x1a   : > { %517 = vmatpush.msra.mxu0 %v483_v9  ;;  %471 = vst.msk [vmem:[#allocation3 + $0x28] sm:$0xf] %vm460_vm7, %v1521_v34 }
  0x1b   : > { %562 = vmatpush.msra.mxu1 %v528_v10  ;;  %473 = vst.msk [vmem:[#allocation4] sm:$0xff] %vm472_vm2, %v1521_v34 }
  0x1c   : > { %1380 = vmatmul.msk.f32.vlgmr.msra.gmra.mxu1 %vm492_vm1, %v526_v11  ;;  %518 = vmatpush.msra.mxu0 %v482_v12  ;;  %476 = vst.msk [vmem:[#allocation4 + $0x10] sm:$0xff] %vm472_vm2, %v1521_v34 }
  0x1d   : > { %1377 = vmatmul.msk.f32.vlgmr.msra.gmra.mxu0 %vm492_vm1, %v480_v13  ;;  %478 = vst.msk [vmem:[#allocation4 + $0x20] sm:$0xff] %vm472_vm2, %v1521_v34  ;;  %v755_v13 = vld [vmem:[#allocation2 + $0x18] sm:$0xf] }
  0x1e   : > { %477 = vst.msk [vmem:[#allocation4 + $0x18] sm:$0xf] %vm474_vm8, %v1521_v34 }
  0x1f   : > { %475 = vst.msk [vmem:[#allocation4 + $0x8] sm:$0xf] %vm474_vm8, %v1521_v34 }
  0x20   : > { %479 = vst.msk [vmem:[#allocation4 + $0x28] sm:$0xf] %vm474_vm8, %v1521_v34 }
  0x24   : > { %1381 = vmatmul.msk.f32.gmra.mxu1 %vm492_vm1, %v527_v14 }
  0x25   : > { %1378 = vmatmul.msk.f32.gmra.mxu0 %vm492_vm1, %v481_v15  ;;  %v1744_v15 = vld [vmem:[#allocation2 + $0x28] sm:$0xf] }
  0x99   : > { %v564_v16 = vpop.f32.mrf.mxu1 }
  0x9a   : > { %v520_v17 = vpop.f32.mrf.mxu0  ;;  %v1637_v23 = vadd.f32 %v1452_v18, %v564_v16 }
  0x9b   : > { %v521_v25 = vadd.f32 %v1453_v21, %v520_v17 }
  0xa1   : > { %v567_v19 = vpop.f32.mrf.mxu1 }
  0xa2   : > { %v1627_v20 = vadd.f32 %v1452_v18, %v567_v19  ;;  %v523_v22 = vpop.f32.mrf.mxu0 }
  0xa3   : > { %v524_v24 = vadd.f32 %v1453_v21, %v523_v22 }
  0xa4   : > { %672 = vrot.lane.b32.xlu2 %v1627_v20, %s1516_s18  ;;  %1382 = vmatpush.xpose.msk.msrb.mxu0 %vm472_vm2, %v1627_v20 }
  0xa5   : > { %1412 = vmatpush.xpose.msk.msra.mxu2 %vm472_vm2, %v1627_v20 }
  0xa8   : > { %1383 = vmatpush.xpose.msk.msrb.mxu0 %vm472_vm2, %v1637_v23 }
  0xa9   : > { %1413 = vmatpush.xpose.msk.msra.mxu2 %vm472_vm2, %v1637_v23 }
  0xab   : > { %1384 = vmatmul.msk.f32.vlgmr.msrb.gmra.mxu0 %vm472_vm2, %v521_v25 }
  0xac   : > { %670 = vrot.lane.b32.xlu2 %v1637_v23, %s1516_s18  ;;  %1385 = vmatmul.msk.f32.vlgmr.msra.gmra.mxu2 %vm472_vm2, %v524_v24 }
  0xb4   : > { %714 = vrot.lane.b32.xlu2 %v521_v25, %s1517_s21 }
  0xbc   : > { %716 = vrot.lane.b32.xlu2 %v524_v24, %s1517_s21 }
  0xc4   : > { %858 = vrot.lane.b32.xlu2 %v521_v25, %s1518_s22 }
  0xfe   : > { %v673_v26 = vpop.permute.xlu2 %672 }
  0xff   : > { %1386 = vmatpush.msk.msra.mxu3 %vm681_vm3, %v673_v26 }
 0x106   : > { %v671_v27 = vpop.permute.xlu2 %670 }
 0x107   : > { %699 = vmatpush.msra.mxu3 %v671_v27 }
 0x10e   : > { %v715_v51 = vpop.permute.xlu2 %714 }
 0x116   : > { %v717_v55 = vpop.permute.xlu2 %716 }
 0x11e   : > { %v859_v57 = vpop.permute.xlu2 %858 }
 0x128   : > { %v600_v28 = vpop.f32.mrf.mxu0 }
 0x129   : > { %v609_v29 = vsel %vm608_vm4, %v600_v28, -inf }
 0x12a   : > { %610 = vmax.xlane.f32.xlu0 %v609_v29 }
 0x12f   : > { %v603_v30 = vpop.f32.mrf.mxu2 }
 0x130   : > { %v613_v32 = vsel %vm612_vm5, %v603_v30, -inf }
 0x132   : > { %614 = vmax.xlane.f32.xlu0 %v613_v32 }
 0x146   : > { %720 = vrot.lane.b32.xlu0 %v1627_v20, %s1517_s21 }
 0x14e   : > { %860 = vrot.lane.b32.xlu0 %v524_v24, %s1518_s22 }
 0x19d   : > { %v611_v36 = vpop.xlane.xlu0 %610 }
 0x19e   : > { %v1682_v37 = vmax.f32 %v1679_v35, %v611_v36 }
 0x1a0   : > { %v618_v38 = vsub.f32 %v1679_v35, %v1682_v37  ;;  %712 = vst.msk [vmem:[#allocation2] sm:$0xff] %vm458_vm6, %v1682_v37  ;;  %626 = vperm.xlu1 %1449, %v1682_v37  }
 0x1a5   : > { %v615_v40 = vpop.xlane.xlu0 %614 }
 0x1a6   : > { %v1692_v41 = vmax.f32 %v1689_v39, %v615_v40 }
 0x1a8   : > { %v619_v42 = vsub.f32 %v1689_v39, %v1692_v41  ;;  %713 = vst.msk [vmem:[#allocation2 + $0x8] sm:$0xf] %vm460_vm7, %v1692_v41  ;;  %631 = vperm.xlu1 %1449, %v1692_v41  }
 0x1b0   : > { %718 = vrot.lane.b32.xlu1 %v1637_v23, %s1517_s21  ;;  %s1411_s21 = sshll.u32 %s1876_s13, 4 }
 0x1b8   : > { %864 = vrot.lane.b32.xlu1 %v1627_v20, %s1518_s22  ;;  %v721_v43 = vpop.permute.xlu0 %720 }
 0x1b9   : > { %1389 = vmatpush.xpose.msk.msrb.mxu3 %vm472_vm2, %v721_v43 }
 0x1c0   : > { %862 = vrot.lane.b32.xlu1 %v1637_v23, %s1518_s22  ;;  %v861_v58 = vpop.permute.xlu0 %860 }
 0x212   : > { %v627_v44 = vpop.permute.xlu1 %626 }
 0x213   : > { %v634_v45 = vsub.f32 %v600_v28, %v627_v44 }
 0x215   : > { %v636_v46 = vmul.f32 1.442695, %v634_v45 }
 0x217   : > { %1456 = vpow2.f32 %v636_v46 }
 0x21a   : > { %v632_v47 = vpop.permute.xlu1 %631 }
 0x21b   : > { %v635_v48 = vsub.f32 %v603_v30, %v632_v47 }
 0x21d   : > { %v1706_v49 = vpop.eup %1456  ;;  %v638_v50 = vmul.f32 1.442695, %v635_v48 }
 0x21e   : > { %1387 = vmatmul.msk.f32.vlgmr.msra.gmra.mxu3 %vm608_vm4, %v1706_v49 }
 0x21f   : > { %1458 = vpow2.f32 %v638_v50 }
 0x222   : > { %v719_v52 = vpop.permute.xlu1 %718 }
 0x223   : > { %1390 = vmatpush.xpose.msk.msrb.mxu3 %vm472_vm2, %v719_v52  ;;  %v644_v52 = vsel %vm608_vm4, %v1706_v49, 0.0  ;;  %v620_v49 = vmul.f32 1.442695, %v618_v38  ;;  %v641_v38 = vld [vmem:[#allocation3 + $0x8] sm:$0xf] }
 0x225   : > { %v1711_v53 = vpop.eup %1458 }
 0x226   : > { %1388 = vmatmul.msk.f32.gmra.mxu3 %vm608_vm4, %v1711_v53 }
 0x22a   : > { %v865_v54 = vpop.permute.xlu1 %864 }
 0x22b   : > { %1396 = vmatpush.xpose.msk.msra.mxu0 %vm472_vm2, %v865_v54 }
 0x22e   : > { %1391 = vmatmul.msk.f32.vlgmr.msrb.gmra.mxu3 %vm472_vm2, %v715_v51 }
 0x232   : > { %v863_v56 = vpop.permute.xlu1 %862 }
 0x233   : > { %1397 = vmatpush.xpose.msk.msra.mxu0 %vm472_vm2, %v863_v56 }
 0x236   : > { %1392 = vmatmul.msk.f32.gmra.mxu3 %vm472_vm2, %v717_v55  ;;  %1398 = vmatmul.msk.f32.vlgmr.msra.gmra.mxu0 %vm472_vm2, %v859_v57 }
 0x23e   : > { %1399 = vmatmul.msk.f32.gmra.mxu0 %vm472_vm2, %v861_v58 }
 0x2a1   : > { %v1721_v59 = vpop.f32.mrf.mxu3 }
 0x2a9   : > { %v1723_v60 = vpop.f32.mrf.mxu3 }
 0x2b1   : > { %v747_v61 = vpop.f32.mrf.mxu3 }
 0x2b2   : > { %v756_v62 = vsel %vm608_vm4, %v747_v61, -inf }
 0x2b3   : > { %v891_v63 = vpop.f32.mrf.mxu0  ;;  %757 = vmax.xlane.f32.xlu1 %v756_v62  ;;  %v622_v62 = vmul.f32 1.442695, %v619_v42 }
 0x2b4   : > { %v900_v0 = vsel %vm608_vm4, %v891_v63, -inf }
 0x2b5   : > { %901 = vmax.xlane.f32.xlu2 %v900_v0 }
 0x2b9   : > { %v750_v1 = vpop.f32.mrf.mxu3 }
 0x2ba   : > { %v759_v2 = vsel %vm612_vm5, %v750_v1, -inf }
 0x2bb   : > { %760 = vmax.xlane.f32.xlu0 %v759_v2  ;;  %v1728_v3 = vpop.f32.mrf.mxu0 }
 0x2bc   : > { %v903_v4 = vsel %vm612_vm5, %v1728_v3, -inf }
 0x2bd   : > { %904 = vmax.xlane.f32.xlu2 %v903_v4 }
 0x2d5   : > { %816 = vrot.lane.b32.xlu2 %v1637_v23, %s1522_s23 }
 0x326   : > { %v758_v6 = vpop.xlane.xlu1 %757 }
 0x327   : > { %v762_v8 = vmax.f32 %v754_v5, %v758_v6 }
 0x328   : > { %v902_v9 = vpop.xlane.xlu2 %901 }
 0x329   : > { %v764_v10 = vsub.f32 %v754_v5, %v762_v8  ;;  %856 = vst.msk [vmem:[#allocation2 + $0x10] sm:$0xff] %vm458_vm6, %v762_v8  ;;  %v1737_v11 = vmax.f32 %v1733_v7, %v902_v9  ;;  %772 = vperm.xlu1 %1449, %v762_v8   ;;  %v931_v5 = vld [vmem:[#allocation3 + $0x20] sm:$0xff] }
 0x32b   : > { %v908_v12 = vsub.f32 %v1733_v7, %v1737_v11  ;;  %1000 = vst.msk [vmem:[#allocation2 + $0x20] sm:$0xff] %vm458_vm6, %v1737_v11  ;;  %916 = vperm.xlu0 %1450, %v1737_v11   ;;  %v766_v50 = vmul.f32 1.442695, %v764_v10 }
 0x32d   : > { %v910_v37 = vmul.f32 1.442695, %v908_v12  ;;  %v640_v12 = vld [vmem:[#allocation3] sm:$0xff] }
 0x32e   : > { %v761_v14 = vpop.xlane.xlu0 %760 }
 0x32f   : > { %v763_v16 = vmax.f32 %v755_v13, %v761_v14 }
 0x330   : > { %v905_v17 = vpop.xlane.xlu2 %904 }
 0x331   : > { %v765_v18 = vsub.f32 %v755_v13, %v763_v16  ;;  %857 = vst.msk [vmem:[#allocation2 + $0x18] sm:$0xf] %vm460_vm7, %v763_v16  ;;  %v1748_v19 = vmax.f32 %v1744_v15, %v905_v17  ;;  %818 = vrot.lane.b32.xlu1 %v1627_v20, %s1522_s23  ;;  %777 = vperm.xlu2 %1451, %v763_v16  }
 0x333   : > { %v909_v21 = vsub.f32 %v1744_v15, %v1748_v19  ;;  %1001 = vst.msk [vmem:[#allocation2 + $0x28] sm:$0xf] %vm460_vm7, %v1748_v19  ;;  %v768_v55 = vmul.f32 1.442695, %v765_v18  ;;  %v802_v15 = vld [vmem:[#allocation4 + $0x10] sm:$0xff] }
 0x335   : > { %v912_v10 = vmul.f32 1.442695, %v909_v21 }
 0x338   : > { %v817_v22 = vpop.permute.xlu2 %816 }
 0x339   : > { %921 = vperm.xlu1 %1449, %v1748_v19   ;;  %962 = vrot.lane.b32.xlu2 %v1627_v20, %s1523_s24  ;;  %v647_v20 = vsel %vm612_vm5, %v1711_v53, 0.0 }
 0x341   : > { %960 = vrot.lane.b32.xlu1 %v1637_v23, %s1523_s24 }
 0x38b   : > { %v778_v24 = vpop.permute.xlu2 %777 }
 0x38c   : > { %v781_v25 = vsub.f32 %v750_v1, %v778_v24  ;;  %v932_v24 = vld [vmem:[#allocation3 + $0x28] sm:$0xf] }
 0x38e   : > { %v784_v26 = vmul.f32 1.442695, %v781_v25 }
 0x390   : > { %1460 = vpow2.f32 %v784_v26 }
 0x393   : > { %v963_v27 = vpop.permute.xlu2 %962 }
 0x394   : > { %1400 = vmatpush.msk.msrb.mxu1 %vm681_vm3, %v963_v27 }
 0x396   : > { %v1461_v28 = vpop.eup %1460 }
 0x397   : > { %v794_v29 = vsel %vm612_vm5, %v1461_v28, 0.0 }
 0x398   : > { %795 = vadd.xlane.f32.xlu1 %v794_v29 }
 0x39b   : > { %v773_v30 = vpop.permute.xlu1 %772 }
 0x39c   : > { %v780_v31 = vsub.f32 %v747_v61, %v773_v30 }
 0x39d   : > { %v917_v32 = vpop.permute.xlu0 %916 }
 0x39e   : > { %v782_v33 = vmul.f32 1.442695, %v780_v31  ;;  %v924_v36 = vsub.f32 %v891_v63, %v917_v32  ;;  %v788_v63 = vld [vmem:[#allocation3 + $0x18] sm:$0xf]  ;;  %v803_v31 = vld [vmem:[#allocation4 + $0x18] sm:$0xf] }
 0x3a0   : > { %1462 = vpow2.f32 %v782_v33  ;;  %v926_v23 = vmul.f32 1.442695, %v924_v36  ;;  %648 = vadd.xlane.f32.xlu1 %v647_v20 }
 0x3a2   : > { %1464 = vpow2.f32 %v926_v23 }
 0x3a3   : > { %v819_v40 = vpop.permute.xlu1 %818 }
 0x3a4   : > { %1393 = vmatpush.msk.msrb.mxu2 %vm681_vm3, %v819_v40  ;;  %v656_v40 = vld [vmem:[#allocation4] sm:$0xff] }
 0x3a6   : > { %v1463_v43 = vpop.eup %1462  ;;  %844 = vmatpush.msrb.mxu2 %v817_v22 }
 0x3a7   : > { %1394 = vmatmul.msk.f32.vlgmr.msrb.gmra.mxu2 %vm608_vm4, %v1463_v43  ;;  %v791_v44 = vsel %vm608_vm4, %v1463_v43, 0.0 }
 0x3a8   : > { %v1465_v45 = vpop.eup %1464  ;;  %792 = vadd.xlane.f32.xlu0 %v791_v44 }
 0x3a9   : > { %v935_v46 = vsel %vm608_vm4, %v1465_v45, 0.0 }
 0x3aa   : > { %936 = vadd.xlane.f32.xlu2 %v935_v46 }
 0x3ab   : > { %v922_v47 = vpop.permute.xlu1 %921 }
 0x3ac   : > { %v925_v48 = vsub.f32 %v1728_v3, %v922_v47  ;;  %v787_v3 = vld [vmem:[#allocation3 + $0x10] sm:$0xff] }
 0x3ae   : > { %v928_v51 = vmul.f32 1.442695, %v925_v48 }
 0x3af   : > { %1395 = vmatmul.msk.f32.gmra.mxu2 %vm608_vm4, %v1461_v28 }
 0x3b0   : > { %1466 = vpow2.f32 %v928_v51 }
 0x3b1   : > { %1468 = vpow2.f32 %v766_v50 }
 0x3b2   : > { %645 = vadd.xlane.f32.xlu2 %v644_v52  ;;  %1470 = vpow2.f32 %v768_v55  ;;  %v947_v52 = vld [vmem:[#allocation4 + $0x28] sm:$0xf] }
 0x3b3   : > { %v961_v53 = vpop.permute.xlu1 %960  ;;  %1472 = vpow2.f32 %v620_v49 }
 0x3b4   : > { %988 = vmatpush.msrb.mxu1 %v961_v53  ;;  %1474 = vpow2.f32 %v622_v62 }
 0x3b5   : > { %1401 = vmatmul.msk.f32.vlgmr.msrb.gmra.mxu1 %vm608_vm4, %v1465_v45  ;;  %1476 = vpow2.f32 %v910_v37 }
 0x3b6   : > { %v1467_v54 = vpop.eup %1466  ;;  %1478 = vpow2.f32 %v912_v10 }
 0x3b7   : > { %v938_v56 = vsel %vm612_vm5, %v1467_v54, 0.0  ;;  %v1469_v57 = vpop.eup %1468 }
 0x3b8   : > { %939 = vadd.xlane.f32.xlu0 %v938_v56  ;;  %v1471_v58 = vpop.eup %1470  ;;  %v789_v6 = vmul.f32 %v1469_v57, %v787_v3  ;;  %v946_v3 = vld [vmem:[#allocation4 + $0x20] sm:$0xff] }
 0x3b9   : > { %806 = vperm.xlu1 %1449, %v1469_v57   ;;  %v1473_v61 = vpop.eup %1472  ;;  %v790_v0 = vmul.f32 %v1471_v58, %v788_v63 }
 0x3ba   : > { %v1782_v35 = vpop.eup %1474  ;;  %v642_v13 = vmul.f32 %v1473_v61, %v640_v12 }
 0x3bb   : > { %v643_v39 = vmul.f32 %v1782_v35, %v641_v38  ;;  %v1477_v4 = vpop.eup %1476 }
 0x3bc   : > { %v933_v9 = vmul.f32 %v1477_v4, %v931_v5  ;;  %v1479_v18 = vpop.eup %1478 }
 0x3bd   : > { %1402 = vmatmul.msk.f32.gmra.mxu1 %vm608_vm4, %v1467_v54  ;;  %v934_v21 = vmul.f32 %v1479_v18, %v932_v24 }
 0x3c1   : > { %811 = vperm.xlu1 %1449, %v1471_v58  }
 0x3c9   : > { %660 = vperm.xlu1 %1449, %v1473_v61  }
 0x40b   : > { %v796_v1 = vpop.xlane.xlu1 %795 }
 0x40c   : > { %v798_v2 = vadd.f32 %v796_v1, %v790_v0 }
 0x40e   : > { %800 = vst.msk [vmem:[#allocation3 + $0x18] sm:$0xf] %vm460_vm7, %v798_v2 }
 0x413   : > { %v649_v41 = vpop.xlane.xlu1 %648 }
 0x414   : > { %v651_v42 = vadd.f32 %v649_v41, %v643_v39 }
 0x415   : > { %v1052_v30 = vld [vmem:[#allocation3 + $0x18] sm:$0xf] }
 0x416   : > { %655 = vst.msk [vmem:[#allocation3 + $0x8] sm:$0xf] %vm460_vm7, %v651_v42 }
 0x41b   : > { %v793_v7 = vpop.xlane.xlu0 %792 }
 0x41c   : > { %v797_v8 = vadd.f32 %v793_v7, %v789_v6 }
 0x41d   : > { %v937_v11 = vpop.xlane.xlu2 %936  ;;  %v1008_v47 = vld [vmem:[#allocation3 + $0x8] sm:$0xf] }
 0x41e   : > { %799 = vst.msk [vmem:[#allocation3 + $0x10] sm:$0xff] %vm458_vm6, %v797_v8  ;;  %v941_v34 = vadd.f32 %v937_v11, %v933_v9 }
 0x420   : > { %943 = vst.msk [vmem:[#allocation3 + $0x20] sm:$0xff] %vm458_vm6, %v941_v34 }
 0x425   : > { %v646_v14 = vpop.xlane.xlu2 %645  ;;  %v1051_v16 = vld [vmem:[#allocation3 + $0x10] sm:$0xff] }
 0x426   : > { %v650_v17 = vadd.f32 %v646_v14, %v642_v13  ;;  %1055 = vperm.xlu0 %1450, %v1051_v16  }
 0x427   : > { %v1095_v22 = vld [vmem:[#allocation3 + $0x20] sm:$0xff] }
 0x428   : > { %653 = vst.msk [vmem:[#allocation3] sm:$0xff] %vm458_vm6, %v650_v17  ;;  %1099 = vperm.xlu2 %1451, %v1095_v22  }
 0x42a   : > { %v846_v19 = vpop.f32.mrf.mxu2 }
 0x42b   : > { %v807_v25 = vpop.permute.xlu1 %806  ;;  %v940_v26 = vpop.xlane.xlu0 %939 }
 0x42c   : > { %v814_v27 = vmul.f32 %v807_v25, %v802_v15  ;;  %v942_v28 = vadd.f32 %v940_v26, %v934_v21 }
 0x42e   : > { %v852_v29 = vadd.f32 %v846_v19, %v814_v27  ;;  %944 = vst.msk [vmem:[#allocation3 + $0x28] sm:$0xf] %vm460_vm7, %v942_v28  ;;  %950 = vperm.xlu0 %1450, %v1477_v4  }
 0x42f   : > { %v1007_v45 = vld [vmem:[#allocation3] sm:$0xff] }
 0x430   : > { %854 = vst.msk [vmem:[#allocation4 + $0x10] sm:$0xff] %vm472_vm2, %v852_v29  ;;  %1060 = vperm.xlu2 %1451, %v1052_v30  }
 0x432   : > { %v849_v36 = vpop.f32.mrf.mxu2  ;;  %v990_v50 = vpop.f32.mrf.mxu1 }
 0x433   : > { %v812_v32 = vpop.permute.xlu1 %811 }
 0x434   : > { %v815_v33 = vmul.f32 %v812_v32, %v803_v31 }
 0x435   : > { %v1096_v20 = vld [vmem:[#allocation3 + $0x28] sm:$0xf] }
 0x436   : > { %v853_v23 = vadd.f32 %v849_v36, %v815_v33  ;;  %1104 = vperm.xlu0 %1450, %v1096_v20  }
 0x437   : > { %v1049_v15 = vld [vmem:[#allocation4 + $0x10] sm:$0xff] }
 0x438   : > { %855 = vst.msk [vmem:[#allocation4 + $0x18] sm:$0xf] %vm474_vm8, %v853_v23  ;;  %955 = vperm.xlu2 %1451, %v1479_v18  }
 0x43b   : > { %v661_v43 = vpop.permute.xlu1 %660 }
 0x43c   : > { %v668_v44 = vmul.f32 %v661_v43, %v656_v40  ;;  %v657_v40 = vld [vmem:[#allocation4 + $0x8] sm:$0xf] }
 0x43e   : > { %v707_v46 = vadd.f32 %v1721_v59, %v668_v44  ;;  %1011 = vperm.xlu0 %1450, %v1007_v45   ;;  %v993_v59 = vpop.f32.mrf.mxu1 }
 0x43f   : > { %v1050_v38 = vld [vmem:[#allocation4 + $0x18] sm:$0xf] }
 0x440   : > { %709 = vst.msk [vmem:[#allocation4] sm:$0xff] %vm472_vm2, %v707_v46  ;;  %1016 = vperm.xlu2 %1451, %v1008_v47  }
 0x446   : > { %665 = vperm.xlu0 %1450, %v1782_v35  }
 0x482   : > { %v1805_v48 = vpop.permute.xlu2 %1099 }
 0x483   : > { %v1118_v14 = vand.u32 2147483648, %v1805_v48  ;;  %vm1112_vm0 = vweird.f32 %v1805_v48  ;;  %v1116_v18 = vand.u32 2147483647, %v1805_v48 }
 0x485   : > { %v1119_v25 = vor.u32 1.1754944e-38, %v1118_v14  ;;  %vm1117_vm6 = vcmp.eq.f32.partialorder %v1116_v18, 8.507059e+37  ;;  %v1198_v18 = vld [vmem:[%s1868_s8] sm:$0xff] }
 0x48a   : > { %v1061_v51 = vpop.permute.xlu2 %1060 }
 0x48b   : > { %1480 = vrcp.f32 %v1061_v51  ;;  %v1089_v62 = vand.u32 2147483648, %v1061_v51  ;;  %v1087_v63 = vand.u32 2147483647, %v1061_v51  ;;  %vm1083_vm10 = vweird.f32 %v1061_v51 }
 0x48c   : > { %1482 = vrcp.f32 %v1805_v48 }
 0x48d   : > { %v1090_v35 = vor.u32 1.1754944e-38, %v1089_v62  ;;  %vm1088_vm12 = vcmp.eq.f32.partialorder %v1087_v63, 8.507059e+37 }
 0x491   : > { %v1481_v53 = vpop.eup %1480 }
 0x492   : > { %v1079_v54 = vmul.f32 %v1481_v53, %v1061_v51  ;;  %v956_v55 = vpop.permute.xlu2 %955  ;;  %v1483_v58 = vpop.eup %1482  ;;  %vm1084_vm9 = vweird.f32 %v1481_v53 }
 0x493   : > { %v959_v56 = vmul.f32 %v956_v55, %v947_v52  ;;  %v1108_v2 = vmul.f32 %v1483_v58, %v1805_v48  ;;  %vm1085_vm11 = vmor %vm1083_vm10, %vm1084_vm9  ;;  %vm1113_vm14 = vweird.f32 %v1483_v58 }
 0x494   : > { %v1080_v57 = vsub.f32 1.0, %v1079_v54  ;;  %vm1114_vm5 = vmor %vm1112_vm0, %vm1113_vm14  ;;  %v1158_v54 = vld [vmem:[%s1866_s6] sm:$0xff]  ;;  %vm1155_vm0 = vcmask 80896  }
 0x495   : > { %v997_v49 = vadd.f32 %v993_v59, %v959_v56  ;;  %v1109_v41 = vsub.f32 1.0, %v1108_v2 }
 0x496   : > { %v1081_v61 = vmul.f32 %v1481_v53, %v1080_v57 }
 0x497   : > { %999 = vst.msk [vmem:[#allocation4 + $0x28] sm:$0xf] %vm474_vm8, %v997_v49  ;;  %v1110_v7 = vmul.f32 %v1483_v58, %v1109_v41 }
 0x498   : > { %v1056_v0 = vpop.permute.xlu0 %1055  ;;  %v1082_v1 = vadd.f32 %v1481_v53, %v1081_v61 }
 0x499   : > { %1484 = vrcp.f32 %v1056_v0  ;;  %v1074_v10 = vand.u32 2147483648, %v1056_v0  ;;  %v1072_v12 = vand.u32 2147483647, %v1056_v0  ;;  %v1111_v13 = vadd.f32 %v1483_v58, %v1110_v7 }
 0x49a   : > { %v1086_v37 = vsel %vm1085_vm11, %v1481_v53, %v1082_v1  ;;  %vm1068_vm15 = vweird.f32 %v1056_v0  ;;  %v1159_v53 = vld [vmem:[%s1866_s6 + $0x8] sm:$0x7f] }
 0x49b   : > { %v1091_v39 = vsel %vm1088_vm12, %v1090_v35, %v1086_v37  ;;  %v1075_v17 = vor.u32 1.1754944e-38, %v1074_v10  ;;  %vm1073_vm4 = vcmp.eq.f32.partialorder %v1072_v12, 8.507059e+37  ;;  %v1115_v21 = vsel %vm1114_vm5, %v1483_v58, %v1111_v13  ;;  %v1005_v37 = vld [vmem:[#allocation4] sm:$0xff] }
 0x49c   : > { %v1092_v42 = vmul.f32 %v1091_v39, %v1050_v38  ;;  %v1120_v28 = vsel %vm1117_vm6, %v1119_v25, %v1115_v21  ;;  %vm1171_vm12 = vcmask 1046528   ;;  %v1455_v25 = vld [vmem:[%s1869_s9] ss:$0 sm:$0xff] }
 0x49d   : > { %1403 = vmatpush.msk.msra.mxu3 %vm1171_vm12, %v1159_v53 }
 0x49e   : > { %1141 = vrot.lane.b32.xlu0 %v1092_v42, %s1524_s25  ;;  %v1094_v48 = vld [vmem:[#allocation4 + $0x28] sm:$0xf] }
 0x49f   : > { %v1485_v4 = vpop.eup %1484  ;;  %1190 = vmatpush.msra.mxu3 %v1158_v54 }
 0x4a0   : > { %v1064_v5 = vmul.f32 %v1485_v4, %v1056_v0  ;;  %v951_v6 = vpop.permute.xlu0 %950  ;;  %vm1069_vm13 = vweird.f32 %v1485_v4 }
 0x4a1   : > { %v958_v8 = vmul.f32 %v951_v6, %v946_v3  ;;  %vm1070_vm3 = vmor %vm1068_vm15, %vm1069_vm13 }
 0x4a2   : > { %v1065_v9 = vsub.f32 1.0, %v1064_v5 }
 0x4a3   : > { %v996_v11 = vadd.f32 %v990_v50, %v958_v8 }
 0x4a4   : > { %v1066_v34 = vmul.f32 %v1485_v4, %v1065_v9 }
 0x4a5   : > { %998 = vst.msk [vmem:[#allocation4 + $0x20] sm:$0xff] %vm472_vm2, %v996_v11 }
 0x4a6   : > { %v1067_v16 = vadd.f32 %v1485_v4, %v1066_v34 }
 0x4a8   : > { %v1105_v22 = vpop.permute.xlu0 %1104  ;;  %v1071_v24 = vsel %vm1070_vm3, %v1485_v4, %v1067_v16  ;;  %vm1164_vm3 = vcmask 121856  }
 0x4a9   : > { %1486 = vrcp.f32 %v1105_v22  ;;  %v1076_v19 = vsel %vm1073_vm4, %v1075_v17, %v1071_v24  ;;  %v1133_v36 = vand.u32 2147483648, %v1105_v22  ;;  %v1131_v23 = vand.u32 2147483647, %v1105_v22  ;;  %v1199_v17 = vld [vmem:[%s1868_s8 + $0x8] sm:$0x7f] }
 0x4aa   : > { %v1077_v26 = vmul.f32 %v1076_v19, %v1049_v15  ;;  %vm1127_vm9 = vweird.f32 %v1105_v22  ;;  %1406 = vmatpush.msk.msra.mxu2 %vm1171_vm12, %v1199_v17 }
 0x4ab   : > { %v1134_v44 = vor.u32 1.1754944e-38, %v1133_v36  ;;  %vm1132_vm11 = vcmp.eq.f32.partialorder %v1131_v23, 8.507059e+37 }
 0x4ac   : > { %1139 = vrot.lane.b32.xlu1 %v1077_v26, %s1524_s25  ;;  %v1093_v27 = vld [vmem:[#allocation4 + $0x20] sm:$0xff]  ;;  %1228 = vmatpush.msra.mxu2 %v1198_v18 }
 0x4ad   : > { %v1121_v29 = vmul.f32 %v1120_v28, %v1093_v27 }
 0x4af   : > { %v1487_v30 = vpop.eup %1486  ;;  %1147 = vrot.lane.b32.xlu2 %v1121_v29, %s1525_s26 }
 0x4b0   : > { %v1123_v31 = vmul.f32 %v1487_v30, %v1105_v22  ;;  %v1012_v32 = vpop.permute.xlu0 %1011  ;;  %vm1128_vm7 = vweird.f32 %v1487_v30  ;;  %v1454_v22 = vld [vmem:[%s1867_s7] ss:$0 sm:$0xff] }
 0x4b1   : > { %vm1129_vm10 = vmor %vm1127_vm9, %vm1128_vm7  ;;  %1488 = vrcp.f32 %v1012_v32  ;;  %v1030_v58 = vand.u32 2147483648, %v1012_v32  ;;  %vm1024_vm13 = vweird.f32 %v1012_v32  ;;  %v1028_v62 = vand.u32 2147483647, %v1012_v32 }
 0x4b2   : > { %v1124_v33 = vsub.f32 1.0, %v1123_v31 }
 0x4b3   : > { %v1031_v1 = vor.u32 1.1754944e-38, %v1030_v58  ;;  %vm1029_vm15 = vcmp.eq.f32.partialorder %v1028_v62, 8.507059e+37 }
 0x4b4   : > { %v1125_v20 = vmul.f32 %v1487_v30, %v1124_v33 }
 0x4b6   : > { %v1126_v43 = vadd.f32 %v1487_v30, %v1125_v20 }
 0x4b7   : > { %v1489_v55 = vpop.eup %1488 }
 0x4b8   : > { %v666_v45 = vpop.permute.xlu0 %665  ;;  %v1130_v46 = vsel %vm1129_vm10, %v1487_v30, %v1126_v43  ;;  %v1020_v56 = vmul.f32 %v1489_v55, %v1012_v32 }
 0x4b9   : > { %v669_v47 = vmul.f32 %v666_v45, %v657_v40  ;;  %v1135_v50 = vsel %vm1132_vm11, %v1134_v44, %v1130_v46 }
 0x4ba   : > { %v1136_v51 = vmul.f32 %v1135_v50, %v1094_v48  ;;  %v1021_v59 = vsub.f32 1.0, %v1020_v56 }
 0x4bb   : > { %v708_v52 = vadd.f32 %v1723_v60, %v669_v47  ;;  %v1017_v60 = vpop.permute.xlu2 %1016 }
 0x4bc   : > { %1149 = vrot.lane.b32.xlu1 %v1136_v51, %s1525_s26  ;;  %1490 = vrcp.f32 %v1017_v60  ;;  %v1022_v57 = vmul.f32 %v1489_v55, %v1021_v59  ;;  %v1045_v6 = vand.u32 2147483648, %v1017_v60  ;;  %vm1039_vm5 = vweird.f32 %v1017_v60  ;;  %s452_s26 = scalar_lea.vmem %s1870_s10, %s1411_s21 }
 0x4bd   : > { %711 = vst.msk [vmem:[#allocation4 + $0x8] sm:$0xf] %vm474_vm8, %v708_v52  ;;  %vm1025_vm8 = vweird.f32 %v1489_v55  ;;  %v1043_v7 = vand.u32 2147483647, %v1017_v60 }
 0x4be   : > { %v1023_v49 = vadd.f32 %v1489_v55, %v1022_v57  ;;  %vm1026_vm14 = vmor %vm1024_vm13, %vm1025_vm8  ;;  %v1046_v9 = vor.u32 1.1754944e-38, %v1045_v6 }
 0x4bf   : > { %vm1044_vm7 = vcmp.eq.f32.partialorder %v1043_v7, 8.507059e+37 }
 0x4c0   : > { %v1027_v63 = vsel %vm1026_vm14, %v1489_v55, %v1023_v49 }
 0x4c1   : > { %v1032_v2 = vsel %vm1029_vm15, %v1031_v1, %v1027_v63 }
 0x4c2   : > { %v1491_v61 = vpop.eup %1490  ;;  %v1033_v38 = vmul.f32 %v1032_v2, %v1005_v37 }
 0x4c3   : > { %v1035_v0 = vmul.f32 %v1491_v61, %v1017_v60  ;;  %vm1040_vm4 = vweird.f32 %v1491_v61 }
 0x4c4   : > { %vm1041_vm6 = vmor %vm1039_vm5, %vm1040_vm4  ;;  %v1006_v10 = vld [vmem:[#allocation4 + $0x8] sm:$0xf] }
 0x4c5   : > { %v1036_v35 = vsub.f32 1.0, %v1035_v0 }
 0x4c7   : > { %v1037_v3 = vmul.f32 %v1491_v61, %v1036_v35 }
 0x4c9   : > { %v1038_v5 = vadd.f32 %v1491_v61, %v1037_v3 }
 0x4cb   : > { %v1042_v8 = vsel %vm1041_vm6, %v1491_v61, %v1038_v5 }
 0x4cc   : > { %v1047_v11 = vsel %vm1044_vm7, %v1046_v9, %v1042_v8 }
 0x4cd   : > { %v1048_v12 = vmul.f32 %v1047_v11, %v1006_v10 }
 0x509   : > { %v1148_v41 = vpop.permute.xlu2 %1147 }
 0x510   : > { %v1142_v34 = vpop.permute.xlu0 %1141 }
 0x511   : > { %v1154_v13 = vsel %vm472_vm2, %v1048_v12, %v1142_v34 }
 0x51e   : > { %v1140_v39 = vpop.permute.xlu1 %1139 }
 0x51f   : > { %v1153_v42 = vsel %vm472_vm2, %v1033_v38, %v1140_v39  ;;  %vm1237_vm2 = vcmask 363520  }
 0x520   : > { %v1156_v4 = vsel %vm1155_vm0, %v1153_v42, %v1148_v41 }
 0x521   : > { %1404 = vmatmul.msk.f32.vlgmr.msra.gmra.mxu3 %vm1164_vm3, %v1156_v4 }
 0x52e   : > { %v1150_v14 = vpop.permute.xlu1 %1149 }
 0x52f   : > { %v1157_v16 = vsel %vm1155_vm0, %v1154_v13, %v1150_v14 }
 0x530   : > { %1405 = vmatmul.msk.f32.gmra.mxu3 %vm1164_vm3, %v1157_v16 }
 0x5a4   : > { %v1192_v24 = vpop.f32.mrf.mxu3 }
 0x5a5   : > { %v1193_v15 = vadd.f32 %v1454_v22, %v1192_v24 }
 0x5a7   : > { %1407 = vmatmul.msk.f32.vlgmr.msra.gmra.mxu2 %vm1164_vm3, %v1193_v15 }
 0x5b3   : > { %v1195_v19 = vpop.f32.mrf.mxu3 }
 0x5b4   : > { %v1196_v21 = vadd.f32 %v1454_v22, %v1195_v19 }
 0x5b6   : > { %1408 = vmatmul.msk.f32.gmra.mxu2 %vm1164_vm3, %v1196_v21 }
 0x62a   : > { %v1230_v26 = vpop.f32.mrf.mxu2 }
 0x62b   : > { %v1231_v27 = vadd.f32 %v1455_v25, %v1230_v26 }
 0x62d   : > { %1236 = vst.msk [vmem:[%s452_s26] sm:$0xff] %vm492_vm1, %v1231_v27 }
 0x639   : > { %v1233_v28 = vpop.f32.mrf.mxu2 }
 0x63a   : > { %v1234_v29 = vadd.f32 %v1455_v25, %v1233_v28 }
 0x63c   : > { %1238 = vst.msk [vmem:[%s452_s26 + $0x8] sm:$0xf] %vm1237_vm2, %v1234_v29 }
 0x63d PF: > { %s20_s15 = sadd.s32 1, %s1514_s15   ;;  %s1871_s13 = smov %s1510_s14 }
 0x63e   : > { %p17_p5 = scmp.ge.s32.totalorder %s20_s15, 5   ;;  %s1872_s14 = smov %s1874_s16 }
 0x640   :  { %19 = sbr.rel (!%p17_p5) target bundleno = 2 (0x2), region = 113 }

// kernel: dam_forward.3
= control target key start
LH: loop header
LB: loop body
LE: loop exit
PB: predicated region body
PF: predicated region fallthrough
CT: control target
= control target key end

     0   :  { %s1925_s9 = smov 113   ;;  %v2904_v6 = vlaneseq  ;;  %v1926_v21 = vmov 0   ;;  %vm130_vm7 = vcmask 1040384   ;;  %vm120_vm8 = vcmask 1046528   ;;  %s1928_s22 = smov 98   ;;  %s2887_s0 = inlined_call_operand.vmem [shape: f32[3,12,45], index: 0, kind: input, shape index: {}]   ;;  %s2888_s1 = inlined_call_operand.vmem [shape: f32[15,60], index: 1, kind: input, shape index: {}]   ;;  %s2889_s2 = inlined_call_operand.vmem [shape: f32[1,60], index: 2, kind: input, shape index: {}]   ;;  %s2890_s3 = inlined_call_operand.vmem [shape: f32[60,8], index: 3, kind: input, shape index: {}]   ;;  %s2891_s4 = inlined_call_operand.vmem [shape: f32[24,36], index: 4, kind: input, shape index: {}]   ;;  %s2892_s5 = inlined_call_operand.vmem [shape: f32[4,60], index: 5, kind: input, shape index: {}]   ;;  %s2893_s6 = inlined_call_operand.vmem [shape: f32[60,15], index: 6, kind: input, shape index: {}]   ;;  %s2894_s7 = inlined_call_operand.vmem [shape: f32[1,45], index: 7, kind: input, shape index: {}]   ;;  %s2895_s8 = inlined_call_operand.vmem [shape: f32[12,45], index: 8, kind: output, shape index: {}]  }
   0x1   :  { %v1990_v0 = vld [vmem:[%s2887_s0] sm:$0xff]  ;;  %v1995_v1 = vld [vmem:[%s2887_s0 + $0x10] sm:$0xff]  ;;  %v2008_v3 = vld [vmem:[%s2887_s0 + $0x8] sm:$0xf]  ;;  %vm137_vm9 = vcmask 1044480   ;;  %vm2907_vm14 = vcmask 1045504  }
   0x2   :  { %104 = vrot.lane.b32.xlu0 %v1990_v0, %s1925_s9  ;;  %510 = vrot.lane.b32.xlu1 %v1995_v1, %s1925_s9  ;;  %v2002_v2 = vld [vmem:[%s2887_s0 + $0x20] sm:$0xff]  ;;  %v2013_v4 = vld [vmem:[%s2887_s0 + $0x18] sm:$0xf]  ;;  %v30_v7 = vshrl.u32 %v2904_v6, 7  ;;  %v131_v50 = vrot.slane %v1990_v0, 7  ;;  %v132_v51 = vrot.slane %v2008_v3, 7 }
   0x3   :  { %847 = vrot.lane.b32.xlu2 %v2002_v2, %s1925_s9  ;;  %v2018_v5 = vld [vmem:[%s2887_s0 + $0x28] sm:$0xf]  ;;  %v2027_v53 = vrot.slane %v1990_v0, 1  ;;  %v122_v54 = vrot.slane %v2008_v3, 1  ;;  %v135_v55 = vrot.slane %v1990_v0, 3  ;;  %v156_v61 = vrot.slane %v1990_v0, 2 }
   0x4   :  { %v35_v8 = vand.u32 65535, %v30_v7  ;;  %v36_v9 = vshrl.u32 %v30_v7, 16  ;;  %v31_v14 = vadd.s32 8, %v30_v7  ;;  %v2034_v57 = vsel %vm130_vm7, %v131_v50, %v132_v51  ;;  %s1933_s12 = smov 4   ;;  %s1935_s15 = smov 112  }
   0x5   :  { %v123_v58 = vsel %vm120_vm8, %v2027_v53, %v122_v54  ;;  %v138_v59 = vsel %vm137_vm9, %v2034_v57, %v135_v55  ;;  %v157_v62 = vrot.slane %v2008_v3, 2  ;;  %v165_v63 = vrot.slane %v1990_v0, 4  ;;  %s1936_s16 = smov 104   ;;  %s1937_s17 = smov 100  }
   0x6   :  { %v39_v10 = vmul.u32 43690, %v35_v8  ;;  %v40_v11 = vmul.u32 43691, %v36_v9  ;;  %v38_v12 = vmul.u32 43691, %v35_v8  ;;  %v64_v16 = vand.u32 65535, %v31_v14  ;;  %s1938_s18 = smov 108   ;;  %s1939_s19 = smov 96  }
   0x7   :  { %v65_v18 = vshrl.u32 %v31_v14, 16  ;;  %v41_v20 = vmul.u32 43690, %v36_v9  ;;  %vm167_vm15 = vcmask 1043456   ;;  %s1941_s11 = smov 30  }
   0x8   :  { %v42_v13 = vshll.u32 %v39_v10, 16  ;;  %v44_v15 = vshll.u32 %v40_v11, 16  ;;  %v68_v19 = vmul.u32 43690, %v64_v16  ;;  %v67_v23 = vmul.u32 43691, %v64_v16 }
   0x9   :  { %v69_v24 = vmul.u32 43691, %v65_v18  ;;  %v43_v30 = vshrl.u32 %v39_v10, 16  ;;  %v70_v32 = vmul.u32 43690, %v65_v18  ;;  %v45_v34 = vshrl.u32 %v40_v11, 16 }
   0xa   :  { %106 = vrot.lane.b32.xlu0 %v2008_v3, %s1925_s9  ;;  %512 = vrot.lane.b32.xlu1 %v2013_v4, %s1925_s9  ;;  %vm46_vm0 = vc.u32 %v38_v12, %v42_v13  ;;  %v48_v17 = vadd.s32 %v42_v13, %v38_v12  ;;  %v71_v25 = vshll.u32 %v68_v19, 16  ;;  %v72_v39 = vshrl.u32 %v68_v19, 16 }
   0xb   :  { %849 = vrot.lane.b32.xlu2 %v2018_v5, %s1925_s9  ;;  %v47_v22 = vsel %vm46_vm0, 1, %v1926_v21  ;;  %v73_v28 = vshll.u32 %v69_v24, 16  ;;  %v74_v42 = vshrl.u32 %v69_v24, 16  ;;  %vm2901_vm0 = vcmask 121856   ;;  %s1930_s9 = smov 16  }
   0xc   :  { %vm50_vm1 = vc.u32 %v48_v17, %v44_v15  ;;  %v49_v26 = vadd.s32 %v47_v22, %v41_v20  ;;  %vm75_vm2 = vc.u32 %v67_v23, %v71_v25  ;;  %v77_v29 = vadd.s32 %v71_v25, %v67_v23 }
   0xd   :  { %v51_v27 = vsel %vm50_vm1, 1, %v1926_v21  ;;  %v76_v33 = vsel %vm75_vm2, 1, %v1926_v21  ;;  %v126_v10 = vrot.slane %v1990_v0, 5  ;;  %v158_v13 = vsel %vm2907_vm14, %v156_v61, %v157_v62 }
   0xe   :  { %v53_v31 = vadd.s32 %v51_v27, %v49_v26  ;;  %vm79_vm3 = vc.u32 %v77_v29, %v73_v28  ;;  %v78_v36 = vadd.s32 %v76_v33, %v70_v32  ;;  %vm128_vm2 = vcmask 1042432  }
   0xf   :  { %v80_v37 = vsel %vm79_vm3, 1, %v1926_v21  ;;  %v129_v18 = vsel %vm128_vm2, %v122_v54, %v126_v10  ;;  %v161_v20 = vrot.slane %v1990_v0, 6  ;;  %v185_v21 = vrot.slane %v2008_v3, 3 }
  0x10   :  { %v54_v35 = vadd.s32 %v53_v31, %v43_v30  ;;  %v82_v40 = vadd.s32 %v80_v37, %v78_v36  ;;  %v191_v23 = vrot.slane %v2008_v3, 5  ;;  %v210_v37 = vrot.slane %v2008_v3, 4 }
  0x11   :  { %v190_v28 = vsel %vm130_vm7, %v185_v21, %v131_v50  ;;  %v186_v29 = vsel %vm137_vm9, %v135_v55, %v185_v21 }
  0x12   :  { %v55_v38 = vadd.s32 %v54_v35, %v45_v34  ;;  %v83_v43 = vadd.s32 %v82_v40, %v72_v39  ;;  %v192_v33 = vsel %vm128_vm2, %v126_v10, %v191_v23  ;;  %v536_v10 = vrot.slane %v1995_v1, 3 }
  0x14   :  { %v56_v41 = vshrl.u32 %v55_v38, 2  ;;  %v84_v45 = vadd.s32 %v83_v43, %v74_v42  ;;  %v213_v38 = vrot.slane %v2008_v3, 6  ;;  %v211_v43 = vsel %vm167_vm15, %v165_v63, %v210_v37 }
  0x16   :  { %v57_v44 = vmul.u32 6, %v56_v41  ;;  %v85_v47 = vshrl.u32 %v84_v45, 2 }
  0x18   :  { %v58_v46 = vsub.s32 %v30_v7, %v57_v44  ;;  %v86_v48 = vmul.u32 6, %v85_v47  ;;  %v233_v44 = vsel %vm120_vm8, %v192_v33, %v2027_v53 }
  0x1a   :  { %vm90_vm4 = vcmp.ne.s32.totalorder %v58_v46, 0  ;;  %vm92_vm5 = vcmp.lt.s32.totalorder %v58_v46, 0  ;;  %v96_v49 = vadd.s32 6, %v58_v46  ;;  %v87_v52 = vsub.s32 %v31_v14, %v86_v48 }
  0x1b   :  { %vm94_vm6 = vmand %vm92_vm5, %vm90_vm4  ;;  %v168_v14 = vsel %vm167_vm15, %v2008_v3, %v165_v63  ;;  %vm2913_vm4 = vcmask 1041408   ;;  %vm116_vm5 = vcmask 117760  }
  0x1c   :  { %v2031_v56 = vsel %vm94_vm6, %v96_v49, %v58_v46  ;;  %vm91_vm10 = vcmp.ne.s32.totalorder %v87_v52, 0  ;;  %vm93_vm11 = vcmp.lt.s32.totalorder %v87_v52, 0  ;;  %v97_v60 = vadd.s32 6, %v87_v52 }
  0x1d   :  { %vm2908_vm12 = vcmp.lt.s32.totalorder %v2031_v56, 5  ;;  %vm95_vm13 = vmand %vm93_vm11, %vm91_vm10  ;;  %vm2900_vm1 = vcmp.lt.s32.totalorder %v2031_v56, 4  ;;  %v164_v27 = vsel %vm2913_vm4, %v157_v62, %v161_v20  ;;  %vm2896_vm11 = vcmp.lt.s32.totalorder %v2031_v56, 3 }
  0x1e   :  { %v2046_v7 = vsel %vm2908_vm12, %v123_v58, %v138_v59  ;;  %v2051_v9 = vsel %vm95_vm13, %v97_v60, %v87_v52  ;;  %v2066_v17 = vsel %vm2900_vm1, %v158_v13, %v168_v14  ;;  %v2104_v36 = vsel %vm2896_vm11, %v186_v29, %v129_v18 }
  0x1f   :  { %vm2899_vm3 = vcmp.lt.s32.totalorder %v2051_v9, 5  ;;  %vm2910_vm6 = vcmp.lt.s32.totalorder %v2051_v9, 4  ;;  %vm2897_vm10 = vcmp.lt.s32.totalorder %v2051_v9, 3  ;;  %vm2898_vm13 = vcmp.lt.s32.totalorder %v2031_v56, 2 }
  0x20   :  { %v2071_v19 = vsel %vm2899_vm3, %v129_v18, %v135_v55  ;;  %v2096_v34 = vsel %vm2910_vm6, %v164_v27, %v165_v63  ;;  %v2100_v35 = vsel %vm2897_vm10, %v190_v28, %v192_v33  ;;  %vm2902_vm11 = vcmp.lt.s32.totalorder %v2031_v56, 1 }
  0x21   :  { %vm2909_vm10 = vcmp.lt.s32.totalorder %v2051_v9, 2  ;;  %v2128_v48 = vsel %vm2898_vm13, %v211_v43, %v164_v27  ;;  %v2132_v49 = vsel %vm2902_vm11, %v233_v44, %v190_v28  ;;  %vm235_vm13 = vcmp.lt.s32.totalorder %v2051_v9, 1 }
  0x22   :  { %v532_v58 = vrot.slane %v1995_v1, 7  ;;  %v533_v59 = vrot.slane %v2013_v4, 7  ;;  %v2156_v61 = vsel %vm235_vm13, %v2027_v53, %v2034_v57  ;;  %v2160_v63 = vrot.slane %v1995_v1, 1 }
  0x23   :  { %v550_v53 = vrot.slane %v2013_v4, 2  ;;  %v557_v57 = vrot.slane %v1995_v1, 4 }
  0x24   :  { %v2172_v14 = vsel %vm130_vm7, %v532_v58, %v533_v59 }
  0x25   :  { %v538_v21 = vsel %vm137_vm9, %v2172_v14, %v536_v10  ;;  %v559_v23 = vsel %vm167_vm15, %v2013_v4, %v557_v57 }
  0x74   :  { %v2048_v8 = vpop.permute.xlu0 %104  ;;  %v2114_v42 = vpop.permute.xlu1 %510 }
  0x75   :  { %v110_v11 = vmul.f32 %v2048_v8, %v1990_v0  ;;  %v147_v12 = vmul.f32 %v2046_v7, %v2048_v8  ;;  %v177_v22 = vmul.f32 %v2066_v17, %v2048_v8  ;;  %v202_v41 = vmul.f32 %v2104_v36, %v2048_v8 }
  0x76   :  { %v224_v51 = vmul.f32 %v2128_v48, %v2048_v8  ;;  %v242_v52 = vmul.f32 %v2132_v49, %v2048_v8  ;;  %v525_v8 = vrot.slane %v2013_v4, 1  ;;  %v516_v13 = vmul.f32 %v1995_v1, %v2114_v42 }
  0x77   :  { %v113_v15 = vsel %vm2901_vm0, %v110_v11, 0.0  ;;  %v149_v16 = vsel %vm2901_vm0, %v147_v12, 0.0  ;;  %v179_v31 = vsel %vm2901_vm0, %v177_v22, 0.0  ;;  %v204_v47 = vsel %vm2901_vm0, %v202_v41, 0.0 }
  0x78   :  { %114 = vadd.xlane.f32.xlu0 %v113_v15  ;;  %150 = vadd.xlane.f32.xlu2 %v149_v16  ;;  %v244_v60 = vsel %vm2901_vm0, %v242_v52, 0.0  ;;  %v549_v12 = vrot.slane %v1995_v1, 2  ;;  %v529_v15 = vrot.slane %v1995_v1, 5  ;;  %v526_v18 = vsel %vm120_vm8, %v2160_v63, %v525_v8 }
  0x79   :  { %v2194_v28 = vsel %vm2908_vm12, %v526_v18, %v538_v21  ;;  %v589_v52 = vrot.slane %v2013_v4, 4  ;;  %v870_v21 = vrot.slane %v2018_v5, 7 }
  0x7a   :  { %v551_v22 = vsel %vm2907_vm14, %v549_v12, %v550_v53  ;;  %v541_v33 = vmul.f32 %v2194_v28, %v2114_v42 }
  0x7b   :  { %v2198_v29 = vsel %vm2900_vm1, %v551_v22, %v559_v23  ;;  %vm2915_vm1 = vcmp.lt.s32.totalorder %v2031_v56, 3 }
  0x7c   :  { %v2078_v24 = vpop.permute.xlu0 %106  ;;  %v2146_v55 = vpop.permute.xlu1 %512  ;;  %v562_v37 = vmul.f32 %v2198_v29, %v2114_v42  ;;  %v543_v43 = vsel %vm2901_vm0, %v541_v33, 0.0  ;;  %v894_v33 = vrot.slane %v2002_v2, 4 }
  0x7d   :  { %v111_v25 = vmul.f32 %v2078_v24, %v2008_v3  ;;  %v148_v26 = vmul.f32 %v2071_v19, %v2078_v24  ;;  %v178_v39 = vmul.f32 %v2096_v34, %v2078_v24  ;;  %v203_v40 = vmul.f32 %v2100_v35, %v2078_v24 }
  0x7e   :  { %v214_v3 = vsel %vm2913_vm4, %v161_v20, %v213_v38  ;;  %v517_v11 = vmul.f32 %v2013_v4, %v2146_v55  ;;  %v243_v16 = vmul.f32 %v2156_v61, %v2078_v24  ;;  %v576_v38 = vrot.slane %v2013_v4, 5 }
  0x7f   :  { %v117_v30 = vsel %vm116_vm5, %v111_v25, 0.0  ;;  %v152_v32 = vsel %vm116_vm5, %v148_v26, 0.0  ;;  %v182_v45 = vsel %vm116_vm5, %v178_v39, 0.0  ;;  %v207_v46 = vsel %vm116_vm5, %v203_v40, 0.0 }
  0x80   :  { %118 = vadd.xlane.f32.xlu1 %v117_v30  ;;  %180 = vadd.xlane.f32.xlu0 %v179_v31  ;;  %v2137_v50 = vsel %vm2909_vm10, %v1990_v0, %v214_v3  ;;  %v226_v0 = vsel %vm2901_vm0, %v224_v51, 0.0  ;;  %v521_v20 = vsel %vm116_vm5, %v517_v11, 0.0  ;;  %v518_v25 = vsel %vm2901_vm0, %v516_v13, 0.0 }
  0x81   :  { %153 = vadd.xlane.f32.xlu2 %v152_v32  ;;  %v225_v54 = vmul.f32 %v2137_v50, %v2078_v24  ;;  %v531_v26 = vsel %vm128_vm2, %v525_v8, %v529_v15  ;;  %v247_v27 = vsel %vm116_vm5, %v243_v16, 0.0  ;;  %v554_v31 = vrot.slane %v1995_v1, 6  ;;  %v2239_v8 = vpop.permute.xlu2 %847 }
  0x82   :  { %v2190_v24 = vsel %vm2899_vm3, %v531_v26, %v536_v10  ;;  %v570_v32 = vrot.slane %v2013_v4, 3  ;;  %v564_v44 = vsel %vm2901_vm0, %v562_v37, 0.0  ;;  %vm2914_vm3 = vcmp.lt.s32.totalorder %v2051_v9, 3 }
  0x83   :  { %v229_v62 = vsel %vm116_vm5, %v225_v54, 0.0  ;;  %v542_v30 = vmul.f32 %v2190_v24, %v2146_v55  ;;  %v556_v40 = vsel %vm2913_vm4, %v550_v53, %v554_v31  ;;  %v592_v54 = vrot.slane %v2013_v4, 6 }
  0x84   :  { %v571_v41 = vsel %vm137_vm9, %v536_v10, %v570_v32  ;;  %v575_v3 = vsel %vm130_vm7, %v570_v32, %v532_v58  ;;  %v887_v32 = vrot.slane %v2018_v5, 2 }
  0x85   :  { %v546_v39 = vsel %vm116_vm5, %v542_v30, 0.0  ;;  %v2226_v51 = vsel %vm2915_vm1, %v571_v41, %v531_v26  ;;  %v593_v10 = vsel %vm2913_vm4, %v554_v31, %v592_v54  ;;  %vm2916_vm1 = vcmp.lt.s32.totalorder %v2031_v56, 2 }
  0x86   :  { %v2256_v13 = vsel %vm2909_vm10, %v1995_v1, %v593_v10  ;;  %v2278_v26 = vrot.slane %v2002_v2, 1  ;;  %v873_v30 = vrot.slane %v2002_v2, 3  ;;  %v886_v31 = vrot.slane %v2002_v2, 2 }
  0x87   :  { %v598_v18 = vmul.f32 %v2256_v13, %v2146_v55 }
  0x88   :  { %183 = vadd.xlane.f32.xlu1 %v182_v45  ;;  %208 = vadd.xlane.f32.xlu0 %v207_v46  ;;  %v577_v45 = vsel %vm128_vm2, %v529_v15, %v576_v38  ;;  %v2218_v46 = vsel %vm2910_vm6, %v556_v40, %v557_v57  ;;  %v853_v38 = vmul.f32 %v2002_v2, %v2239_v8 }
  0x89   :  { %205 = vadd.xlane.f32.xlu2 %v204_v47  ;;  %v2222_v47 = vsel %vm2914_vm3, %v575_v3, %v577_v45  ;;  %v563_v58 = vmul.f32 %v2218_v46, %v2146_v55  ;;  %v602_v1 = vsel %vm116_vm5, %v598_v18, 0.0  ;;  %vm2917_vm3 = vcmp.lt.s32.totalorder %v2031_v56, 4 }
  0x8a   :  { %v582_v59 = vmul.f32 %v2222_v47, %v2146_v55 }
  0x8b   :  { %v567_v4 = vsel %vm116_vm5, %v563_v58, 0.0 }
  0x8c   :  { %v586_v11 = vsel %vm116_vm5, %v582_v59, 0.0 }
  0x90   :  { %227 = vadd.xlane.f32.xlu1 %v226_v0  ;;  %245 = vadd.xlane.f32.xlu0 %v244_v60  ;;  %v581_v0 = vmul.f32 %v2226_v51, %v2114_v42  ;;  %v590_v60 = vsel %vm167_vm15, %v557_v57, %v589_v52 }
  0x91   :  { %230 = vadd.xlane.f32.xlu2 %v229_v62  ;;  %v606_v62 = vsel %vm120_vm8, %v577_v45, %v2160_v63  ;;  %v2247_v53 = vsel %vm2916_vm1, %v590_v60, %v556_v40  ;;  %v855_v45 = vsel %vm2901_vm0, %v853_v38, 0.0  ;;  %vm2918_vm1 = vcmp.lt.s32.totalorder %v2051_v9, 5 }
  0x92   :  { %v583_v12 = vsel %vm2901_vm0, %v581_v0, 0.0  ;;  %v2251_v57 = vsel %vm2902_vm11, %v606_v62, %v575_v3  ;;  %v597_v15 = vmul.f32 %v2247_v53, %v2114_v42  ;;  %v891_v0 = vrot.slane %v2002_v2, 6 }
  0x93   :  { %v609_v16 = vmul.f32 %v2251_v57, %v2114_v42  ;;  %v2275_v42 = vsel %vm235_vm13, %v2160_v63, %v2172_v14  ;;  %v907_v60 = vrot.slane %v2018_v5, 3 }
  0x94   :  { %v599_v22 = vsel %vm2901_vm0, %v597_v15, 0.0  ;;  %v610_v63 = vmul.f32 %v2275_v42, %v2146_v55 }
  0x95   :  { %v611_v23 = vsel %vm2901_vm0, %v609_v16, 0.0  ;;  %v908_v15 = vsel %vm137_vm9, %v873_v30, %v907_v60 }
  0x96   :  { %v614_v55 = vsel %vm116_vm5, %v610_v63, 0.0 }
  0x98   :  { %248 = vadd.xlane.f32.xlu1 %v247_v27  ;;  %522 = vadd.xlane.f32.xlu0 %v521_v20  ;;  %v869_v20 = vrot.slane %v2002_v2, 7  ;;  %v862_v27 = vrot.slane %v2018_v5, 1 }
  0x99   :  { %519 = vadd.xlane.f32.xlu2 %v518_v25  ;;  %v2268_v25 = vpop.permute.xlu2 %849 }
  0x9a   :  { %v2286_v37 = vsel %vm130_vm7, %v869_v20, %v870_v21  ;;  %v854_v14 = vmul.f32 %v2018_v5, %v2268_v25  ;;  %v863_v40 = vsel %vm120_vm8, %v2278_v26, %v862_v27  ;;  %v912_v21 = vsel %vm130_vm7, %v907_v60, %v869_v20 }
  0x9b   :  { %v875_v41 = vsel %vm137_vm9, %v2286_v37, %v873_v30  ;;  %v926_v20 = vrot.slane %v2018_v5, 4 }
  0x9c   :  { %v858_v3 = vsel %vm116_vm5, %v854_v14, 0.0  ;;  %v2307_v52 = vsel %vm2908_vm12, %v863_v40, %v875_v41 }
  0x9d   :  { %v878_v62 = vmul.f32 %v2307_v52, %v2239_v8  ;;  %v927_v38 = vsel %vm167_vm15, %v894_v33, %v926_v20 }
  0x9f   :  { %v880_v16 = vsel %vm2901_vm0, %v878_v62, 0.0 }
  0xa0   :  { %544 = vadd.xlane.f32.xlu1 %v543_v43  ;;  %565 = vadd.xlane.f32.xlu0 %v564_v44  ;;  %v888_v43 = vsel %vm2907_vm14, %v886_v31, %v887_v32  ;;  %v896_v44 = vsel %vm167_vm15, %v2018_v5, %v894_v33  ;;  %v929_v31 = vrot.slane %v2018_v5, 6 }
  0xa1   :  { %547 = vadd.xlane.f32.xlu2 %v546_v39  ;;  %v866_v39 = vrot.slane %v2002_v2, 5  ;;  %v2311_v54 = vsel %vm2917_vm3, %v888_v43, %v896_v44  ;;  %vm2919_vm3 = vcmp.lt.s32.totalorder %v2051_v9, 3 }
  0xa2   :  { %v899_v10 = vmul.f32 %v2311_v54, %v2239_v8  ;;  %v930_v40 = vsel %vm2913_vm4, %v891_v0, %v929_v31 }
  0xa3   :  { %v868_v58 = vsel %vm128_vm2, %v862_v27, %v866_v39 }
  0xa4   :  { %v2316_v59 = vsel %vm2918_vm1, %v868_v58, %v873_v30  ;;  %v901_v18 = vsel %vm2901_vm0, %v899_v10, 0.0  ;;  %vm2920_vm1 = vcmp.lt.s32.totalorder %v2031_v56, 3 }
  0xa5   :  { %v2344_v30 = vsel %vm2920_vm1, %v908_v15, %v868_v58  ;;  %vm250_vm1 = vcmask 7168  }
  0xa6   :  { %2921 = vst [vmem:[#allocation2_spill] sm:$0xff] %v2344_v30  ;;  %v918_v14 = vmul.f32 %v2344_v30, %v2239_v8 }
  0xa8   :  { %568 = vadd.xlane.f32.xlu1 %v567_v4  ;;  %587 = vadd.xlane.f32.xlu0 %v586_v11  ;;  %v913_v4 = vrot.slane %v2018_v5, 5  ;;  %v879_v11 = vmul.f32 %v2316_v59, %v2268_v25  ;;  %v920_v43 = vsel %vm2901_vm0, %v918_v14, 0.0 }
  0xa9   :  { %584 = vadd.xlane.f32.xlu2 %v583_v12  ;;  %v893_v12 = vsel %vm2913_vm4, %v887_v32, %v891_v0 }
  0xb0   :  { %600 = vadd.xlane.f32.xlu1 %v599_v22  ;;  %612 = vadd.xlane.f32.xlu0 %v611_v23  ;;  %v914_v22 = vsel %vm128_vm2, %v866_v39, %v913_v4  ;;  %v883_v23 = vsel %vm116_vm5, %v879_v11, 0.0 }
  0xb1   :  { %603 = vadd.xlane.f32.xlu2 %v602_v1  ;;  %v2336_v1 = vsel %vm2910_vm6, %v893_v12, %v894_v33  ;;  %v2340_v27 = vsel %vm2919_vm3, %v912_v21, %v914_v22  ;;  %v943_v39 = vsel %vm120_vm8, %v914_v22, %v2278_v26  ;;  %vm2922_vm3 = vcmp.lt.s32.totalorder %v2031_v56, 2 }
  0xb2   :  { %v900_v32 = vmul.f32 %v2336_v1, %v2268_v25  ;;  %v919_v63 = vmul.f32 %v2340_v27, %v2268_v25  ;;  %v2363_v44 = vsel %vm2922_vm3, %v927_v38, %v893_v12  ;;  %v2367_v33 = vsel %vm2902_vm11, %v943_v39, %v912_v21 }
  0xb3   :  { %2923 = vst [vmem:[#allocation3_spill] sm:$0xff] %v2363_v44  ;;  %vm253_vm3 = vcmask 15360   ;;  %vm259_vm11 = vcmask 31744  }
  0xb4   :  { %v904_v41 = vsel %vm116_vm5, %v900_v32, 0.0  ;;  %v923_v5 = vsel %vm116_vm5, %v919_v63, 0.0  ;;  %2924 = vst [vmem:[#allocation4_spill] sm:$0xff] %v2367_v33 }
  0xb8   :  { %615 = vadd.xlane.f32.xlu1 %v614_v55  ;;  %859 = vadd.xlane.f32.xlu0 %v858_v3  ;;  %v2372_v55 = vsel %vm2909_vm10, %v2002_v2, %v930_v40  ;;  %v934_v3 = vmul.f32 %v2363_v44, %v2239_v8  ;;  %v2387_v2 = vsel %vm235_vm13, %v2278_v26, %v2286_v37 }
  0xb9   :  { %856 = vadd.xlane.f32.xlu2 %v855_v45  ;;  %v946_v45 = vmul.f32 %v2367_v33, %v2239_v8  ;;  %v935_v58 = vmul.f32 %v2372_v55, %v2268_v25  ;;  %2925 = vst [vmem:[#allocation5_spill] sm:$0xff] %v2387_v2  ;;  %v947_v8 = vmul.f32 %v2387_v2, %v2268_v25 }
  0xba   :  { %v936_v0 = vsel %vm2901_vm0, %v934_v3, 0.0 }
  0xbb   :  { %v948_v60 = vsel %vm2901_vm0, %v946_v45, 0.0  ;;  %v939_v62 = vsel %vm116_vm5, %v935_v58, 0.0  ;;  %v951_v10 = vsel %vm116_vm5, %v947_v8, 0.0  ;;  %vm256_vm0 = vcmask 23552  }
  0xbc   :  { %vm2903_vm5 = vcmask 39936  }
  0xc0   :  { %881 = vadd.xlane.f32.xlu1 %v880_v16  ;;  %902 = vadd.xlane.f32.xlu0 %v901_v18 }
  0xc1   :  { %884 = vadd.xlane.f32.xlu2 %v883_v23 }
  0xc8   :  { %905 = vadd.xlane.f32.xlu1 %v904_v41  ;;  %924 = vadd.xlane.f32.xlu0 %v923_v5 }
  0xc9   :  { %921 = vadd.xlane.f32.xlu2 %v920_v43 }
  0xd0   :  { %937 = vadd.xlane.f32.xlu1 %v936_v0  ;;  %949 = vadd.xlane.f32.xlu0 %v948_v60 }
  0xd1   :  { %940 = vadd.xlane.f32.xlu2 %v939_v62 }
  0xd8   :  { %952 = vadd.xlane.f32.xlu1 %v951_v10 }
  0xeb   :  { %v115_v4 = vpop.xlane.xlu0 %114  ;;  %v151_v11 = vpop.xlane.xlu2 %150 }
  0xec   :  { %v251_v26 = vsel %vm250_vm1, %v115_v4, %v151_v11 }
  0xf3   :  { %v119_v12 = vpop.xlane.xlu1 %118  ;;  %v181_v15 = vpop.xlane.xlu0 %180 }
  0xf4   :  { %v154_v16 = vpop.xlane.xlu2 %153  ;;  %v254_v25 = vsel %vm253_vm3, %v251_v26, %v181_v15 }
  0xf5   :  { %v252_v32 = vsel %vm250_vm1, %v119_v12, %v154_v16 }
  0xfb   :  { %v184_v18 = vpop.xlane.xlu1 %183  ;;  %v209_v21 = vpop.xlane.xlu0 %208 }
  0xfc   :  { %v206_v22 = vpop.xlane.xlu2 %205  ;;  %v255_v14 = vsel %vm253_vm3, %v252_v32, %v184_v18 }
  0xfd   :  { %v257_v31 = vsel %vm256_vm0, %v254_v25, %v206_v22  ;;  %v258_v39 = vsel %vm256_vm0, %v255_v14, %v209_v21 }
 0x103   :  { %v228_v37 = vpop.xlane.xlu1 %227  ;;  %v246_v23 = vpop.xlane.xlu0 %245 }
 0x104   :  { %v231_v20 = vpop.xlane.xlu2 %230  ;;  %v260_v63 = vsel %vm259_vm11, %v257_v31, %v228_v37 }
 0x105   :  { %v263_v38 = vsel %vm2903_vm5, %v260_v63, %v246_v23  ;;  %v261_v40 = vsel %vm259_vm11, %v258_v39, %v231_v20 }
 0x106   :  { %v272_v45 = vrot.slane %v263_v38, 5  ;;  %v275_v58 = vrot.slane %v263_v38, 7  ;;  %v291_v0 = vrot.slane %v263_v38, 6  ;;  %v267_v4 = vrot.slane %v263_v38, 1 }
 0x107   :  { %v279_v11 = vrot.slane %v263_v38, 3  ;;  %v294_v37 = vrot.slane %v263_v38, 4  ;;  %v286_v23 = vrot.slane %v263_v38, 2 }
 0x10b   :  { %v249_v41 = vpop.xlane.xlu1 %248  ;;  %v2401_v5 = vpop.xlane.xlu0 %522 }
 0x10c   :  { %v264_v43 = vsel %vm2903_vm5, %v261_v40, %v249_v41  ;;  %v520_v3 = vpop.xlane.xlu2 %519  ;;  %vm2926_vm5 = vcmp.lt.s32.totalorder %v2051_v9, 5 }
 0x10d   :  { %v268_v60 = vrot.slane %v264_v43, 1  ;;  %v276_v62 = vrot.slane %v264_v43, 7  ;;  %v287_v8 = vrot.slane %v264_v43, 2  ;;  %v301_v10 = vrot.slane %v264_v43, 3 }
 0x10e   :  { %v307_v12 = vrot.slane %v264_v43, 5  ;;  %v317_v21 = vrot.slane %v264_v43, 6  ;;  %v314_v39 = vrot.slane %v264_v43, 4 }
 0x10f   :  { %v274_v15 = vsel %vm128_vm2, %v268_v60, %v272_v45  ;;  %v277_v16 = vsel %vm130_vm7, %v275_v58, %v276_v62  ;;  %v293_v18 = vsel %vm2913_vm4, %v287_v8, %v291_v0  ;;  %v306_v20 = vsel %vm130_vm7, %v301_v10, %v275_v58 }
 0x110   :  { %v281_v22 = vsel %vm137_vm9, %v277_v16, %v279_v11  ;;  %v283_v26 = vsel %vm2926_vm5, %v274_v15, %v279_v11  ;;  %v308_v31 = vsel %vm128_vm2, %v272_v45, %v307_v12  ;;  %v298_v32 = vsel %vm2910_vm6, %v293_v18, %v294_v37 }
 0x111   :  { %v285_v25 = vadd.f32 %v283_v26, %v264_v43  ;;  %v269_v63 = vsel %vm120_vm8, %v267_v4, %v268_v60  ;;  %v288_v14 = vsel %vm2907_vm14, %v286_v23, %v287_v8  ;;  %v318_v6 = vsel %vm2913_vm4, %v291_v0, %v317_v21 }
 0x112   :  { %v282_v26 = vsel %vm2908_vm12, %v269_v63, %v281_v22  ;;  %vm2927_vm5 = vcmp.lt.s32.totalorder %v2051_v9, 3  ;;  %v296_v12 = vsel %vm167_vm15, %v264_v43, %v294_v37  ;;  %v302_v60 = vsel %vm137_vm9, %v279_v11, %v301_v10 }
 0x113   :  { %v545_v40 = vpop.xlane.xlu1 %544  ;;  %v566_v41 = vpop.xlane.xlu0 %565  ;;  %v300_v62 = vadd.f32 %v298_v32, %v285_v25  ;;  %v311_v45 = vsel %vm2927_vm5, %v306_v20, %v308_v31  ;;  %v284_v58 = vadd.f32 %v282_v26, %v263_v38  ;;  %vm2928_vm14 = vcmp.lt.s32.totalorder %v2031_v56, 4 }
 0x114   :  { %v548_v33 = vpop.xlane.xlu2 %547  ;;  %v297_v8 = vsel %vm2928_vm14, %v288_v14, %v296_v12  ;;  %v321_v23 = vsel %vm2909_vm10, %v263_v38, %v318_v6  ;;  %v315_v21 = vsel %vm167_vm15, %v294_v37, %v314_v39  ;;  %vm2929_vm12 = vcmp.lt.s32.totalorder %v2031_v56, 3 }
 0x115   :  { %v313_v44 = vadd.f32 %v311_v45, %v300_v62  ;;  %v299_v0 = vadd.f32 %v297_v8, %v284_v58  ;;  %v310_v25 = vsel %vm2929_vm12, %v302_v60, %v274_v15  ;;  %v327_v32 = vsel %vm235_vm13, %v267_v4, %v277_v16 }
 0x116   :  { %vm336_vm5 = vcmask 44032   ;;  %v325_v10 = vsel %vm120_vm8, %v308_v31, %v267_v4  ;;  %vm2930_vm14 = vcmp.lt.s32.totalorder %v2031_v56, 2  ;;  %vm2931_vm12 = vcmp.lt.s32.totalorder %v2031_v56, 1 }
 0x117   :  { %v323_v22 = vadd.f32 %v321_v23, %v313_v44  ;;  %v312_v43 = vadd.f32 %v310_v25, %v299_v0  ;;  %v320_v63 = vsel %vm2930_vm14, %v315_v21, %v293_v18  ;;  %v326_v15 = vsel %vm2931_vm12, %v325_v10, %v306_v20 }
 0x118   :  { %vm332_vm10 = vcmask 48128   ;;  %v617_v18 = vsel %vm250_vm1, %v520_v3, %v545_v40  ;;  %v618_v20 = vsel %vm250_vm1, %v2401_v5, %v548_v33  ;;  %vm2932_vm14 = vcmask 39936  }
 0x119   :  { %v2433_v11 = vadd.f32 %v327_v32, %v323_v22  ;;  %v322_v6 = vadd.f32 %v320_v63, %v312_v43  ;;  %v619_v62 = vsel %vm253_vm3, %v617_v18, %v566_v41  ;;  %vm2933_vm12 = vmmov %vm2932_vm14 }
 0x11b   :  { %v569_v38 = vpop.xlane.xlu1 %568  ;;  %v588_v14 = vpop.xlane.xlu0 %587  ;;  %v337_v44 = vsel %vm336_vm5, %v2433_v11, -inf  ;;  %v2441_v37 = vadd.f32 %v326_v15, %v322_v6 }
 0x11c   :  { %v585_v16 = vpop.xlane.xlu2 %584  ;;  %338 = vmax.xlane.f32.xlu0 %v337_v44  ;;  %v620_v12 = vsel %vm253_vm3, %v618_v20, %v569_v38 }
 0x11d   :  { %v333_v4 = vsel %vm332_vm10, %v2441_v37, -inf  ;;  %v621_v45 = vsel %vm256_vm0, %v619_v62, %v585_v16  ;;  %v622_v8 = vsel %vm256_vm0, %v620_v12, %v588_v14 }
 0x11e   :  { %334 = vmax.xlane.f32.xlu2 %v333_v4 }
 0x123   :  { %v601_v31 = vpop.xlane.xlu1 %600  ;;  %v613_v39 = vpop.xlane.xlu0 %612 }
 0x124   :  { %v604_v26 = vpop.xlane.xlu2 %603  ;;  %v623_v58 = vsel %vm259_vm11, %v621_v45, %v601_v31 }
 0x125   :  { %v625_v60 = vsel %vm2932_vm14, %v623_v58, %v613_v39  ;;  %v624_v3 = vsel %vm259_vm11, %v622_v8, %v604_v26  ;;  %vm2934_vm14 = vcmp.lt.s32.totalorder %v2051_v9, 5 }
 0x126   :  { %v634_v21 = vrot.slane %v625_v60, 5  ;;  %v637_v22 = vrot.slane %v625_v60, 7  ;;  %v653_v25 = vrot.slane %v625_v60, 6  ;;  %v629_v10 = vrot.slane %v625_v60, 1 }
 0x127   :  { %v641_v63 = vrot.slane %v625_v60, 3  ;;  %v656_v18 = vrot.slane %v625_v60, 4  ;;  %v648_v31 = vrot.slane %v625_v60, 2 }
 0x12b   :  { %v616_v40 = vpop.xlane.xlu1 %615  ;;  %v860_v23 = vpop.xlane.xlu0 %859 }
 0x12c   :  { %v626_v41 = vsel %vm2933_vm12, %v624_v3, %v616_v40  ;;  %v857_v0 = vpop.xlane.xlu2 %856  ;;  %vm2935_vm12 = vcmask 1045504  }
 0x12d   :  { %v630_v32 = vrot.slane %v626_v41, 1  ;;  %v638_v33 = vrot.slane %v626_v41, 7  ;;  %v649_v5 = vrot.slane %v626_v41, 2  ;;  %v663_v43 = vrot.slane %v626_v41, 3 }
 0x12e   :  { %v669_v6 = vrot.slane %v626_v41, 5  ;;  %v679_v15 = vrot.slane %v626_v41, 6  ;;  %v676_v12 = vrot.slane %v626_v41, 4 }
 0x12f   :  { %v636_v38 = vsel %vm128_vm2, %v630_v32, %v634_v21  ;;  %v639_v14 = vsel %vm130_vm7, %v637_v22, %v638_v33  ;;  %v655_v44 = vsel %vm2913_vm4, %v649_v5, %v653_v25  ;;  %v668_v62 = vsel %vm130_vm7, %v663_v43, %v637_v22 }
 0x130   :  { %v643_v16 = vsel %vm137_vm9, %v639_v14, %v641_v63  ;;  %v645_v4 = vsel %vm2934_vm14, %v636_v38, %v641_v63  ;;  %v670_v26 = vsel %vm128_vm2, %v634_v21, %v669_v6  ;;  %v660_v45 = vsel %vm2910_vm6, %v655_v44, %v656_v18 }
 0x131   :  { %v647_v39 = vadd.f32 %v645_v4, %v626_v41  ;;  %v631_v20 = vsel %vm120_vm8, %v629_v10, %v630_v32  ;;  %v650_v58 = vsel %vm2935_vm12, %v648_v31, %v649_v5  ;;  %v680_v33 = vsel %vm2913_vm4, %v653_v25, %v679_v15 }
 0x132   :  { %vm2936_vm14 = vcmp.lt.s32.totalorder %v2031_v56, 5  ;;  %v658_v22 = vsel %vm167_vm15, %v626_v41, %v656_v18  ;;  %vm2937_vm6 = vcmp.lt.s32.totalorder %v2051_v9, 3  ;;  %v664_v5 = vsel %vm137_vm9, %v641_v63, %v663_v43 }
 0x133   :  { %v882_v8 = vpop.xlane.xlu1 %881  ;;  %v903_v3 = vpop.xlane.xlu0 %902  ;;  %v662_v40 = vadd.f32 %v660_v45, %v647_v39  ;;  %v644_v4 = vsel %vm2936_vm14, %v631_v20, %v643_v16  ;;  %v673_v30 = vsel %vm2937_vm6, %v668_v62, %v670_v26  ;;  %vm2938_vm12 = vcmp.lt.s32.totalorder %v2031_v56, 4 }
 0x134   :  { %v954_v21 = vsel %vm250_vm1, %v857_v0, %v882_v8  ;;  %v885_v6 = vpop.xlane.xlu2 %884  ;;  %v646_v32 = vadd.f32 %v644_v4, %v625_v60  ;;  %v659_v25 = vsel %vm2938_vm12, %v650_v58, %v658_v22  ;;  %vm2939_vm4 = vcmp.lt.s32.totalorder %v2051_v9, 2 }
 0x135   :  { %v956_v31 = vsel %vm253_vm3, %v954_v21, %v903_v3  ;;  %v675_v2 = vadd.f32 %v673_v30, %v662_v40  ;;  %v683_v15 = vsel %vm2939_vm4, %v625_v60, %v680_v33  ;;  %v677_v41 = vsel %vm167_vm15, %v656_v18, %v676_v12 }
 0x136   :  { %v661_v16 = vadd.f32 %v659_v25, %v646_v32  ;;  %vm2940_vm14 = vcmp.lt.s32.totalorder %v2031_v56, 3  ;;  %v689_v45 = vsel %vm235_vm13, %v629_v10, %v639_v14  ;;  %v687_v63 = vsel %vm120_vm8, %v670_v26, %v629_v10 }
 0x137   :  { %v685_v0 = vadd.f32 %v683_v15, %v675_v2  ;;  %v672_v39 = vsel %vm2940_vm14, %v664_v5, %v636_v38  ;;  %vm2941_vm6 = vcmp.lt.s32.totalorder %v2031_v56, 2  ;;  %v955_v60 = vsel %vm250_vm1, %v860_v23, %v885_v6 }
 0x138   :  { %v674_v43 = vadd.f32 %v672_v39, %v661_v16  ;;  %v682_v20 = vsel %vm2941_vm6, %v677_v41, %v655_v44  ;;  %vm2942_vm4 = vcmp.lt.s32.totalorder %v2031_v56, 1  ;;  %vm2943_vm1 = vcmask 39936  }
 0x139   :  { %v2487_v30 = vadd.f32 %v689_v45, %v685_v0  ;;  %v688_v38 = vsel %vm2942_vm4, %v687_v63, %v668_v62  ;;  %vm2946_vm12 = vcmp.lt.s32.totalorder %v2051_v9, 5  ;;  %vm2947_vm14 = vcmp.lt.s32.totalorder %v2051_v9, 4 }
 0x13a   :  { %v684_v58 = vadd.f32 %v682_v20, %v674_v43  ;;  %vm2948_vm6 = vcmp.lt.s32.totalorder %v2051_v9, 3 }
 0x13b   :  { %v906_v8 = vpop.xlane.xlu1 %905  ;;  %v925_v18 = vpop.xlane.xlu0 %924  ;;  %v695_v2 = vsel %vm336_vm5, %v2487_v30, -inf }
 0x13c   :  { %v957_v14 = vsel %vm253_vm3, %v955_v60, %v906_v8  ;;  %v922_v12 = vpop.xlane.xlu2 %921  ;;  %696 = vmax.xlane.f32.xlu0 %v695_v2  ;;  %v2497_v10 = vadd.f32 %v688_v38, %v684_v58  ;;  %vm2944_vm3 = vmmov %vm2943_vm1 }
 0x13d   :  { %v959_v26 = vsel %vm256_vm0, %v957_v14, %v925_v18  ;;  %v958_v44 = vsel %vm256_vm0, %v956_v31, %v922_v12  ;;  %vm2945_vm0 = vcmask 1041408  }
 0x13e   :  { %v692_v23 = vsel %vm332_vm10, %v2497_v10, -inf  ;;  %vm2949_vm4 = vmmov %vm2945_vm0 }
 0x13f   :  { %693 = vmax.xlane.f32.xlu1 %v692_v23 }
 0x143   :  { %v938_v3 = vpop.xlane.xlu1 %937  ;;  %v950_v40 = vpop.xlane.xlu0 %949 }
 0x144   :  { %v960_v33 = vsel %vm259_vm11, %v958_v44, %v938_v3  ;;  %v941_v4 = vpop.xlane.xlu2 %940 }
 0x145   :  { %v962_v62 = vsel %vm2943_vm1, %v960_v33, %v950_v40  ;;  %v961_v22 = vsel %vm259_vm11, %v959_v26, %v941_v4  ;;  %vm2951_vm1 = vcmask 1045504  }
 0x146   :  { %v966_v6 = vrot.slane %v962_v62, 1  ;;  %v971_v32 = vrot.slane %v962_v62, 5  ;;  %v974_v5 = vrot.slane %v962_v62, 7  ;;  %v978_v25 = vrot.slane %v962_v62, 3 }
 0x147   :  { %v990_v15 = vrot.slane %v962_v62, 6  ;;  %v993_v16 = vrot.slane %v962_v62, 4  ;;  %v985_v41 = vrot.slane %v962_v62, 2 }
 0x14b   :  { %v953_v21 = vpop.xlane.xlu1 %952 }
 0x14c   :  { %v963_v31 = vsel %vm2944_vm3, %v961_v22, %v953_v21  ;;  %vm2953_vm3 = vcmp.lt.s32.totalorder %v2031_v56, 4 }
 0x14d   :  { %v967_v0 = vrot.slane %v963_v31, 1  ;;  %v975_v39 = vrot.slane %v963_v31, 7  ;;  %v986_v45 = vrot.slane %v963_v31, 2  ;;  %v1000_v43 = vrot.slane %v963_v31, 3 }
 0x14e   :  { %v1006_v63 = vrot.slane %v963_v31, 5  ;;  %v1016_v20 = vrot.slane %v963_v31, 6  ;;  %v995_v58 = vsel %vm167_vm15, %v963_v31, %v993_v16  ;;  %v1013_v60 = vrot.slane %v963_v31, 4 }
 0x14f   :  { %v973_v8 = vsel %vm128_vm2, %v967_v0, %v971_v32  ;;  %v976_v18 = vsel %vm130_vm7, %v974_v5, %v975_v39  ;;  %v992_v2 = vsel %vm2945_vm0, %v986_v45, %v990_v15  ;;  %v1005_v38 = vsel %vm130_vm7, %v1000_v43, %v974_v5 }
 0x150   :  { %v980_v14 = vsel %vm137_vm9, %v976_v18, %v978_v25  ;;  %v982_v12 = vsel %vm2946_vm12, %v973_v8, %v978_v25  ;;  %v997_v26 = vsel %vm2947_vm14, %v992_v2, %v993_v16  ;;  %v1007_v44 = vsel %vm128_vm2, %v971_v32, %v1006_v63 }
 0x151   :  { %v984_v23 = vadd.f32 %v982_v12, %v963_v31  ;;  %v1010_v3 = vsel %vm2948_vm6, %v1005_v38, %v1007_v44  ;;  %v1017_v40 = vsel %vm2949_vm4, %v990_v15, %v1016_v20  ;;  %v1026_v33 = vsel %vm235_vm13, %v966_v6, %v976_v18 }
 0x152   :  { %vm2950_vm7 = vcmp.lt.s32.totalorder %v2051_v9, 2  ;;  %v968_v22 = vsel %vm120_vm8, %v966_v6, %v967_v0  ;;  %v987_v21 = vsel %vm2951_vm1, %v985_v41, %v986_v45  ;;  %v1001_v5 = vsel %vm137_vm9, %v978_v25, %v1000_v43 }
 0x153   :  { %v1020_v4 = vsel %vm2950_vm7, %v962_v62, %v1017_v40  ;;  %v999_v39 = vadd.f32 %v997_v26, %v984_v23  ;;  %vm2952_vm2 = vcmp.lt.s32.totalorder %v2031_v56, 5  ;;  %v996_v31 = vsel %vm2953_vm3, %v987_v21, %v995_v58 }
 0x154   :  { %v981_v32 = vsel %vm2952_vm2, %v968_v22, %v980_v14  ;;  %vm2954_vm0 = vcmp.lt.s32.totalorder %v2031_v56, 3  ;;  %v1014_v9 = vsel %vm167_vm15, %v993_v16, %v1013_v60  ;;  %v1024_v20 = vsel %vm120_vm8, %v1007_v44, %v966_v6 }
 0x155   :  { %v1009_v15 = vsel %vm2954_vm0, %v1001_v5, %v973_v8  ;;  %v983_v63 = vadd.f32 %v981_v32, %v962_v62  ;;  %v1012_v0 = vadd.f32 %v1010_v3, %v999_v39  ;;  %vm2955_vm13 = vcmp.lt.s32.totalorder %v2031_v56, 2 }
 0x156   :  { %v1019_v41 = vsel %vm2955_vm13, %v1014_v9, %v992_v2  ;;  %vm2956_vm9 = vcmp.lt.s32.totalorder %v2031_v56, 1  ;;  %v2957_v6 = vlaneseq }
 0x157   :  { %v1025_v25 = vsel %vm2956_vm9, %v1024_v20, %v1005_v38  ;;  %v998_v45 = vadd.f32 %v996_v31, %v983_v63  ;;  %v1022_v43 = vadd.f32 %v1020_v4, %v1012_v0 }
 0x158   :  { %v331_v60 = vand.u32 127, %v2957_v6 }
 0x159   :  { %v1011_v18 = vadd.f32 %v1009_v15, %v998_v45  ;;  %v1028_v14 = vadd.f32 %v1026_v33, %v1022_v43 }
 0x15b   :  { %v1021_v58 = vadd.f32 %v1019_v41, %v1011_v18  ;;  %v1032_v12 = vsel %vm336_vm5, %v1028_v14, -inf }
 0x15c   :  { %1033 = vmax.xlane.f32.xlu1 %v1032_v12 }
 0x15d   :  { %v1027_v62 = vadd.f32 %v1025_v25, %v1021_v58 }
 0x15f   :  { %v1029_v16 = vsel %vm332_vm10, %v1027_v62, -inf }
 0x160   :  { %1030 = vmax.xlane.f32.xlu2 %v1029_v16 }
 0x18f   :  { %v339_v8 = vpop.xlane.xlu0 %338 }
 0x190   :  { %vm341_vm12 = vcmp.ge.f32.partialorder %v2433_v11, %v339_v8 }
 0x191   :  { %v343_v2 = vsel %vm341_vm12, %v331_v60, 6  ;;  %v335_v38 = vpop.xlane.xlu2 %334 }
 0x192   :  { %v359_v56 = vsel %vm336_vm5, %v343_v2, 2147483647  ;;  %vm340_vm14 = vcmp.ge.f32.partialorder %v2441_v37, %v335_v38 }
 0x193   :  { %v361_v26 = vshra.s32 %v359_v56, 16  ;;  %v342_v44 = vsel %vm340_vm14, %v331_v60, 6  ;;  %v360_v18 = vand.u32 65535, %v359_v56 }
 0x194   :  { %v344_v23 = vsel %vm332_vm10, %v342_v44, 2147483647 }
 0x195   :  { %v363_v3 = vcvt.s32.f32 %v361_v26  ;;  %v346_v40 = vshra.s32 %v344_v23, 16  ;;  %v345_v58 = vand.u32 65535, %v344_v23  ;;  %v362_v16 = vcvt.s32.f32 %v360_v18  ;;  %v1919_v18 = vld [vmem:[%s2887_s0 + $0x8] sm:$0xf] }
 0x197   :  { %364 = vmin.xlane.f32.xlu0 %v363_v3  ;;  %v348_v33 = vcvt.s32.f32 %v346_v40  ;;  %v347_v8 = vcvt.s32.f32 %v345_v58 }
 0x199   :  { %349 = vmin.xlane.f32.xlu2 %v348_v33 }
 0x1af   :  { %v697_v4 = vpop.xlane.xlu0 %696 }
 0x1b0   :  { %vm699_vm6 = vcmp.ge.f32.partialorder %v2487_v30, %v697_v4 }
 0x1b1   :  { %v701_v22 = vsel %vm699_vm6, %v331_v60, 6 }
 0x1b2   :  { %v717_v11 = vsel %vm336_vm5, %v701_v22, 2147483647  ;;  %v694_v21 = vpop.xlane.xlu1 %693 }
 0x1b3   :  { %vm698_vm4 = vcmp.ge.f32.partialorder %v2497_v10, %v694_v21  ;;  %v719_v5 = vshra.s32 %v717_v11, 16 }
 0x1b4   :  { %v700_v37 = vsel %vm698_vm4, %v331_v60, 6 }
 0x1b5   :  { %v702_v39 = vsel %vm332_vm10, %v700_v37, 2147483647  ;;  %v721_v32 = vcvt.s32.f32 %v719_v5 }
 0x1b6   :  { %v704_v31 = vshra.s32 %v702_v39, 16  ;;  %v703_v2 = vand.u32 65535, %v702_v39 }
 0x1b7   :  { %722 = vmin.xlane.f32.xlu0 %v721_v32 }
 0x1b8   :  { %v706_v15 = vcvt.s32.f32 %v704_v31  ;;  %v705_v23 = vcvt.s32.f32 %v703_v2  ;;  %v1920_v2 = vld [vmem:[%s2887_s0] sm:$0xff] }
 0x1ba   :  { %707 = vmin.xlane.f32.xlu1 %v706_v15 }
 0x1cf   :  { %v1034_v63 = vpop.xlane.xlu1 %1033 }
 0x1d0   :  { %vm1036_vm7 = vcmp.ge.f32.partialorder %v1028_v14, %v1034_v63 }
 0x1d1   :  { %v1038_v9 = vsel %vm1036_vm7, %v331_v60, 6 }
 0x1d2   :  { %v1054_v30 = vsel %vm336_vm5, %v1038_v9, 2147483647 }
 0x1d3   :  { %v1031_v20 = vpop.xlane.xlu2 %1030  ;;  %v1056_v0 = vshra.s32 %v1054_v30, 16  ;;  %v1055_v40 = vand.u32 65535, %v1054_v30 }
 0x1d4   :  { %vm1035_vm1 = vcmp.ge.f32.partialorder %v1027_v62, %v1031_v20 }
 0x1d5   :  { %v1037_v41 = vsel %vm1035_vm1, %v331_v60, 6  ;;  %v1058_v25 = vcvt.s32.f32 %v1056_v0  ;;  %v718_v60 = vand.u32 65535, %v717_v11  ;;  %v1057_v22 = vcvt.s32.f32 %v1055_v40 }
 0x1d6   :  { %v1039_v10 = vsel %vm332_vm10, %v1037_v41, 2147483647 }
 0x1d7   :  { %v1041_v45 = vshra.s32 %v1039_v10, 16  ;;  %1059 = vmin.xlane.f32.xlu1 %v1058_v25  ;;  %v720_v26 = vcvt.s32.f32 %v718_v60 }
 0x1d9   :  { %v1043_v43 = vcvt.s32.f32 %v1041_v45 }
 0x1db   :  { %1044 = vmin.xlane.f32.xlu2 %v1043_v43 }
 0x20a   :  { %v365_v12 = vpop.xlane.xlu0 %364 }
 0x20b   :  { %vm366_vm2 = vcmp.eq.f32.partialorder %v363_v3, %v365_v12  ;;  %v371_v39 = vcvt.f32.s32 %v365_v12 }
 0x20c   :  { %v367_v14 = vsel %vm366_vm2, %v362_v16, inf  ;;  %v350_v6 = vpop.xlane.xlu2 %349 }
 0x20d   :  { %368 = vmin.xlane.f32.xlu0 %v367_v14  ;;  %vm351_vm5 = vcmp.eq.f32.partialorder %v348_v33, %v350_v6  ;;  %v1040_v33 = vand.u32 65535, %v1039_v10  ;;  %v1927_v10 = vmov 0.0  }
 0x20e   :  { %v352_v62 = vsel %vm351_vm5, %v347_v8, inf }
 0x20f   :  { %353 = vmin.xlane.f32.xlu2 %v352_v62  ;;  %v1042_v5 = vcvt.s32.f32 %v1040_v33 }
 0x22a   :  { %v2553_v38 = vpop.xlane.xlu0 %722 }
 0x22b   :  { %vm724_vm10 = vcmp.eq.f32.partialorder %v721_v32, %v2553_v38  ;;  %v356_v32 = vcvt.f32.s32 %v350_v6 }
 0x22c   :  { %v725_v44 = vsel %vm724_vm10, %v720_v26, inf }
 0x22d   :  { %v2556_v56 = vpop.xlane.xlu1 %707  ;;  %726 = vmin.xlane.f32.xlu0 %v725_v44  ;;  %v357_v20 = vshll.u32 %v356_v32, 16 }
 0x22e   :  { %vm709_vm3 = vcmp.eq.f32.partialorder %v706_v15, %v2556_v56  ;;  %v372_v15 = vshll.u32 %v371_v39, 16 }
 0x22f   :  { %v710_v3 = vsel %vm709_vm3, %v705_v23, inf }
 0x230   :  { %711 = vmin.xlane.f32.xlu1 %v710_v3 }
 0x24a   :  { %v2559_v4 = vpop.xlane.xlu1 %1059 }
 0x24b   :  { %vm1061_vm0 = vcmp.eq.f32.partialorder %v1058_v25, %v2559_v4 }
 0x24c   :  { %v1062_v11 = vsel %vm1061_vm0, %v1057_v22, inf }
 0x24d   :  { %1063 = vmin.xlane.f32.xlu1 %v1062_v11 }
 0x24e   :  { %v2562_v21 = vpop.xlane.xlu2 %1044 }
 0x24f   :  { %vm1046_vm13 = vcmp.eq.f32.partialorder %v1043_v43, %v2562_v21 }
 0x250   :  { %v1047_v37 = vsel %vm1046_vm13, %v1042_v5, inf }
 0x251   :  { %1048 = vmin.xlane.f32.xlu2 %v1047_v37 }
 0x280   :  { %v369_v31 = vpop.xlane.xlu0 %368 }
 0x281   :  { %v370_v63 = vcvt.f32.s32 %v369_v31 }
 0x282   :  { %v354_v30 = vpop.xlane.xlu2 %353 }
 0x283   :  { %v373_v9 = vadd.s32 %v372_v15, %v370_v63  ;;  %v355_v0 = vcvt.f32.s32 %v354_v30 }
 0x285   :  { %vm375_vm9 = vcmp.eq.s32.totalorder %v373_v9, 0  ;;  %vm383_vm12 = vcmp.eq.s32.totalorder %v373_v9, 1  ;;  %vm391_vm14 = vcmp.eq.s32.totalorder %v373_v9, 2  ;;  %vm399_vm6 = vcmp.eq.s32.totalorder %v373_v9, 3 }
 0x286   :  { %v358_v41 = vadd.s32 %v357_v20, %v355_v0  ;;  %v377_v25 = vsel %vm375_vm9, 1.0, %v1927_v10  ;;  %v385_v45 = vsel %vm383_vm12, 1.0, %v1927_v10  ;;  %v393_v43 = vsel %vm391_vm14, 1.0, %v1927_v10 }
 0x287   :  { %v379_v58 = vmul.f32 %v1919_v18, %v377_v25  ;;  %v387_v12 = vmul.f32 %v385_v45, %v2071_v19  ;;  %v401_v16 = vsel %vm399_vm6, 1.0, %v1927_v10  ;;  %vm407_vm4 = vcmp.eq.s32.totalorder %v373_v9, 4 }
 0x288   :  { %vm374_vm7 = vcmp.eq.s32.totalorder %v358_v41, 0  ;;  %v395_v6 = vmul.f32 %v393_v43, %v2096_v34  ;;  %vm415_vm1 = vcmp.eq.s32.totalorder %v373_v9, 5  ;;  %v403_v62 = vmul.f32 %v401_v16, %v2100_v35 }
 0x289   :  { %v389_v14 = vadd.f32 %v387_v12, %v379_v58  ;;  %v376_v8 = vsel %vm374_vm7, 1.0, %v1927_v10  ;;  %v409_v60 = vsel %vm407_vm4, 1.0, %v1927_v10  ;;  %vm382_vm2 = vcmp.eq.s32.totalorder %v358_v41, 1 }
 0x28a   :  { %v378_v26 = vmul.f32 %v1920_v2, %v376_v8  ;;  %v384_v44 = vsel %vm382_vm2, 1.0, %v1927_v10  ;;  %vm390_vm5 = vcmp.eq.s32.totalorder %v358_v41, 2  ;;  %vm398_vm10 = vcmp.eq.s32.totalorder %v358_v41, 3 }
 0x28b   :  { %v397_v19 = vadd.f32 %v395_v6, %v389_v14  ;;  %v417_v34 = vsel %vm415_vm1, 1.0, %v1927_v10  ;;  %v386_v23 = vmul.f32 %v384_v44, %v2046_v7  ;;  %v392_v3 = vsel %vm390_vm5, 1.0, %v1927_v10 }
 0x28c   :  { %vm406_vm3 = vcmp.eq.s32.totalorder %v358_v41, 4  ;;  %v411_v40 = vmul.f32 %v409_v60, %v2137_v50  ;;  %v400_v33 = vsel %vm398_vm10, 1.0, %v1927_v10  ;;  %v394_v11 = vmul.f32 %v392_v3, %v2066_v17 }
 0x28d   :  { %v405_v35 = vadd.f32 %v403_v62, %v397_v19  ;;  %v388_v22 = vadd.f32 %v386_v23, %v378_v26  ;;  %vm414_vm0 = vcmp.eq.s32.totalorder %v358_v41, 5  ;;  %v419_v37 = vmul.f32 %v417_v34, %v2156_v61  ;;  %v1922_v26 = vld [vmem:[%s2887_s0 + $0x10] sm:$0xff] }
 0x28e   :  { %v408_v39 = vsel %vm406_vm3, 1.0, %v1927_v10  ;;  %v402_v7 = vmul.f32 %v400_v33, %v2104_v36  ;;  %v416_v15 = vsel %vm414_vm0, 1.0, %v1927_v10  ;;  %v729_v61 = vcvt.f32.s32 %v2553_v38 }
 0x28f   :  { %v413_v5 = vadd.f32 %v411_v40, %v405_v35  ;;  %v396_v32 = vadd.f32 %v394_v11, %v388_v22  ;;  %v410_v50 = vmul.f32 %v408_v39, %v2128_v48  ;;  %v418_v17 = vmul.f32 %v416_v15, %v2132_v49 }
 0x290   :  { %v714_v20 = vcvt.f32.s32 %v2556_v56  ;;  %v730_v0 = vshll.u32 %v729_v61, 16  ;;  %v1921_v56 = vld [vmem:[%s2887_s0 + $0x18] sm:$0xf] }
 0x291   :  { %v421_v31 = vadd.f32 %v419_v37, %v413_v5  ;;  %v404_v63 = vadd.f32 %v402_v7, %v396_v32 }
 0x292   :  { %v715_v43 = vshll.u32 %v714_v20, 16 }
 0x293   :  { %432 = vrot.lane.b32.xlu0 %v421_v31, %s1928_s22  ;;  %v412_v9 = vadd.f32 %v410_v50, %v404_v63 }
 0x295   :  { %v420_v30 = vadd.f32 %v418_v17, %v412_v9 }
 0x297   :  { %430 = vrot.lane.b32.xlu2 %v420_v30, %s1928_s22 }
 0x2a0   :  { %v727_v36 = vpop.xlane.xlu0 %726 }
 0x2a1   :  { %v728_v41 = vcvt.f32.s32 %v727_v36 }
 0x2a3   :  { %v731_v25 = vadd.s32 %v730_v0, %v728_v41  ;;  %v712_v45 = vpop.xlane.xlu1 %711 }
 0x2a4   :  { %v713_v48 = vcvt.f32.s32 %v712_v45 }
 0x2a5   :  { %vm733_vm13 = vcmp.eq.s32.totalorder %v731_v25, 0  ;;  %vm741_vm9 = vcmp.eq.s32.totalorder %v731_v25, 1  ;;  %vm749_vm12 = vcmp.eq.s32.totalorder %v731_v25, 2  ;;  %vm757_vm14 = vcmp.eq.s32.totalorder %v731_v25, 3 }
 0x2a6   :  { %v716_v18 = vadd.s32 %v715_v43, %v713_v48  ;;  %v735_v49 = vsel %vm733_vm13, 1.0, %v1927_v10  ;;  %v743_v58 = vsel %vm741_vm9, 1.0, %v1927_v10  ;;  %v751_v38 = vsel %vm749_vm12, 1.0, %v1927_v10 }
 0x2a7   :  { %v737_v12 = vmul.f32 %v1921_v56, %v735_v49  ;;  %v745_v16 = vmul.f32 %v743_v58, %v2190_v24  ;;  %v759_v14 = vsel %vm757_vm14, 1.0, %v1927_v10  ;;  %vm765_vm6 = vcmp.eq.s32.totalorder %v731_v25, 4  ;;  %v1924_v56 = vld [vmem:[%s2887_s0 + $0x20] sm:$0xff] }
 0x2a8   :  { %vm732_vm4 = vcmp.eq.s32.totalorder %v716_v18, 0  ;;  %v753_v8 = vmul.f32 %v751_v38, %v2218_v46  ;;  %vm773_vm7 = vcmp.eq.s32.totalorder %v731_v25, 5  ;;  %v761_v60 = vmul.f32 %v759_v14, %v2222_v47 }
 0x2a9   :  { %v747_v6 = vadd.f32 %v745_v16, %v737_v12  ;;  %v734_v62 = vsel %vm732_vm4, 1.0, %v1927_v10  ;;  %v767_v2 = vsel %vm765_vm6, 1.0, %v1927_v10  ;;  %vm740_vm1 = vcmp.eq.s32.totalorder %v716_v18, 1 }
 0x2aa   :  { %v736_v19 = vmul.f32 %v1922_v26, %v734_v62  ;;  %v742_v44 = vsel %vm740_vm1, 1.0, %v1927_v10  ;;  %vm748_vm2 = vcmp.eq.s32.totalorder %v716_v18, 2  ;;  %vm756_vm5 = vcmp.eq.s32.totalorder %v716_v18, 3 }
 0x2ab   :  { %v755_v24 = vadd.f32 %v753_v8, %v747_v6  ;;  %v775_v46 = vsel %vm773_vm7, 1.0, %v1927_v10  ;;  %v744_v34 = vmul.f32 %v742_v44, %v2194_v28  ;;  %v750_v23 = vsel %vm748_vm2, 1.0, %v1927_v10 }
 0x2ac   :  { %vm764_vm10 = vcmp.eq.s32.totalorder %v716_v18, 4  ;;  %v769_v3 = vmul.f32 %v767_v2, %v2256_v13  ;;  %v758_v35 = vsel %vm756_vm5, 1.0, %v1927_v10  ;;  %v752_v33 = vmul.f32 %v750_v23, %v2198_v29 }
 0x2ad   :  { %v763_v47 = vadd.f32 %v761_v60, %v755_v24  ;;  %v746_v40 = vadd.f32 %v744_v34, %v736_v19  ;;  %vm772_vm3 = vcmp.eq.s32.totalorder %v716_v18, 5  ;;  %v777_v11 = vmul.f32 %v775_v46, %v2275_v42  ;;  %v423_v42 = vld [vmem:[%s2888_s1 + $0x8] sm:$0x7f]  ;;  %v2958_v19 = vld [vmem:[#allocation5_spill] sm:$0xff]  ;;  %v2959_v34 = vld [vmem:[#allocation2_spill] sm:$0xff] }
 0x2ae   :  { %v766_v5 = vsel %vm764_vm10, 1.0, %v1927_v10  ;;  %v760_v28 = vmul.f32 %v758_v35, %v2226_v51  ;;  %v774_v32 = vsel %vm772_vm3, 1.0, %v1927_v10  ;;  %v422_v51 = vld [vmem:[%s2888_s1] sm:$0xff]  ;;  %1816 = vmatpush.msk.msra.mxu0 %vm120_vm8, %v423_v42  ;;  %1824 = vmatpush.msk.msra.mxu2 %vm120_vm8, %v423_v42  ;;  %v2960_v35 = vld [vmem:[#allocation3_spill] sm:$0xff]  ;;  %vm2962_vm10 = vcmask 121856  }
 0x2af   :  { %v771_v22 = vadd.f32 %v769_v3, %v763_v47  ;;  %v754_v37 = vadd.f32 %v752_v33, %v746_v40  ;;  %v768_v13 = vmul.f32 %v766_v5, %v2247_v53  ;;  %v776_v29 = vmul.f32 %v774_v32, %v2251_v57  ;;  %v2961_v33 = vld [vmem:[#allocation4_spill] sm:$0xff]  ;;  %vm2963_vm3 = vmmov %vm2962_vm10  ;;  %v469_v32 = vld [vmem:[%s2890_s3 + $0x28] sm:$0xff] }
 0x2b0   :  { %456 = vmatpush.msra.mxu0 %v422_v51  ;;  %805 = vmatpush.msra.mxu2 %v422_v51  ;;  %v1066_v53 = vcvt.f32.s32 %v2559_v4  ;;  %v1051_v57 = vcvt.f32.s32 %v2562_v21  ;;  %v1923_v21 = vld [vmem:[%s2887_s0 + $0x28] sm:$0xf]  ;;  %s1932_s0 = smov 120  }
 0x2b1   :  { %v779_v39 = vadd.f32 %v777_v11, %v771_v22  ;;  %v762_v7 = vadd.f32 %v760_v28, %v754_v37  ;;  %v471_v28 = vld [vmem:[%s2890_s3 + $0x38] sm:$0xf] }
 0x2b2   :  { %1832 = vmatpush.msk.msrb.mxu0 %vm120_vm8, %v423_v42  ;;  %v1067_v50 = vshll.u32 %v1066_v53, 16  ;;  %v1052_v61 = vshll.u32 %v1051_v57, 16  ;;  %1819 = vmatpush.msk.msra.mxu1 %vm167_vm15, %v471_v28  ;;  %v464_v42 = vld [vmem:[%s2890_s3] sm:$0xff] }
 0x2b3   :  { %784 = vrot.lane.b32.xlu2 %v779_v39, %s1928_s22  ;;  %v770_v31 = vadd.f32 %v768_v13, %v762_v7  ;;  %v470_v39 = vld [vmem:[%s2890_s3 + $0x30] sm:$0xff]  ;;  %1827 = vmatpush.msk.msra.mxu3 %vm167_vm15, %v471_v28  ;;  %v468_v7 = vld [vmem:[%s2890_s3 + $0x20] sm:$0xff]  ;;  %v467_v13 = vld [vmem:[%s2890_s3 + $0x18] sm:$0xff] }
 0x2b4   :  { %1142 = vmatpush.msrb.mxu0 %v422_v51  ;;  %1835 = vmatpush.msk.msrb.mxu2 %vm167_vm15, %v471_v28  ;;  %v1901_v53 = vld [vmem:[%s2889_s2] ss:$0 sm:$0xff]  ;;  %s1929_s2 = smov 8  }
 0x2b5   :  { %v778_v15 = vadd.f32 %v776_v29, %v770_v31  ;;  %491 = vmatpush.msra.mxu1 %v470_v39  ;;  %828 = vmatpush.msra.mxu3 %v470_v39  ;;  %v466_v31 = vld [vmem:[%s2890_s3 + $0x10] sm:$0xff] }
 0x2b6   :  { %1165 = vmatpush.msrb.mxu2 %v470_v39 }
 0x2b7   :  { %782 = vrot.lane.b32.xlu1 %v778_v15, %s1928_s22  ;;  %492 = vmatpush.msra.mxu1 %v469_v32  ;;  %v465_v15 = vld [vmem:[%s2890_s3 + $0x8] sm:$0xff] }
 0x2b8   :  { %829 = vmatpush.msra.mxu3 %v469_v32  ;;  %1166 = vmatpush.msrb.mxu2 %v469_v32 }
 0x2b9   :  { %493 = vmatpush.msra.mxu1 %v468_v7 }
 0x2ba   :  { %830 = vmatpush.msra.mxu3 %v468_v7  ;;  %1167 = vmatpush.msrb.mxu2 %v468_v7 }
 0x2bb   :  { %494 = vmatpush.msra.mxu1 %v467_v13 }
 0x2bc   :  { %831 = vmatpush.msra.mxu3 %v467_v13  ;;  %1168 = vmatpush.msrb.mxu2 %v467_v13 }
 0x2bd   :  { %495 = vmatpush.msra.mxu1 %v466_v31 }
 0x2be   :  { %832 = vmatpush.msra.mxu3 %v466_v31  ;;  %1169 = vmatpush.msrb.mxu2 %v466_v31 }
 0x2bf   :  { %496 = vmatpush.msra.mxu1 %v465_v15 }
 0x2c0   :  { %v1064_v63 = vpop.xlane.xlu1 %1063  ;;  %833 = vmatpush.msra.mxu3 %v465_v15  ;;  %1170 = vmatpush.msrb.mxu2 %v465_v15 }
 0x2c1   :  { %v1065_v9 = vcvt.f32.s32 %v1064_v63  ;;  %497 = vmatpush.msra.mxu1 %v464_v42 }
 0x2c2   :  { %834 = vmatpush.msra.mxu3 %v464_v42  ;;  %1171 = vmatpush.msrb.mxu2 %v464_v42  ;;  %v2773_v42 = vld [vmem:[%s2892_s5] sm:$0xf]  ;;  %s1934_s5 = smov 116  }
 0x2c3   :  { %v1068_v17 = vadd.s32 %v1067_v50, %v1065_v9 }
 0x2c4   :  { %v1049_v30 = vpop.xlane.xlu2 %1048  ;;  %1840 = vmatpush.msk.msrb.mxu3 %vm167_vm15, %v2773_v42 }
 0x2c5   :  { %v1050_v20 = vcvt.f32.s32 %v1049_v30  ;;  %vm1070_vm0 = vcmp.eq.s32.totalorder %v1068_v17, 0  ;;  %vm1078_vm13 = vcmp.eq.s32.totalorder %v1068_v17, 1  ;;  %vm1086_vm9 = vcmp.eq.s32.totalorder %v1068_v17, 2 }
 0x2c6   :  { %vm1094_vm12 = vcmp.eq.s32.totalorder %v1068_v17, 3  ;;  %v1072_v0 = vsel %vm1070_vm0, 1.0, %v1927_v10  ;;  %v1080_v41 = vsel %vm1078_vm13, 1.0, %v1927_v10  ;;  %v1088_v4 = vsel %vm1086_vm9, 1.0, %v1927_v10  ;;  %vm2964_vm0 = vmmov %vm2963_vm3 }
 0x2c7   :  { %v1053_v36 = vadd.s32 %v1052_v61, %v1050_v20  ;;  %v1074_v25 = vmul.f32 %v1923_v21, %v1072_v0  ;;  %v1082_v45 = vmul.f32 %v1080_v41, %v2316_v59  ;;  %v1096_v43 = vsel %vm1094_vm12, 1.0, %v1927_v10  ;;  %vm2965_vm13 = vmmov %vm2964_vm0 }
 0x2c8   :  { %vm1102_vm8 = vcmp.eq.s32.totalorder %v1068_v17, 4  ;;  %v1090_v18 = vmul.f32 %v1088_v4, %v2336_v1  ;;  %vm1110_vm6 = vcmp.eq.s32.totalorder %v1068_v17, 5  ;;  %v1098_v58 = vmul.f32 %v1096_v43, %v2340_v27  ;;  %vm2966_vm9 = vmmov %vm2964_vm0 }
 0x2c9   :  { %vm1069_vm14 = vcmp.eq.s32.totalorder %v1053_v36, 0  ;;  %v1084_v48 = vadd.f32 %v1082_v45, %v1074_v25  ;;  %v1104_v38 = vsel %vm1102_vm8, 1.0, %v1927_v10  ;;  %vm1077_vm4 = vcmp.eq.s32.totalorder %v1053_v36, 1  ;;  %vm2967_vm12 = vmmov %vm2964_vm0  ;;  %v1203_v25 = vld [vmem:[%s2891_s4 + $0x10] sm:$0xff]  ;;  %v1202_v45 = vld [vmem:[%s2891_s4 + $0x8] sm:$0xff] }
 0x2ca   :  { %v1071_v49 = vsel %vm1069_vm14, 1.0, %v1927_v10  ;;  %v1079_v16 = vsel %vm1077_vm4, 1.0, %v1927_v10  ;;  %vm1085_vm7 = vcmp.eq.s32.totalorder %v1053_v36, 2  ;;  %vm1093_vm1 = vcmp.eq.s32.totalorder %v1053_v36, 3  ;;  %1224 = vmatpush.msrb.mxu1 %v1203_v25 }
 0x2cb   :  { %v1073_v12 = vmul.f32 %v1924_v56, %v1071_v49  ;;  %v1092_v59 = vadd.f32 %v1090_v18, %v1084_v48  ;;  %v1112_v1 = vsel %vm1110_vm6, 1.0, %v1927_v10  ;;  %v1081_v14 = vmul.f32 %v1079_v16, %v2307_v52  ;;  %v1201_v49 = vld [vmem:[%s2891_s4] sm:$0xff]  ;;  %s1931_s4 = smov 124  }
 0x2cc   :  { %v1087_v6 = vsel %vm1085_vm7, 1.0, %v1927_v10  ;;  %vm1101_vm2 = vcmp.eq.s32.totalorder %v1053_v36, 4  ;;  %v1106_v8 = vmul.f32 %v1104_v38, %v2372_v55  ;;  %v1095_v62 = vsel %vm1093_vm1, 1.0, %v1927_v10  ;;  %1225 = vmatpush.msrb.mxu1 %v1202_v45 }
 0x2cd   :  { %v1100_v27 = vadd.f32 %v1098_v58, %v1092_v59  ;;  %v1083_v60 = vadd.f32 %v1081_v14, %v1073_v12  ;;  %v1089_v2 = vmul.f32 %v1087_v6, %v2311_v54  ;;  %vm1109_vm5 = vcmp.eq.s32.totalorder %v1053_v36, 5 }
 0x2ce   :  { %v1114_v24 = vmul.f32 %v1112_v1, %v2958_v19  ;;  %v1103_v44 = vsel %vm1101_vm2, 1.0, %v1927_v10  ;;  %v1097_v52 = vmul.f32 %v1095_v62, %v2959_v34  ;;  %v1111_v47 = vsel %vm1109_vm5, 1.0, %v1927_v10  ;;  %1226 = vmatpush.msrb.mxu1 %v1201_v49 }
 0x2cf   :  { %v1108_v26 = vadd.f32 %v1106_v8, %v1100_v27  ;;  %v1091_v46 = vadd.f32 %v1089_v2, %v1083_v60  ;;  %v1105_v55 = vmul.f32 %v1103_v44, %v2960_v35  ;;  %v1113_v54 = vmul.f32 %v1111_v47, %v2961_v33 }
 0x2d0   :  { %vm472_vm8 = vcmask 490496   ;;  %vm1195_vm14 = vcmask 64512   ;;  %vm1198_vm6 = vcmask 130048   ;;  %vm1204_vm4 = vcmask 195584  }
 0x2d1   :  { %v1116_v23 = vadd.f32 %v1114_v24, %v1108_v26  ;;  %v1099_v3 = vadd.f32 %v1097_v52, %v1091_v46 }
 0x2d3   :  { %1121 = vrot.lane.b32.xlu1 %v1116_v23, %s1928_s22  ;;  %v1107_v40 = vadd.f32 %v1105_v55, %v1099_v3 }
 0x2d5   :  { %v1115_v22 = vadd.f32 %v1113_v54, %v1107_v40 }
 0x2d7   :  { %1119 = vrot.lane.b32.xlu0 %v1115_v22, %s1928_s22 }
 0x2f1   :  { %v431_v11 = vpop.permute.xlu2 %430 }
 0x2f2   :  { %1817 = vmatmul.msk.f32.vlgmr.msra.gmra.mxu0 %vm2962_vm10, %v431_v11 }
 0x2f3   :  { %1843 = vmatpush.msk.msra.mxu0 %vm167_vm15, %v2773_v42 }
 0x305   :  { %v433_v5 = vpop.permute.xlu0 %432 }
 0x306   :  { %1818 = vmatmul.msk.f32.gmra.mxu0 %vm2963_vm3, %v433_v5 }
 0x30d   :  { %v785_v10 = vpop.permute.xlu2 %784 }
 0x329   :  { %v783_v37 = vpop.permute.xlu1 %782 }
 0x32a   :  { %1825 = vmatmul.msk.f32.vlgmr.msra.gmra.mxu2 %vm2964_vm0, %v783_v37 }
 0x32b   :  { %1846 = vmatpush.msk.msra.mxu2 %vm167_vm15, %v2773_v42 }
 0x332   :  { %1826 = vmatmul.msk.f32.gmra.mxu2 %vm2965_vm13, %v785_v10 }
 0x345   :  { %v1122_v51 = vpop.permute.xlu1 %1121 }
 0x349   :  { %v1120_v29 = vpop.permute.xlu0 %1119 }
 0x34a   :  { %1833 = vmatmul.msk.f32.vlgmr.msrb.gmra.mxu0 %vm2966_vm9, %v1120_v29 }
 0x34b   :  { %1855 = vmatpush.msk.msrb.mxu0 %vm167_vm15, %v2773_v42 }
 0x352   :  { %1834 = vmatmul.msk.f32.gmra.mxu0 %vm2967_vm12, %v1122_v51 }
 0x36f   :  { %v458_v57 = vpop.f32.mrf.mxu0 }
 0x370   :  { %v2704_v63 = vadd.f32 %v1901_v53, %v458_v57 }
 0x372   :  { %1820 = vmatmul.msk.f32.vlgmr.msra.gmra.mxu1 %vm472_vm8, %v2704_v63 }
 0x383   :  { %v461_v50 = vpop.f32.mrf.mxu0 }
 0x384   :  { %v2708_v9 = vadd.f32 %v1901_v53, %v461_v50 }
 0x386   :  { %1821 = vmatmul.msk.f32.gmra.mxu1 %vm472_vm8, %v2708_v9 }
 0x3ad   :  { %v807_v17 = vpop.f32.mrf.mxu2 }
 0x3ae   :  { %v2712_v30 = vadd.f32 %v1901_v53, %v807_v17 }
 0x3b0   :  { %1828 = vmatmul.msk.f32.vlgmr.msra.gmra.mxu3 %vm472_vm8, %v2712_v30 }
 0x3b1   :  { %1852 = vmatpush.msk.msra.mxu3 %vm167_vm15, %v2773_v42 }
 0x3b5   :  { %v810_v61 = vpop.f32.mrf.mxu2 }
 0x3b6   :  { %v2716_v20 = vadd.f32 %v1901_v53, %v810_v61 }
 0x3b8   :  { %1829 = vmatmul.msk.f32.gmra.mxu3 %vm472_vm8, %v2716_v20 }
 0x3c7   :  { %v1144_v36 = vpop.f32.mrf.mxu0 }
 0x3c8   :  { %v2720_v0 = vadd.f32 %v1901_v53, %v1144_v36 }
 0x3ca   :  { %1836 = vmatmul.msk.f32.vlgmr.msrb.gmra.mxu2 %vm472_vm8, %v2720_v0 }
 0x3cb   :  { %1858 = vmatpush.msk.msrb.mxu2 %vm167_vm15, %v2773_v42 }
 0x3cf   :  { %v1147_v41 = vpop.f32.mrf.mxu0 }
 0x3d0   :  { %v2724_v4 = vadd.f32 %v1901_v53, %v1147_v41 }
 0x3d2   :  { %1837 = vmatmul.msk.f32.gmra.mxu2 %vm472_vm8, %v2724_v4 }
 0x3ef   :  { %v499_v58 = vpop.f32.mrf.mxu1 }
 0x403   :  { %v502_v1 = vpop.f32.mrf.mxu1 }
 0x433   :  { %v836_v21 = vpop.f32.mrf.mxu3 }
 0x434   :  { %1181 = vrot.lane.b32.xlu0 %v836_v21, %s1929_s2 }
 0x43b   :  { %v839_v43 = vpop.f32.mrf.mxu3 }
 0x43c   :  { %1183 = vrot.lane.b32.xlu1 %v839_v43, %s1929_s2 }
 0x44d   :  { %v1173_v48 = vpop.f32.mrf.mxu2 }
 0x44e   :  { %1189 = vrot.lane.b32.xlu2 %v1173_v48, %s1930_s9 }
 0x455   :  { %v1176_v18 = vpop.f32.mrf.mxu2 }
 0x456   :  { %1191 = vrot.lane.b32.xlu0 %v1176_v18, %s1930_s9 }
 0x4a6   :  { %v1182_v38 = vpop.permute.xlu0 %1181 }
 0x4a7   :  { %v1196_v56 = vsel %vm1195_vm14, %v499_v58, %v1182_v38 }
 0x4a8   :  { %v1190_v12 = vpop.permute.xlu2 %1189 }
 0x4a9   :  { %v1199_v59 = vsel %vm1198_vm6, %v1196_v56, %v1190_v12 }
 0x4aa   :  { %1838 = vmatmul.msk.f32.vlgmr.msrb.gmra.mxu1 %vm1204_vm4, %v1199_v59 }
 0x4ae   :  { %v1184_v16 = vpop.permute.xlu1 %1183 }
 0x4af   :  { %v1197_v14 = vsel %vm1195_vm14, %v502_v1, %v1184_v16 }
 0x4c8   :  { %v1192_v6 = vpop.permute.xlu0 %1191 }
 0x4c9   :  { %v1200_v27 = vsel %vm1198_vm6, %v1197_v14, %v1192_v6  ;;  %vm1810_vm6 = vcmask 363520  }
 0x4ca   :  { %1839 = vmatmul.msk.f32.gmra.mxu1 %vm1204_vm4, %v1200_v27 }
 0x527   :  { %v1228_v8 = vpop.f32.mrf.mxu1 }
 0x528   :  { %vm1234_vm7 = vcmp.gt.f32.partialorder %v1228_v8, 0.0  ;;  %v1236_v62 = vmul.f32 0.2, %v1228_v8 }
 0x52a   :  { %v1238_v60 = vsel %vm1234_vm7, %v1228_v8, %v1236_v62 }
 0x52b   :  { %1242 = vrot.lane.b32.xlu2 %v1238_v60, %s1931_s4  ;;  %1250 = vrot.lane.b32.xlu1 %v1238_v60, %s1932_s0 }
 0x547   :  { %v1231_v2 = vpop.f32.mrf.mxu1 }
 0x548   :  { %vm1235_vm1 = vcmp.gt.f32.partialorder %v1231_v2, 0.0  ;;  %v1237_v26 = vmul.f32 0.2, %v1231_v2 }
 0x54a   :  { %v2741_v19 = vsel %vm1235_vm1, %v1231_v2, %v1237_v26 }
 0x54b   :  { %1252 = vrot.lane.b32.xlu2 %v2741_v19, %s1932_s0  ;;  %1244 = vrot.lane.b32.xlu0 %v2741_v19, %s1931_s4 }
 0x585   :  { %v1243_v24 = vpop.permute.xlu2 %1242 }
 0x586   :  { %v1248_v44 = vmax.f32 %v1238_v60, %v1243_v24 }
 0x59d   :  { %v1251_v46 = vpop.permute.xlu1 %1250 }
 0x59e   :  { %v1256_v34 = vmax.f32 %v1248_v44, %v1251_v46 }
 0x5a0   :  { %1278 = vrot.lane.b32.xlu0 %v1256_v34, %s1929_s2  ;;  %1266 = vrot.lane.b32.xlu1 %v1256_v34, %s1933_s12  ;;  %v1258_v29 = vsub.f32 %v1238_v60, %v1256_v34 }
 0x5a2   :  { %v1260_v15 = vmul.f32 1.442695, %v1258_v29 }
 0x5a5   :  { %v1253_v47 = vpop.permute.xlu2 %1252 }
 0x5bd   :  { %v1245_v52 = vpop.permute.xlu0 %1244 }
 0x5be   :  { %v1249_v23 = vmax.f32 %v2741_v19, %v1245_v52 }
 0x5c0   :  { %v1257_v3 = vmax.f32 %v1249_v23, %v1253_v47 }
 0x5c2   :  { %1268 = vrot.lane.b32.xlu2 %v1257_v3, %s1933_s12  ;;  %1280 = vrot.lane.b32.xlu1 %v1257_v3, %s1929_s2  ;;  %v1259_v43 = vsub.f32 %v2741_v19, %v1257_v3 }
 0x5c4   :  { %v1262_v58 = vmul.f32 1.442695, %v1259_v43 }
 0x612   :  { %v1279_v35 = vpop.permute.xlu0 %1278  ;;  %v1267_v55 = vpop.permute.xlu1 %1266 }
 0x613   :  { %v1284_v40 = vsub.f32 %v1238_v60, %v1279_v35  ;;  %v1272_v33 = vsub.f32 %v1238_v60, %v1267_v55 }
 0x615   :  { %v1286_v54 = vmul.f32 1.442695, %v1284_v40  ;;  %v1274_v22 = vmul.f32 1.442695, %v1272_v33 }
 0x617   :  { %1903 = vpow2.f32 %v1286_v54 }
 0x618   :  { %1905 = vpow2.f32 %v1274_v22 }
 0x61c   :  { %v1269_v11 = vpop.permute.xlu2 %1268 }
 0x61d   :  { %v2752_v5 = vpop.eup %1903  ;;  %v1273_v37 = vsub.f32 %v2741_v19, %v1269_v11 }
 0x61e   :  { %v2755_v10 = vpop.eup %1905  ;;  %1302 = vrot.lane.b32.xlu2 %v2752_v5, %s1932_s0 }
 0x61f   :  { %v1276_v28 = vmul.f32 1.442695, %v1273_v37  ;;  %1292 = vrot.lane.b32.xlu0 %v2755_v10, %s1931_s4 }
 0x621   :  { %1907 = vpow2.f32 %v1276_v28 }
 0x627   :  { %v2761_v39 = vpop.eup %1907 }
 0x628   :  { %1294 = vrot.lane.b32.xlu1 %v2761_v39, %s1931_s4 }
 0x634   :  { %v1281_v32 = vpop.permute.xlu1 %1280 }
 0x635   :  { %v1285_v7 = vsub.f32 %v2741_v19, %v1281_v32 }
 0x637   :  { %v1288_v13 = vmul.f32 1.442695, %v1285_v7 }
 0x639   :  { %1909 = vpow2.f32 %v1288_v13 }
 0x63a   :  { %1911 = vpow2.f32 %v1260_v15 }
 0x63f   :  { %v2766_v31 = vpop.eup %1909 }
 0x640   :  { %1304 = vrot.lane.b32.xlu0 %v2766_v31, %s1932_s0  ;;  %v1912_v51 = vpop.eup %1911 }
 0x678   :  { %v1303_v50 = vpop.permute.xlu2 %1302 }
 0x691   :  { %v1293_v53 = vpop.permute.xlu0 %1292 }
 0x692   :  { %v1298_v57 = vadd.f32 %v1912_v51, %v1293_v53  ;;  %v1477_v53 = vld [vmem:[%s2893_s6 + $0x30] sm:$0xff] }
 0x694   :  { %v1308_v17 = vadd.f32 %v1303_v50, %v1298_v57  ;;  %v1476_v57 = vld [vmem:[%s2893_s6 + $0x28] sm:$0xff]  ;;  %v1475_v50 = vld [vmem:[%s2893_s6 + $0x20] sm:$0xff] }
 0x696   :  { %1913 = vrcp.f32 %v1308_v17  ;;  %v1321_v21 = vand.u32 2147483648, %v1308_v17  ;;  %v1319_v45 = vand.u32 2147483647, %v1308_v17  ;;  %vm1315_vm5 = vweird.f32 %v1308_v17 }
 0x697   :  { %1915 = vpow2.f32 %v1262_v58 }
 0x698   :  { %v1322_v18 = vor.u32 1.1754944e-38, %v1321_v21  ;;  %vm1320_vm3 = vcmp.eq.f32.partialorder %v1319_v45, 8.507059e+37 }
 0x69a   :  { %v1295_v12 = vpop.permute.xlu1 %1294 }
 0x69c   :  { %v1914_v61 = vpop.eup %1913 }
 0x69d   :  { %v1311_v36 = vmul.f32 %v1914_v61, %v1308_v17  ;;  %vm1316_vm2 = vweird.f32 %v1914_v61  ;;  %v1916_v59 = vpop.eup %1915  ;;  %v1474_v17 = vld [vmem:[%s2893_s6 + $0x18] sm:$0xff] }
 0x69e   :  { %vm1317_vm10 = vmor %vm1315_vm5, %vm1316_vm2  ;;  %v1299_v16 = vadd.f32 %v1916_v59, %v1295_v12 }
 0x69f   :  { %v1312_v41 = vsub.f32 1.0, %v1311_v36  ;;  %v1472_v36 = vld [vmem:[%s2893_s6 + $0x8] sm:$0xff] }
 0x6a1   :  { %v1313_v25 = vmul.f32 %v1914_v61, %v1312_v41  ;;  %v1471_v41 = vld [vmem:[%s2893_s6] sm:$0xff] }
 0x6a3   :  { %v1314_v48 = vadd.f32 %v1914_v61, %v1313_v25 }
 0x6a5   :  { %v1318_v49 = vsel %vm1317_vm10, %v1914_v61, %v1314_v48  ;;  %v1473_v61 = vld [vmem:[%s2893_s6 + $0x10] sm:$0xff] }
 0x6a6   :  { %v1323_v38 = vsel %vm1320_vm3, %v1322_v18, %v1318_v49 }
 0x6a7   :  { %1381 = vrot.lane.b32.xlu1 %v1323_v38, %s1933_s12  ;;  %v1340_v56 = vmul.f32 %v1912_v51, %v1323_v38  ;;  %1426 = vrot.lane.b32.xlu2 %v1323_v38, %s1929_s2  ;;  %v1478_v51 = vld [vmem:[%s2893_s6 + $0x38] sm:$0xf]  ;;  %s1940_s6 = smov 15  }
 0x6a8   :  { %1849 = vmatpush.msk.msra.mxu1 %vm167_vm15, %v1478_v51 }
 0x6a9   :  { %1841 = vmatmul.msk.f32.vlgmr.msrb.gmra.mxu3 %vm259_vm11, %v1340_v56 }
 0x6aa   :  { %1864 = vmatpush.msk.msrb.mxu3 %vm167_vm15, %v2773_v42  ;;  %1497 = vmatpush.msra.mxu1 %v1477_v53 }
 0x6ac   :  { %1498 = vmatpush.msra.mxu1 %v1476_v57 }
 0x6ae   :  { %1499 = vmatpush.msra.mxu1 %v1475_v50 }
 0x6b0   :  { %1500 = vmatpush.msra.mxu1 %v1474_v17 }
 0x6b2   :  { %v1305_v1 = vpop.permute.xlu0 %1304  ;;  %1501 = vmatpush.msra.mxu1 %v1473_v61 }
 0x6b3   :  { %v1309_v14 = vadd.f32 %v1305_v1, %v1299_v16 }
 0x6b4   :  { %1502 = vmatpush.msra.mxu1 %v1472_v36 }
 0x6b5   :  { %1917 = vrcp.f32 %v1309_v14  ;;  %v1336_v62 = vand.u32 2147483648, %v1309_v14  ;;  %v1334_v2 = vand.u32 2147483647, %v1309_v14  ;;  %vm1330_vm13 = vweird.f32 %v1309_v14 }
 0x6b6   :  { %1503 = vmatpush.msra.mxu1 %v1471_v41 }
 0x6b7   :  { %v1337_v19 = vor.u32 1.1754944e-38, %v1336_v62  ;;  %vm1335_vm12 = vcmp.eq.f32.partialorder %v1334_v2, 8.507059e+37 }
 0x6b8   :  { %1861 = vmatpush.msk.msrb.mxu1 %vm167_vm15, %v1478_v51 }
 0x6ba   :  { %1631 = vmatpush.msrb.mxu1 %v1477_v53 }
 0x6bb   :  { %v1918_v6 = vpop.eup %1917 }
 0x6bc   :  { %v1326_v27 = vmul.f32 %v1918_v6, %v1309_v14  ;;  %vm1331_vm0 = vweird.f32 %v1918_v6  ;;  %1632 = vmatpush.msrb.mxu1 %v1476_v57 }
 0x6bd   :  { %vm1332_vm9 = vmor %vm1330_vm13, %vm1331_vm0 }
 0x6be   :  { %v1327_v8 = vsub.f32 1.0, %v1326_v27  ;;  %1633 = vmatpush.msrb.mxu1 %v1475_v50 }
 0x6c0   :  { %v1328_v60 = vmul.f32 %v1918_v6, %v1327_v8  ;;  %1634 = vmatpush.msrb.mxu1 %v1474_v17 }
 0x6c2   :  { %v1329_v26 = vadd.f32 %v1918_v6, %v1328_v60  ;;  %1635 = vmatpush.msrb.mxu1 %v1473_v61 }
 0x6c4   :  { %v1333_v24 = vsel %vm1332_vm9, %v1918_v6, %v1329_v26  ;;  %1636 = vmatpush.msrb.mxu1 %v1472_v36 }
 0x6c5   :  { %v1338_v44 = vsel %vm1335_vm12, %v1337_v19, %v1333_v24 }
 0x6c6   :  { %1428 = vrot.lane.b32.xlu0 %v1338_v44, %s1929_s2  ;;  %1383 = vrot.lane.b32.xlu2 %v1338_v44, %s1933_s12  ;;  %v1341_v46 = vmul.f32 %v1916_v59, %v1338_v44 }
 0x6c7   :  { %1637 = vmatpush.msrb.mxu1 %v1471_v41 }
 0x6c8   :  { %1842 = vmatmul.msk.f32.gmra.mxu3 %vm259_vm11, %v1341_v46 }
 0x701   :  { %v1427_v34 = vpop.permute.xlu2 %1426 }
 0x702   :  { %v1432_v52 = vmul.f32 %v2752_v5, %v1427_v34 }
 0x704   :  { %1436 = vrot.lane.b32.xlu1 %v1432_v52, %s1932_s0 }
 0x719   :  { %v1382_v23 = vpop.permute.xlu1 %1381 }
 0x71a   :  { %v1387_v47 = vmul.f32 %v2755_v10, %v1382_v23 }
 0x71c   :  { %1391 = vrot.lane.b32.xlu0 %v1387_v47, %s1931_s4 }
 0x720   :  { %v1384_v3 = vpop.permute.xlu2 %1383 }
 0x721   :  { %v1388_v35 = vmul.f32 %v2761_v39, %v1384_v3 }
 0x723   :  { %1393 = vrot.lane.b32.xlu1 %v1388_v35, %s1931_s4 }
 0x724   :  { %1511 = vrot.lane.b32.xlu0 %v1340_v56, %s1934_s5 }
 0x72b   :  { %1546 = vrot.lane.b32.xlu1 %v1387_v47, %s1935_s15 }
 0x72c   :  { %1513 = vrot.lane.b32.xlu0 %v1341_v46, %s1934_s5  ;;  %v1369_v21 = vpop.f32.mrf.mxu3 }
 0x72d   :  { %v1375_v43 = vmul.f32 %v1369_v21, %v2704_v63 }
 0x733   :  { %1548 = vrot.lane.b32.xlu1 %v1388_v35, %s1935_s15 }
 0x734   :  { %1645 = vrot.lane.b32.xlu0 %v1340_v56, %s1936_s16 }
 0x738   :  { %v1429_v55 = vpop.permute.xlu0 %1428 }
 0x739   :  { %v1433_v40 = vmul.f32 %v2766_v31, %v1429_v55 }
 0x73b   :  { %1438 = vrot.lane.b32.xlu2 %v1433_v40, %s1932_s0  ;;  %1680 = vrot.lane.b32.xlu1 %v1387_v47, %s1937_s17 }
 0x73c   :  { %1647 = vrot.lane.b32.xlu0 %v1341_v46, %s1936_s16 }
 0x743   :  { %1581 = vrot.lane.b32.xlu2 %v1432_v52, %s1938_s18  ;;  %1682 = vrot.lane.b32.xlu1 %v1388_v35, %s1937_s17 }
 0x74b   :  { %1583 = vrot.lane.b32.xlu2 %v1433_v40, %s1938_s18  ;;  %v1372_v38 = vpop.f32.mrf.mxu3 }
 0x74c   :  { %v1376_v59 = vmul.f32 %v1372_v38, %v2708_v9 }
 0x753   :  { %1715 = vrot.lane.b32.xlu2 %v1432_v52, %s1939_s19 }
 0x75b   :  { %1717 = vrot.lane.b32.xlu2 %v1433_v40, %s1939_s19 }
 0x776   :  { %v1437_v33 = vpop.permute.xlu1 %1436 }
 0x777   :  { %1847 = vmatmul.msk.f32.vlgmr.msra.gmra.mxu2 %vm259_vm11, %v1437_v33 }
 0x778   :  { %1870 = vmatpush.msk.msra.mxu2 %vm167_vm15, %v2773_v42 }
 0x78e   :  { %v1392_v54 = vpop.permute.xlu0 %1391 }
 0x78f   :  { %1844 = vmatmul.msk.f32.vlgmr.msra.gmra.mxu0 %vm259_vm11, %v1392_v54 }
 0x790   :  { %1867 = vmatpush.msk.msra.mxu0 %vm167_vm15, %v2773_v42 }
 0x795   :  { %v1394_v22 = vpop.permute.xlu1 %1393  ;;  %v1439_v11 = vpop.permute.xlu2 %1438 }
 0x796   :  { %v1512_v5 = vpop.permute.xlu0 %1511  ;;  %1848 = vmatmul.msk.f32.gmra.mxu2 %vm259_vm11, %v1439_v11 }
 0x797   :  { %1845 = vmatmul.msk.f32.gmra.mxu0 %vm259_vm11, %v1394_v22  ;;  %1853 = vmatmul.msk.f32.vlgmr.msra.gmra.mxu3 %vm259_vm11, %v1512_v5 }
 0x798   :  { %1876 = vmatpush.msk.msra.mxu3 %vm167_vm15, %v1478_v51 }
 0x79a   :  { %1877 = vmatpush.msra.mxu3 %v1477_v53 }
 0x79c   :  { %1878 = vmatpush.msra.mxu3 %v1476_v57 }
 0x79d   :  { %v1547_v37 = vpop.permute.xlu1 %1546  ;;  %v1582_v10 = vpop.permute.xlu2 %1581 }
 0x79e   :  { %v1514_v28 = vpop.permute.xlu0 %1513  ;;  %1859 = vmatmul.msk.f32.vlgmr.msrb.gmra.mxu2 %vm259_vm11, %v1582_v10  ;;  %1879 = vmatpush.msra.mxu3 %v1475_v50 }
 0x79f   :  { %1854 = vmatmul.msk.f32.gmra.mxu3 %vm259_vm11, %v1514_v28  ;;  %1856 = vmatmul.msk.f32.vlgmr.msrb.gmra.mxu0 %vm259_vm11, %v1547_v37 }
 0x7a0   :  { %1880 = vmatpush.msra.mxu3 %v1474_v17 }
 0x7a2   :  { %1881 = vmatpush.msra.mxu3 %v1473_v61 }
 0x7a4   :  { %1882 = vmatpush.msra.mxu3 %v1472_v36 }
 0x7a5   :  { %v1549_v39 = vpop.permute.xlu1 %1548  ;;  %v1584_v32 = vpop.permute.xlu2 %1583 }
 0x7a6   :  { %v1646_v7 = vpop.permute.xlu0 %1645  ;;  %1860 = vmatmul.msk.f32.gmra.mxu2 %vm259_vm11, %v1584_v32  ;;  %1883 = vmatpush.msra.mxu3 %v1471_v41 }
 0x7a7   :  { %1857 = vmatmul.msk.f32.gmra.mxu0 %vm259_vm11, %v1549_v39  ;;  %1865 = vmatmul.msk.f32.vlgmr.msrb.gmra.mxu3 %vm259_vm11, %v1646_v7 }
 0x7ad   :  { %v1681_v13 = vpop.permute.xlu1 %1680  ;;  %v1716_v31 = vpop.permute.xlu2 %1715 }
 0x7ae   :  { %v1648_v29 = vpop.permute.xlu0 %1647  ;;  %1871 = vmatmul.msk.f32.vlgmr.msra.gmra.mxu2 %vm259_vm11, %v1716_v31 }
 0x7af   :  { %1866 = vmatmul.msk.f32.gmra.mxu3 %vm259_vm11, %v1648_v29  ;;  %1868 = vmatmul.msk.f32.vlgmr.msra.gmra.mxu0 %vm259_vm11, %v1681_v13 }
 0x7b5   :  { %v1683_v15 = vpop.permute.xlu1 %1682  ;;  %v1718_v42 = vpop.permute.xlu2 %1717 }
 0x7b6   :  { %1872 = vmatmul.msk.f32.gmra.mxu2 %vm259_vm11, %v1718_v42 }
 0x7b7   :  { %1869 = vmatmul.msk.f32.gmra.mxu0 %vm259_vm11, %v1683_v15  ;;  %vm2968_vm11 = vcmask 121856  }
 0x7b8   :  { %vm2969_vm14 = vmmov %vm2968_vm11 }
 0x7fa   :  { %v1461_v25 = vpop.f32.mrf.mxu2 }
 0x7fb   :  { %v1467_v18 = vmul.f32 %v1461_v25, %v2720_v0 }
 0x80c   :  { %v1416_v45 = vpop.f32.mrf.mxu0 }
 0x80d   :  { %v1422_v48 = vmul.f32 %v1416_v45, %v2712_v30 }
 0x80f   :  { %v1424_v49 = vadd.f32 %v1422_v48, %v1375_v43 }
 0x811   :  { %v1469_v58 = vadd.f32 %v1467_v18, %v1424_v49 }
 0x813   :  { %1850 = vmatmul.msk.f32.vlgmr.msra.gmra.mxu1 %vm472_vm8, %v1469_v58 }
 0x814   :  { %v1419_v56 = vpop.f32.mrf.mxu0  ;;  %1873 = vmatpush.msk.msra.mxu1 %vm167_vm15, %v1478_v51  ;;  %vm1797_vm15 = vcmask 244736  }
 0x815   :  { %v1423_v12 = vmul.f32 %v1419_v56, %v2716_v20 }
 0x816   :  { %1765 = vmatpush.msra.mxu1 %v1477_v53 }
 0x817   :  { %v1425_v1 = vadd.f32 %v1423_v12, %v1376_v59 }
 0x818   :  { %1766 = vmatpush.msra.mxu1 %v1476_v57 }
 0x819   :  { %v1464_v16 = vpop.f32.mrf.mxu2 }
 0x81a   :  { %v1468_v14 = vmul.f32 %v1464_v16, %v2724_v4  ;;  %v1536_v6 = vpop.f32.mrf.mxu3  ;;  %1767 = vmatpush.msra.mxu1 %v1475_v50 }
 0x81b   :  { %v1542_v60 = vmul.f32 %v1536_v6, %v2704_v63 }
 0x81c   :  { %v1470_v27 = vadd.f32 %v1468_v14, %v1425_v1  ;;  %v1571_v8 = vpop.f32.mrf.mxu0  ;;  %1768 = vmatpush.msra.mxu1 %v1474_v17 }
 0x81d   :  { %v1577_v62 = vmul.f32 %v1571_v8, %v2712_v30 }
 0x81e   :  { %1851 = vmatmul.msk.f32.gmra.mxu1 %vm472_vm8, %v1470_v27 }
 0x81f   :  { %1769 = vmatpush.msra.mxu1 %v1473_v61  ;;  %v1579_v26 = vadd.f32 %v1577_v62, %v1542_v60 }
 0x821   :  { %v1606_v2 = vpop.f32.mrf.mxu2  ;;  %1770 = vmatpush.msra.mxu1 %v1472_v36 }
 0x822   :  { %v1539_v19 = vpop.f32.mrf.mxu3  ;;  %v1612_v24 = vmul.f32 %v1606_v2, %v2720_v0 }
 0x823   :  { %1771 = vmatpush.msra.mxu1 %v1471_v41  ;;  %v1543_v52 = vmul.f32 %v1539_v19, %v2708_v9 }
 0x824   :  { %v1614_v44 = vadd.f32 %v1612_v24, %v1579_v26  ;;  %v1574_v46 = vpop.f32.mrf.mxu0 }
 0x825   :  { %v1578_v34 = vmul.f32 %v1574_v46, %v2716_v20 }
 0x826   :  { %1862 = vmatmul.msk.f32.vlgmr.msrb.gmra.mxu1 %vm472_vm8, %v1614_v44 }
 0x827   :  { %v1580_v47 = vadd.f32 %v1578_v34, %v1543_v52 }
 0x829   :  { %v1609_v23 = vpop.f32.mrf.mxu2 }
 0x82a   :  { %v1613_v3 = vmul.f32 %v1609_v23, %v2724_v4  ;;  %v1670_v35 = vpop.f32.mrf.mxu3 }
 0x82b   :  { %v1676_v54 = vmul.f32 %v1670_v35, %v2704_v63 }
 0x82c   :  { %v1615_v55 = vadd.f32 %v1613_v3, %v1580_v47  ;;  %v1705_v40 = vpop.f32.mrf.mxu0 }
 0x82d   :  { %v1711_v33 = vmul.f32 %v1705_v40, %v2712_v30 }
 0x82e   :  { %1863 = vmatmul.msk.f32.gmra.mxu1 %vm472_vm8, %v1615_v55 }
 0x82f   :  { %v1713_v11 = vadd.f32 %v1711_v33, %v1676_v54 }
 0x831   :  { %v1740_v22 = vpop.f32.mrf.mxu2 }
 0x832   :  { %v1746_v5 = vmul.f32 %v1740_v22, %v2720_v0  ;;  %v1673_v28 = vpop.f32.mrf.mxu3 }
 0x833   :  { %v1677_v32 = vmul.f32 %v1673_v28, %v2708_v9 }
 0x834   :  { %v1748_v37 = vadd.f32 %v1746_v5, %v1713_v11  ;;  %v1708_v10 = vpop.f32.mrf.mxu0 }
 0x835   :  { %v1712_v39 = vmul.f32 %v1708_v10, %v2716_v20 }
 0x836   :  { %1874 = vmatmul.msk.f32.vlgmr.msra.gmra.mxu1 %vm472_vm8, %v1748_v37 }
 0x837   :  { %v1714_v13 = vadd.f32 %v1712_v39, %v1677_v32 }
 0x839   :  { %v1743_v7 = vpop.f32.mrf.mxu2 }
 0x83a   :  { %v1747_v30 = vmul.f32 %v1743_v7, %v2724_v4  ;;  %v1902_v4 = vld [vmem:[%s2894_s7] ss:$0 sm:$0xff] }
 0x83c   :  { %v1749_v31 = vadd.f32 %v1747_v30, %v1714_v13 }
 0x83e   :  { %1875 = vmatmul.msk.f32.vlgmr.msra.gmra.mxu3 %vm472_vm8, %v1749_v31  ;;  %vm1808_vm8 = vcmask 367616  }
 0x890   :  { %v1505_v63 = vpop.f32.mrf.mxu1 }
 0x89b   :  { %v1508_v29 = vpop.f32.mrf.mxu1 }
 0x8a3   :  { %v1639_v15 = vpop.f32.mrf.mxu1 }
 0x8a4   :  { %1781 = vrot.lane.b32.xlu0 %v1639_v15, %s1940_s6 }
 0x8ab   :  { %v1642_v0 = vpop.f32.mrf.mxu1 }
 0x8ac   :  { %1783 = vrot.lane.b32.xlu2 %v1642_v0, %s1940_s6 }
 0x8b3   :  { %v1773_v42 = vpop.f32.mrf.mxu1 }
 0x8b4   :  { %1789 = vrot.lane.b32.xlu1 %v1773_v42, %s1941_s11 }
 0x8c1   :  { %v1776_v20 = vpop.f32.mrf.mxu3 }
 0x8c2   :  { %1791 = vrot.lane.b32.xlu0 %v1776_v20, %s1941_s11 }
 0x906   :  { %v1784_v61 = vpop.permute.xlu2 %1783 }
 0x907   :  { %v1796_v36 = vsel %vm2969_vm14, %v1508_v29, %v1784_v61 }
 0x916   :  { %v1782_v9 = vpop.permute.xlu0 %1781 }
 0x917   :  { %v1795_v51 = vsel %vm2968_vm11, %v1505_v63, %v1782_v9 }
 0x926   :  { %v1790_v53 = vpop.permute.xlu1 %1789 }
 0x927   :  { %v1798_v57 = vsel %vm1797_vm15, %v1795_v51, %v1790_v53 }
 0x928   :  { %v1804_v50 = vadd.f32 %v1902_v4, %v1798_v57 }
 0x92a   :  { %v1806_v17 = vmax.f32 %v1804_v50, 0.0 }
 0x92c   :  { %1809 = vst.msk [vmem:[%s2895_s8] sm:$0xff] %vm1808_vm8, %v1806_v17 }
 0x934   :  { %v1792_v41 = vpop.permute.xlu0 %1791 }
 0x935   :  { %v1799_v21 = vsel %vm1797_vm15, %v1796_v36, %v1792_v41 }
 0x936   :  { %v1805_v25 = vadd.f32 %v1902_v4, %v1799_v21 }
 0x938   :  { %v1807_v45 = vmax.f32 %v1805_v25, 0.0 }
 0x93a   :  { %1811 = vst.msk [vmem:[%s2895_s8 + $0x8] sm:$0xf] %vm1810_vm6, %v1807_v45 }

</bundles_post_ra>
